<compile_context>
chip_gen: v7x
topology: tpu7x:2x2x1
jax: 0.10.0
libtpu: 0.0.40
codegen_flags: <defaults>
</compile_context>

<pallas_src>
import functools
import math

import jax
import jax.numpy as jnp
from jax.experimental import pallas as pl
from jax.experimental.pallas import tpu as pltpu

# ---------------- hyper-parameters (mirror dilated_CNN.__init__) -------------
SEQ_LEN = 208              # args.use_days
L_PAD = 256                # SEQ_LEN rounded up to a lane multiple
N_DYN_FEA = 4
N_FILTERS = 3
KERNEL_SIZE = 2
MAX_DEPT_ID = 7
MAX_CAT_ID = 3
EMB0_DIM = math.ceil(math.log(MAX_DEPT_ID + 1))   # 3
EMB1_DIM = math.ceil(math.log(MAX_CAT_ID + 1))    # 2
N_CONV_OUT = 8
N_OUTPUTS = 28
DENSE0_IN = N_CONV_OUT * SEQ_LEN + EMB0_DIM + EMB1_DIM   # 1669
DENSE0_OUT = 56
assert DENSE0_IN == 1669

# ---------------- per-generation tuning --------------------------------------
def _tpu_kind():
    try:
        return jax.devices()[0].device_kind.lower().replace(" ", "")
    except Exception:  # pragma: no cover
        return ""

_KIND = _tpu_kind()
_IS_V7 = ("v7" in _KIND) or ("tpu7" in _KIND)
_IS_V6 = ("v6" in _KIND) or ("tpu6" in _KIND)
_IS_V5 = ("v5" in _KIND) or ("tpu5" in _KIND)

# bf16 VALUs exist on v6e/v7x only; keep the slab math in f32 on v5e/older.
_USE_BF16_VPU = _IS_V6 or _IS_V7
_COMPUTE_DTYPE = jnp.bfloat16 if _USE_BF16_VPU else jnp.float32
# Batch-tile cap & scoped-VMEM limit (v7x has 64 MiB physical VMEM per TC).
if _IS_V7:
    _MAX_TILE, _VMEM_LIMIT = 512, 48 << 20
elif _IS_V5 or _IS_V6:
    _MAX_TILE, _VMEM_LIMIT = 1024, 96 << 20
else:
    _MAX_TILE, _VMEM_LIMIT = 256, None   # conservative fallback


# ---------------- fused Pallas kernel -----------------------------------------
def _fused_kernel(wsm_ref, x_ref, eb_ref, w0f_ref, w1_ref, b1_ref, o_ref,
                  flat_ref, *, compute_dtype):
    # wsm_ref : SMEM f32[146]                 packed conv weights/biases (scalar reads)
    # x_ref   : VMEM f32[4, BT, 256]          input, channel-major (batch on sublanes)
    # eb_ref  : VMEM f32[BT, 56]              b0 + e0 @ w0_e0 + e1 @ w0_e1
    # w0f_ref : VMEM bf16[8*256, 56]          conv part of dense0 weight (time rows 208..255 zero)
    # w1_ref  : VMEM bf16[56, 28], b1_ref : VMEM f32[1, 28]
    # o_ref   : VMEM f32[BT, 28]
    # flat_ref: VMEM bf16[BT, 8*256] scratch  flattened relu'd conv_out (dense0 LHS)
    cdt = compute_dtype
    bt = x_ref.shape[1]

    # Hoisted 0/1 causal masks, one per dilation (mask[t] = 0 for t < d).
    lane = jax.lax.broadcasted_iota(jnp.int32, (bt, L_PAD), 1)
    masks = {d: (lane >= d).astype(cdt) for d in (1, 2, 4, 8)}

    def causal_shift(v, d):
        # out[:, t] = v[:, t-d] for t >= d, 0 otherwise (roll-wrap lands in masked lanes).
        return pltpu.roll(v, shift=d, axis=1) * masks[d]

    off = [0]

    def take(n):
        base = off[0]
        off[0] += n
        return base

    def conv_layer(inputs, c_in, c_out, dilation):
        # CausalConv1d(kernel_size=2, dilation=d) + ReLU, unrolled over channels
        # as scalar-broadcast FMAs on [BT, L_PAD] slabs (pure VPU work in cdt).
        w_base = take(c_out * c_in * KERNEL_SIZE)
        b_base = take(c_out)
        shifted = [causal_shift(v, dilation) for v in inputs]
        outs = []
        for o in range(c_out):
            acc = None
            for c in range(c_in):
                w_old = wsm_ref[w_base + (o * c_in + c) * KERNEL_SIZE + 0].astype(cdt)  # tap @ x[t-d]
                w_cur = wsm_ref[w_base + (o * c_in + c) * KERNEL_SIZE + 1].astype(cdt)  # tap @ x[t]
                term = w_old * shifted[c] + w_cur * inputs[c]
                acc = term if acc is None else acc + term
            outs.append(jnp.maximum(acc + wsm_ref[b_base + o].astype(cdt), 0.0))
        return outs

    xs = [x_ref[c].astype(cdt) for c in range(N_DYN_FEA)]
    h0 = conv_layer(xs, N_DYN_FEA, N_FILTERS, 1)
    h1 = conv_layer(h0, N_FILTERS, N_FILTERS, 2)
    h2 = conv_layer(h1, N_FILTERS, N_FILTERS, 4)
    h3 = conv_layer(h2, N_FILTERS, N_FILTERS, 8)

    # conv1d_out: kernel_size=1 over cat((h0, h3), channel); Dropout(0.1) and the
    # extra relu(dropout)/relu(flatten) are identities in eval.
    cat_ch = h0 + h3                                  # list concat: 6 channel slabs
    wo_base = take(N_CONV_OUT * 2 * N_FILTERS)
    bo_base = take(N_CONV_OUT)
    for o in range(N_CONV_OUT):
        co = None
        for c in range(2 * N_FILTERS):
            term = wsm_ref[wo_base + o * (2 * N_FILTERS) + c].astype(cdt) * cat_ch[c]
            co = term if co is None else co + term
        co = jnp.maximum(co + wsm_ref[bo_base + o].astype(cdt), 0.0)   # conv_out[:, o, :]
        flat_ref[:, o * L_PAD:(o + 1) * L_PAD] = co.astype(jnp.bfloat16)

    # Dense head: one K=2048 bf16 MXU matmul with f32 accumulation.  Padded time
    # lanes / relu(bias) garbage multiply zero rows of w0f so they contribute 0.
    acc = jnp.dot(flat_ref[...], w0f_ref[...],
                  preferred_element_type=jnp.float32) + eb_ref[...]     # [BT, 56]
    h = jnp.maximum(acc, 0.0).astype(jnp.bfloat16)
    o_ref[...] = (jnp.dot(h, w1_ref[...], preferred_element_type=jnp.float32)
                  + b1_ref[...])                                        # [BT, 28]


# ---------------- wrapper ------------------------------------------------------
def _round_up(x, m):
    return ((x + m - 1) // m) * m


def _choose_tile(B):
    # Smallest multiple-of-8 tile that keeps batch padding low, capped per chip;
    # >= 2 grid steps on v7x so both TensorCores get work ("parallel" axis).
    n_tiles = max(1, -(-B // _MAX_TILE))
    if _IS_V7 and B > 8 and n_tiles < 2:
        n_tiles = 2
    b_tile = _round_up(-(-B // n_tiles), 8)
    return b_tile, n_tiles


@jax.jit
def forward(seq_in, cat_fea_in, p):
    B = seq_in.shape[0]
    # Embedding lookups (tiny gathers) + the 3/2-row slices of w0 stay in plain
    # JAX, folded with b0 into one [B, 56] additive term for the kernel.
    e0 = jnp.take(p['emb0'], cat_fea_in[:, 0], axis=0)            # [B, 3]
    e1 = jnp.take(p['emb1'], cat_fea_in[:, 1], axis=0)            # [B, 2]
    e_bias = e0 @ p['w0_e0'] + e1 @ p['w0_e1'] + p['b0']          # [B, 56]

    b_tile, n_tiles = _choose_tile(B)
    b_pad = b_tile * n_tiles

    # TODO(synk): the transpose below is the only pre-kernel HBM pass; it goes
    # away entirely if the caller provides channel-major [4, B, L] activations.
    x = jnp.transpose(seq_in, (1, 0, 2))                          # [C, B, L]
    x = jnp.pad(x, ((0, 0), (0, b_pad - B), (0, L_PAD - SEQ_LEN)))
    e_bias = jnp.pad(e_bias, ((0, b_pad - B), (0, 0)))

    kernel = functools.partial(_fused_kernel, compute_dtype=_COMPUTE_DTYPE)
    cp = dict(dimension_semantics=("parallel",))
    if _VMEM_LIMIT is not None:
        cp["vmem_limit_bytes"] = _VMEM_LIMIT

    out = pl.pallas_call(
        kernel,
        out_shape=jax.ShapeDtypeStruct((b_pad, N_OUTPUTS), jnp.float32),
        grid=(n_tiles,),
        in_specs=[
            pl.BlockSpec(memory_space=pltpu.MemorySpace.SMEM),              # packed conv scalars
            pl.BlockSpec((N_DYN_FEA, b_tile, L_PAD), lambda b: (0, b, 0)),  # input
            pl.BlockSpec((b_tile, DENSE0_OUT), lambda b: (b, 0)),           # emb/bias term
            pl.BlockSpec((N_CONV_OUT * L_PAD, DENSE0_OUT), lambda b: (0, 0)),  # w0 conv part (bf16)
            pl.BlockSpec((DENSE0_OUT, N_OUTPUTS), lambda b: (0, 0)),        # w1 (bf16)
            pl.BlockSpec((1, N_OUTPUTS), lambda b: (0, 0)),                 # b1
        ],
        out_specs=pl.BlockSpec((b_tile, N_OUTPUTS), lambda b: (b, 0)),
        scratch_shapes=[pltpu.VMEM((b_tile, N_CONV_OUT * L_PAD), jnp.bfloat16)],
        compiler_params=pltpu.CompilerParams(**cp),
    )(p['wsm'], x, e_bias, p['w0_flat'], p['w1_bf16'], p['b1'])
    return out[:B]


# ---------------- pure-JAX reference (for self-check) -------------------------
def ref_forward(seq_in, cat_fea_in, p):
    def shift(x, d):
        return jnp.pad(x, ((0, 0), (0, 0), (d, 0)))[:, :, : x.shape[-1]]

    def cconv(x, w, b, d):
        y = (jnp.einsum('oc,bcl->bol', w[:, :, 0], shift(x, d))
             + jnp.einsum('oc,bcl->bol', w[:, :, 1], x)
             + b[None, :, None])
        return jax.nn.relu(y)

    h0 = cconv(seq_in, p['w_c1'], p['b_c1'], 1)
    h1 = cconv(h0, p['w_d0'], p['b_d0'], 2)
    h2 = cconv(h1, p['w_d1'], p['b_d1'], 4)
    h3 = cconv(h2, p['w_d2'], p['b_d2'], 8)
    c = jnp.concatenate([h0, h3], axis=1)
    co = jax.nn.relu(jnp.einsum('oc,bcl->bol', p['w_out'][:, :, 0], c)
                     + p['b_out'][None, :, None])
    flat = co.reshape(co.shape[0], -1)
    e0 = jnp.take(p['emb0'], cat_fea_in[:, 0], axis=0)
    e1 = jnp.take(p['emb1'], cat_fea_in[:, 1], axis=0)
    x = jnp.concatenate([flat, e0, e1], axis=1)
    x = jax.nn.relu(x @ p['w0'] + p['b0'])
    return x @ p['w1'] + p['b1']


# ---------------- deterministic parameter init --------------------------------
def init_params(key):
    ks = jax.random.split(key, 16)

    def nrm(k, shape, scale=0.1):
        return (scale * jax.random.normal(k, shape)).astype(jnp.float32)

    p = {}
    p['w_c1'] = nrm(ks[0], (N_FILTERS, N_DYN_FEA, KERNEL_SIZE));  p['b_c1'] = nrm(ks[1], (N_FILTERS,))
    p['w_d0'] = nrm(ks[2], (N_FILTERS, N_FILTERS, KERNEL_SIZE));  p['b_d0'] = nrm(ks[3], (N_FILTERS,))
    p['w_d1'] = nrm(ks[4], (N_FILTERS, N_FILTERS, KERNEL_SIZE));  p['b_d1'] = nrm(ks[5], (N_FILTERS,))
    p['w_d2'] = nrm(ks[6], (N_FILTERS, N_FILTERS, KERNEL_SIZE));  p['b_d2'] = nrm(ks[7], (N_FILTERS,))
    p['w_out'] = nrm(ks[8], (N_CONV_OUT, 2 * N_FILTERS, 1));      p['b_out'] = nrm(ks[9], (N_CONV_OUT,))
    p['emb0'] = nrm(ks[10], (MAX_DEPT_ID + 1, EMB0_DIM), 1.0)
    p['emb1'] = nrm(ks[11], (MAX_CAT_ID + 1, EMB1_DIM), 1.0)
    p['w0'] = nrm(ks[12], (DENSE0_IN, DENSE0_OUT))   # stored [in, out] (transposed vs torch Linear)
    p['b0'] = nrm(ks[13], (1, DENSE0_OUT))
    p['w1'] = nrm(ks[14], (DENSE0_OUT, N_OUTPUTS))
    p['b1'] = nrm(ks[15], (1, N_OUTPUTS))

    # ---- pre-packed forms consumed by the fused Pallas kernel ----------------
    # all conv weights/biases flattened into one SMEM scalar table (146 f32).
    p['wsm'] = jnp.concatenate([
        p['w_c1'].ravel(), p['b_c1'],
        p['w_d0'].ravel(), p['b_d0'],
        p['w_d1'].ravel(), p['b_d1'],
        p['w_d2'].ravel(), p['b_d2'],
        p['w_out'].ravel(), p['b_out'],
    ]).astype(jnp.float32)
    # dense0 weight split: conv rows reshaped [8, 208, 56] -> zero-padded time
    # axis to 256 (garbage in padded lanes is zero-weighted), flattened to the
    # [8*256, 56] bf16 operand of the single fused dense0 matmul.
    n_conv = N_CONV_OUT * SEQ_LEN
    w0c = p['w0'][:n_conv].reshape(N_CONV_OUT, SEQ_LEN, DENSE0_OUT)
    w0c = jnp.pad(w0c, ((0, 0), (0, L_PAD - SEQ_LEN), (0, 0)))
    p['w0_flat'] = w0c.reshape(N_CONV_OUT * L_PAD, DENSE0_OUT).astype(jnp.bfloat16)
    p['w0_e0'] = p['w0'][n_conv:n_conv + EMB0_DIM]
    p['w0_e1'] = p['w0'][n_conv + EMB0_DIM:]
    p['w1_bf16'] = p['w1'].astype(jnp.bfloat16)
    return p


# ---------------- main ---------------------------------------------------------
if __name__ == "__main__":
    B = 2
    key = jax.random.PRNGKey(0)
    k_seq, k_c0, k_c1, k_p = jax.random.split(key, 4)

    seq_in = jax.random.normal(k_seq, (B, N_DYN_FEA, SEQ_LEN), dtype=jnp.float32)
    cat0 = jax.random.randint(k_c0, (B, 1), 0, MAX_DEPT_ID + 1)
    cat1 = jax.random.randint(k_c1, (B, 1), 0, MAX_CAT_ID + 1)
    cat_fea_in = jnp.concatenate([cat0, cat1], axis=1).astype(jnp.int32)

    params = init_params(k_p)

    out = jax.block_until_ready(forward(seq_in, cat_fea_in, params))

    ref = ref_forward(seq_in, cat_fea_in, params)
    assert out.shape == (B, N_OUTPUTS)
    # bf16 conv-stack path (v6e/v7x) gets a looser bound than the f32 path (v5e),
    # which only uses bf16 operands on the MXU dots.
    tol = 4e-2 if _USE_BF16_VPU else 2e-2
    max_err = float(jnp.max(jnp.abs(out - ref)))
    assert max_err < tol, f"Pallas output mismatch vs JAX reference (max abs err {max_err:.4e})"

    print("KERNEL_OK")
</pallas_src>

<mosaic_0001>
module attributes {stable_mosaic.version = 11 : i64} {
  func.func @_fused_kernel(%arg0: i32, %arg1: memref<146xf32, #tpu.memory_space<smem>>, %arg2: memref<4x8x256xf32, #tpu.memory_space<vmem>>, %arg3: memref<8x56xf32, #tpu.memory_space<vmem>>, %arg4: memref<2048x56xbf16, #tpu.memory_space<vmem>>, %arg5: memref<56x28xbf16, #tpu.memory_space<vmem>>, %arg6: memref<1x28xf32, #tpu.memory_space<vmem>>, %arg7: memref<8x28xf32, #tpu.memory_space<vmem>>, %arg8: memref<8x2048xbf16, #tpu.memory_space<vmem>>) attributes {dimension_semantics = [#tpu.dimension_semantics<parallel>], iteration_bounds = array<i64: 1>, scalar_prefetch = 0 : i64, scratch_operands = 1 : i64, tpu.core_type = #tpu.core_type<tc>, window_params = [{transform_indices = @transform_0, window_bounds = array<i64: 146>}, {transform_indices = @transform_1, window_bounds = array<i64: 4, 8, 256>}, {transform_indices = @transform_2, window_bounds = array<i64: 8, 56>}, {pipeline_mode = #tpu.pipeline_mode<synchronous>, transform_indices = @transform_3, window_bounds = array<i64: 2048, 56>}, {pipeline_mode = #tpu.pipeline_mode<synchronous>, transform_indices = @transform_4, window_bounds = array<i64: 56, 28>}, {pipeline_mode = #tpu.pipeline_mode<synchronous>, transform_indices = @transform_5, window_bounds = array<i64: 1, 28>}, {transform_indices = @transform_6, window_bounds = array<i64: 8, 28>}]} {
    %0 = tpu.iota {dimensions = array<i32: 1>} : vector<8x256xi32>
    %c1_i32 = arith.constant 1 : i32
    %1 = vector.broadcast %c1_i32 : i32 to vector<8x256xi32>
    %2 = arith.cmpi sge, %0, %1 : vector<8x256xi32>
    %3 = arith.extui %2 : vector<8x256xi1> to vector<8x256xi32>
    %4 = arith.sitofp %3 : vector<8x256xi32> to vector<8x256xf32>
    %c2_i32 = arith.constant 2 : i32
    %5 = vector.broadcast %c2_i32 : i32 to vector<8x256xi32>
    %6 = arith.cmpi sge, %0, %5 : vector<8x256xi32>
    %7 = arith.extui %6 : vector<8x256xi1> to vector<8x256xi32>
    %8 = arith.sitofp %7 : vector<8x256xi32> to vector<8x256xf32>
    %c4_i32 = arith.constant 4 : i32
    %9 = vector.broadcast %c4_i32 : i32 to vector<8x256xi32>
    %10 = arith.cmpi sge, %0, %9 : vector<8x256xi32>
    %11 = arith.extui %10 : vector<8x256xi1> to vector<8x256xi32>
    %12 = arith.sitofp %11 : vector<8x256xi32> to vector<8x256xf32>
    %c8_i32 = arith.constant 8 : i32
    %13 = vector.broadcast %c8_i32 : i32 to vector<8x256xi32>
    %14 = arith.cmpi sge, %0, %13 : vector<8x256xi32>
    %15 = arith.extui %14 : vector<8x256xi1> to vector<8x256xi32>
    %16 = arith.sitofp %15 : vector<8x256xi32> to vector<8x256xf32>
    %c0 = arith.constant 0 : index
    %c0_0 = arith.constant 0 : index
    %c0_1 = arith.constant 0 : index
    %17 = vector.load %arg2[%c0, %c0_0, %c0_1] : memref<4x8x256xf32, #tpu.memory_space<vmem>>, vector<1x8x256xf32>
    %18 = vector.shape_cast %17 : vector<1x8x256xf32> to vector<8x256xf32>
    %c1 = arith.constant 1 : index
    %c0_2 = arith.constant 0 : index
    %c0_3 = arith.constant 0 : index
    %19 = vector.load %arg2[%c1, %c0_2, %c0_3] : memref<4x8x256xf32, #tpu.memory_space<vmem>>, vector<1x8x256xf32>
    %20 = vector.shape_cast %19 : vector<1x8x256xf32> to vector<8x256xf32>
    %c2 = arith.constant 2 : index
    %c0_4 = arith.constant 0 : index
    %c0_5 = arith.constant 0 : index
    %21 = vector.load %arg2[%c2, %c0_4, %c0_5] : memref<4x8x256xf32, #tpu.memory_space<vmem>>, vector<1x8x256xf32>
    %22 = vector.shape_cast %21 : vector<1x8x256xf32> to vector<8x256xf32>
    %c3 = arith.constant 3 : index
    %c0_6 = arith.constant 0 : index
    %c0_7 = arith.constant 0 : index
    %23 = vector.load %arg2[%c3, %c0_6, %c0_7] : memref<4x8x256xf32, #tpu.memory_space<vmem>>, vector<1x8x256xf32>
    %24 = vector.shape_cast %23 : vector<1x8x256xf32> to vector<8x256xf32>
    %c1_i32_8 = arith.constant 1 : i32
    %25 = tpu.dynamic_rotate %18 by %c1_i32_8 dim 1 : vector<8x256xf32>, i32 -> vector<8x256xf32>
    %26 = arith.mulf %25, %4 : vector<8x256xf32>
    %c1_i32_9 = arith.constant 1 : i32
    %27 = tpu.dynamic_rotate %20 by %c1_i32_9 dim 1 : vector<8x256xf32>, i32 -> vector<8x256xf32>
    %28 = arith.mulf %27, %4 : vector<8x256xf32>
    %c1_i32_10 = arith.constant 1 : i32
    %29 = tpu.dynamic_rotate %22 by %c1_i32_10 dim 1 : vector<8x256xf32>, i32 -> vector<8x256xf32>
    %30 = arith.mulf %29, %4 : vector<8x256xf32>
    %c1_i32_11 = arith.constant 1 : i32
    %31 = tpu.dynamic_rotate %24 by %c1_i32_11 dim 1 : vector<8x256xf32>, i32 -> vector<8x256xf32>
    %32 = arith.mulf %31, %4 : vector<8x256xf32>
    %c0_12 = arith.constant 0 : index
    %33 = memref.load %arg1[%c0_12] : memref<146xf32, #tpu.memory_space<smem>>
    %c1_13 = arith.constant 1 : index
    %34 = memref.load %arg1[%c1_13] : memref<146xf32, #tpu.memory_space<smem>>
    %35 = vector.broadcast %33 : f32 to vector<8x256xf32>
    %36 = arith.mulf %35, %26 : vector<8x256xf32>
    %37 = vector.broadcast %34 : f32 to vector<8x256xf32>
    %38 = arith.mulf %37, %18 : vector<8x256xf32>
    %39 = arith.addf %36, %38 : vector<8x256xf32>
    %c2_14 = arith.constant 2 : index
    %40 = memref.load %arg1[%c2_14] : memref<146xf32, #tpu.memory_space<smem>>
    %c3_15 = arith.constant 3 : index
    %41 = memref.load %arg1[%c3_15] : memref<146xf32, #tpu.memory_space<smem>>
    %42 = vector.broadcast %40 : f32 to vector<8x256xf32>
    %43 = arith.mulf %42, %28 : vector<8x256xf32>
    %44 = vector.broadcast %41 : f32 to vector<8x256xf32>
    %45 = arith.mulf %44, %20 : vector<8x256xf32>
    %46 = arith.addf %43, %45 : vector<8x256xf32>
    %47 = arith.addf %39, %46 : vector<8x256xf32>
    %c4 = arith.constant 4 : index
    %48 = memref.load %arg1[%c4] : memref<146xf32, #tpu.memory_space<smem>>
    %c5 = arith.constant 5 : index
    %49 = memref.load %arg1[%c5] : memref<146xf32, #tpu.memory_space<smem>>
    %50 = vector.broadcast %48 : f32 to vector<8x256xf32>
    %51 = arith.mulf %50, %30 : vector<8x256xf32>
    %52 = vector.broadcast %49 : f32 to vector<8x256xf32>
    %53 = arith.mulf %52, %22 : vector<8x256xf32>
    %54 = arith.addf %51, %53 : vector<8x256xf32>
    %55 = arith.addf %47, %54 : vector<8x256xf32>
    %c6 = arith.constant 6 : index
    %56 = memref.load %arg1[%c6] : memref<146xf32, #tpu.memory_space<smem>>
    %c7 = arith.constant 7 : index
    %57 = memref.load %arg1[%c7] : memref<146xf32, #tpu.memory_space<smem>>
    %58 = vector.broadcast %56 : f32 to vector<8x256xf32>
    %59 = arith.mulf %58, %32 : vector<8x256xf32>
    %60 = vector.broadcast %57 : f32 to vector<8x256xf32>
    %61 = arith.mulf %60, %24 : vector<8x256xf32>
    %62 = arith.addf %59, %61 : vector<8x256xf32>
    %63 = arith.addf %55, %62 : vector<8x256xf32>
    %c24 = arith.constant 24 : index
    %64 = memref.load %arg1[%c24] : memref<146xf32, #tpu.memory_space<smem>>
    %65 = vector.broadcast %64 : f32 to vector<8x256xf32>
    %66 = arith.addf %63, %65 : vector<8x256xf32>
    %cst = arith.constant 0.000000e+00 : f32
    %67 = vector.broadcast %cst : f32 to vector<8x256xf32>
    %68 = arith.maximumf %66, %67 : vector<8x256xf32>
    %c8 = arith.constant 8 : index
    %69 = memref.load %arg1[%c8] : memref<146xf32, #tpu.memory_space<smem>>
    %c9 = arith.constant 9 : index
    %70 = memref.load %arg1[%c9] : memref<146xf32, #tpu.memory_space<smem>>
    %71 = vector.broadcast %69 : f32 to vector<8x256xf32>
    %72 = arith.mulf %71, %26 : vector<8x256xf32>
    %73 = vector.broadcast %70 : f32 to vector<8x256xf32>
    %74 = arith.mulf %73, %18 : vector<8x256xf32>
    %75 = arith.addf %72, %74 : vector<8x256xf32>
    %c10 = arith.constant 10 : index
    %76 = memref.load %arg1[%c10] : memref<146xf32, #tpu.memory_space<smem>>
    %c11 = arith.constant 11 : index
    %77 = memref.load %arg1[%c11] : memref<146xf32, #tpu.memory_space<smem>>
    %78 = vector.broadcast %76 : f32 to vector<8x256xf32>
    %79 = arith.mulf %78, %28 : vector<8x256xf32>
    %80 = vector.broadcast %77 : f32 to vector<8x256xf32>
    %81 = arith.mulf %80, %20 : vector<8x256xf32>
    %82 = arith.addf %79, %81 : vector<8x256xf32>
    %83 = arith.addf %75, %82 : vector<8x256xf32>
    %c12 = arith.constant 12 : index
    %84 = memref.load %arg1[%c12] : memref<146xf32, #tpu.memory_space<smem>>
    %c13 = arith.constant 13 : index
    %85 = memref.load %arg1[%c13] : memref<146xf32, #tpu.memory_space<smem>>
    %86 = vector.broadcast %84 : f32 to vector<8x256xf32>
    %87 = arith.mulf %86, %30 : vector<8x256xf32>
    %88 = vector.broadcast %85 : f32 to vector<8x256xf32>
    %89 = arith.mulf %88, %22 : vector<8x256xf32>
    %90 = arith.addf %87, %89 : vector<8x256xf32>
    %91 = arith.addf %83, %90 : vector<8x256xf32>
    %c14 = arith.constant 14 : index
    %92 = memref.load %arg1[%c14] : memref<146xf32, #tpu.memory_space<smem>>
    %c15 = arith.constant 15 : index
    %93 = memref.load %arg1[%c15] : memref<146xf32, #tpu.memory_space<smem>>
    %94 = vector.broadcast %92 : f32 to vector<8x256xf32>
    %95 = arith.mulf %94, %32 : vector<8x256xf32>
    %96 = vector.broadcast %93 : f32 to vector<8x256xf32>
    %97 = arith.mulf %96, %24 : vector<8x256xf32>
    %98 = arith.addf %95, %97 : vector<8x256xf32>
    %99 = arith.addf %91, %98 : vector<8x256xf32>
    %c25 = arith.constant 25 : index
    %100 = memref.load %arg1[%c25] : memref<146xf32, #tpu.memory_space<smem>>
    %101 = vector.broadcast %100 : f32 to vector<8x256xf32>
    %102 = arith.addf %99, %101 : vector<8x256xf32>
    %cst_16 = arith.constant 0.000000e+00 : f32
    %103 = vector.broadcast %cst_16 : f32 to vector<8x256xf32>
    %104 = arith.maximumf %102, %103 : vector<8x256xf32>
    %c16 = arith.constant 16 : index
    %105 = memref.load %arg1[%c16] : memref<146xf32, #tpu.memory_space<smem>>
    %c17 = arith.constant 17 : index
    %106 = memref.load %arg1[%c17] : memref<146xf32, #tpu.memory_space<smem>>
    %107 = vector.broadcast %105 : f32 to vector<8x256xf32>
    %108 = arith.mulf %107, %26 : vector<8x256xf32>
    %109 = vector.broadcast %106 : f32 to vector<8x256xf32>
    %110 = arith.mulf %109, %18 : vector<8x256xf32>
    %111 = arith.addf %108, %110 : vector<8x256xf32>
    %c18 = arith.constant 18 : index
    %112 = memref.load %arg1[%c18] : memref<146xf32, #tpu.memory_space<smem>>
    %c19 = arith.constant 19 : index
    %113 = memref.load %arg1[%c19] : memref<146xf32, #tpu.memory_space<smem>>
    %114 = vector.broadcast %112 : f32 to vector<8x256xf32>
    %115 = arith.mulf %114, %28 : vector<8x256xf32>
    %116 = vector.broadcast %113 : f32 to vector<8x256xf32>
    %117 = arith.mulf %116, %20 : vector<8x256xf32>
    %118 = arith.addf %115, %117 : vector<8x256xf32>
    %119 = arith.addf %111, %118 : vector<8x256xf32>
    %c20 = arith.constant 20 : index
    %120 = memref.load %arg1[%c20] : memref<146xf32, #tpu.memory_space<smem>>
    %c21 = arith.constant 21 : index
    %121 = memref.load %arg1[%c21] : memref<146xf32, #tpu.memory_space<smem>>
    %122 = vector.broadcast %120 : f32 to vector<8x256xf32>
    %123 = arith.mulf %122, %30 : vector<8x256xf32>
    %124 = vector.broadcast %121 : f32 to vector<8x256xf32>
    %125 = arith.mulf %124, %22 : vector<8x256xf32>
    %126 = arith.addf %123, %125 : vector<8x256xf32>
    %127 = arith.addf %119, %126 : vector<8x256xf32>
    %c22 = arith.constant 22 : index
    %128 = memref.load %arg1[%c22] : memref<146xf32, #tpu.memory_space<smem>>
    %c23 = arith.constant 23 : index
    %129 = memref.load %arg1[%c23] : memref<146xf32, #tpu.memory_space<smem>>
    %130 = vector.broadcast %128 : f32 to vector<8x256xf32>
    %131 = arith.mulf %130, %32 : vector<8x256xf32>
    %132 = vector.broadcast %129 : f32 to vector<8x256xf32>
    %133 = arith.mulf %132, %24 : vector<8x256xf32>
    %134 = arith.addf %131, %133 : vector<8x256xf32>
    %135 = arith.addf %127, %134 : vector<8x256xf32>
    %c26 = arith.constant 26 : index
    %136 = memref.load %arg1[%c26] : memref<146xf32, #tpu.memory_space<smem>>
    %137 = vector.broadcast %136 : f32 to vector<8x256xf32>
    %138 = arith.addf %135, %137 : vector<8x256xf32>
    %cst_17 = arith.constant 0.000000e+00 : f32
    %139 = vector.broadcast %cst_17 : f32 to vector<8x256xf32>
    %140 = arith.maximumf %138, %139 : vector<8x256xf32>
    %c2_i32_18 = arith.constant 2 : i32
    %141 = tpu.dynamic_rotate %68 by %c2_i32_18 dim 1 : vector<8x256xf32>, i32 -> vector<8x256xf32>
    %142 = arith.mulf %141, %8 : vector<8x256xf32>
    %c2_i32_19 = arith.constant 2 : i32
    %143 = tpu.dynamic_rotate %104 by %c2_i32_19 dim 1 : vector<8x256xf32>, i32 -> vector<8x256xf32>
    %144 = arith.mulf %143, %8 : vector<8x256xf32>
    %c2_i32_20 = arith.constant 2 : i32
    %145 = tpu.dynamic_rotate %140 by %c2_i32_20 dim 1 : vector<8x256xf32>, i32 -> vector<8x256xf32>
    %146 = arith.mulf %145, %8 : vector<8x256xf32>
    %c27 = arith.constant 27 : index
    %147 = memref.load %arg1[%c27] : memref<146xf32, #tpu.memory_space<smem>>
    %c28 = arith.constant 28 : index
    %148 = memref.load %arg1[%c28] : memref<146xf32, #tpu.memory_space<smem>>
    %149 = vector.broadcast %147 : f32 to vector<8x256xf32>
    %150 = arith.mulf %149, %142 : vector<8x256xf32>
    %151 = vector.broadcast %148 : f32 to vector<8x256xf32>
    %152 = arith.mulf %151, %68 : vector<8x256xf32>
    %153 = arith.addf %150, %152 : vector<8x256xf32>
    %c29 = arith.constant 29 : index
    %154 = memref.load %arg1[%c29] : memref<146xf32, #tpu.memory_space<smem>>
    %c30 = arith.constant 30 : index
    %155 = memref.load %arg1[%c30] : memref<146xf32, #tpu.memory_space<smem>>
    %156 = vector.broadcast %154 : f32 to vector<8x256xf32>
    %157 = arith.mulf %156, %144 : vector<8x256xf32>
    %158 = vector.broadcast %155 : f32 to vector<8x256xf32>
    %159 = arith.mulf %158, %104 : vector<8x256xf32>
    %160 = arith.addf %157, %159 : vector<8x256xf32>
    %161 = arith.addf %153, %160 : vector<8x256xf32>
    %c31 = arith.constant 31 : index
    %162 = memref.load %arg1[%c31] : memref<146xf32, #tpu.memory_space<smem>>
    %c32 = arith.constant 32 : index
    %163 = memref.load %arg1[%c32] : memref<146xf32, #tpu.memory_space<smem>>
    %164 = vector.broadcast %162 : f32 to vector<8x256xf32>
    %165 = arith.mulf %164, %146 : vector<8x256xf32>
    %166 = vector.broadcast %163 : f32 to vector<8x256xf32>
    %167 = arith.mulf %166, %140 : vector<8x256xf32>
    %168 = arith.addf %165, %167 : vector<8x256xf32>
    %169 = arith.addf %161, %168 : vector<8x256xf32>
    %c45 = arith.constant 45 : index
    %170 = memref.load %arg1[%c45] : memref<146xf32, #tpu.memory_space<smem>>
    %171 = vector.broadcast %170 : f32 to vector<8x256xf32>
    %172 = arith.addf %169, %171 : vector<8x256xf32>
    %cst_21 = arith.constant 0.000000e+00 : f32
    %173 = vector.broadcast %cst_21 : f32 to vector<8x256xf32>
    %174 = arith.maximumf %172, %173 : vector<8x256xf32>
    %c33 = arith.constant 33 : index
    %175 = memref.load %arg1[%c33] : memref<146xf32, #tpu.memory_space<smem>>
    %c34 = arith.constant 34 : index
    %176 = memref.load %arg1[%c34] : memref<146xf32, #tpu.memory_space<smem>>
    %177 = vector.broadcast %175 : f32 to vector<8x256xf32>
    %178 = arith.mulf %177, %142 : vector<8x256xf32>
    %179 = vector.broadcast %176 : f32 to vector<8x256xf32>
    %180 = arith.mulf %179, %68 : vector<8x256xf32>
    %181 = arith.addf %178, %180 : vector<8x256xf32>
    %c35 = arith.constant 35 : index
    %182 = memref.load %arg1[%c35] : memref<146xf32, #tpu.memory_space<smem>>
    %c36 = arith.constant 36 : index
    %183 = memref.load %arg1[%c36] : memref<146xf32, #tpu.memory_space<smem>>
    %184 = vector.broadcast %182 : f32 to vector<8x256xf32>
    %185 = arith.mulf %184, %144 : vector<8x256xf32>
    %186 = vector.broadcast %183 : f32 to vector<8x256xf32>
    %187 = arith.mulf %186, %104 : vector<8x256xf32>
    %188 = arith.addf %185, %187 : vector<8x256xf32>
    %189 = arith.addf %181, %188 : vector<8x256xf32>
    %c37 = arith.constant 37 : index
    %190 = memref.load %arg1[%c37] : memref<146xf32, #tpu.memory_space<smem>>
    %c38 = arith.constant 38 : index
    %191 = memref.load %arg1[%c38] : memref<146xf32, #tpu.memory_space<smem>>
    %192 = vector.broadcast %190 : f32 to vector<8x256xf32>
    %193 = arith.mulf %192, %146 : vector<8x256xf32>
    %194 = vector.broadcast %191 : f32 to vector<8x256xf32>
    %195 = arith.mulf %194, %140 : vector<8x256xf32>
    %196 = arith.addf %193, %195 : vector<8x256xf32>
    %197 = arith.addf %189, %196 : vector<8x256xf32>
    %c46 = arith.constant 46 : index
    %198 = memref.load %arg1[%c46] : memref<146xf32, #tpu.memory_space<smem>>
    %199 = vector.broadcast %198 : f32 to vector<8x256xf32>
    %200 = arith.addf %197, %199 : vector<8x256xf32>
    %cst_22 = arith.constant 0.000000e+00 : f32
    %201 = vector.broadcast %cst_22 : f32 to vector<8x256xf32>
    %202 = arith.maximumf %200, %201 : vector<8x256xf32>
    %c39 = arith.constant 39 : index
    %203 = memref.load %arg1[%c39] : memref<146xf32, #tpu.memory_space<smem>>
    %c40 = arith.constant 40 : index
    %204 = memref.load %arg1[%c40] : memref<146xf32, #tpu.memory_space<smem>>
    %205 = vector.broadcast %203 : f32 to vector<8x256xf32>
    %206 = arith.mulf %205, %142 : vector<8x256xf32>
    %207 = vector.broadcast %204 : f32 to vector<8x256xf32>
    %208 = arith.mulf %207, %68 : vector<8x256xf32>
    %209 = arith.addf %206, %208 : vector<8x256xf32>
    %c41 = arith.constant 41 : index
    %210 = memref.load %arg1[%c41] : memref<146xf32, #tpu.memory_space<smem>>
    %c42 = arith.constant 42 : index
    %211 = memref.load %arg1[%c42] : memref<146xf32, #tpu.memory_space<smem>>
    %212 = vector.broadcast %210 : f32 to vector<8x256xf32>
    %213 = arith.mulf %212, %144 : vector<8x256xf32>
    %214 = vector.broadcast %211 : f32 to vector<8x256xf32>
    %215 = arith.mulf %214, %104 : vector<8x256xf32>
    %216 = arith.addf %213, %215 : vector<8x256xf32>
    %217 = arith.addf %209, %216 : vector<8x256xf32>
    %c43 = arith.constant 43 : index
    %218 = memref.load %arg1[%c43] : memref<146xf32, #tpu.memory_space<smem>>
    %c44 = arith.constant 44 : index
    %219 = memref.load %arg1[%c44] : memref<146xf32, #tpu.memory_space<smem>>
    %220 = vector.broadcast %218 : f32 to vector<8x256xf32>
    %221 = arith.mulf %220, %146 : vector<8x256xf32>
    %222 = vector.broadcast %219 : f32 to vector<8x256xf32>
    %223 = arith.mulf %222, %140 : vector<8x256xf32>
    %224 = arith.addf %221, %223 : vector<8x256xf32>
    %225 = arith.addf %217, %224 : vector<8x256xf32>
    %c47 = arith.constant 47 : index
    %226 = memref.load %arg1[%c47] : memref<146xf32, #tpu.memory_space<smem>>
    %227 = vector.broadcast %226 : f32 to vector<8x256xf32>
    %228 = arith.addf %225, %227 : vector<8x256xf32>
    %cst_23 = arith.constant 0.000000e+00 : f32
    %229 = vector.broadcast %cst_23 : f32 to vector<8x256xf32>
    %230 = arith.maximumf %228, %229 : vector<8x256xf32>
    %c4_i32_24 = arith.constant 4 : i32
    %231 = tpu.dynamic_rotate %174 by %c4_i32_24 dim 1 : vector<8x256xf32>, i32 -> vector<8x256xf32>
    %232 = arith.mulf %231, %12 : vector<8x256xf32>
    %c4_i32_25 = arith.constant 4 : i32
    %233 = tpu.dynamic_rotate %202 by %c4_i32_25 dim 1 : vector<8x256xf32>, i32 -> vector<8x256xf32>
    %234 = arith.mulf %233, %12 : vector<8x256xf32>
    %c4_i32_26 = arith.constant 4 : i32
    %235 = tpu.dynamic_rotate %230 by %c4_i32_26 dim 1 : vector<8x256xf32>, i32 -> vector<8x256xf32>
    %236 = arith.mulf %235, %12 : vector<8x256xf32>
    %c48 = arith.constant 48 : index
    %237 = memref.load %arg1[%c48] : memref<146xf32, #tpu.memory_space<smem>>
    %c49 = arith.constant 49 : index
    %238 = memref.load %arg1[%c49] : memref<146xf32, #tpu.memory_space<smem>>
    %239 = vector.broadcast %237 : f32 to vector<8x256xf32>
    %240 = arith.mulf %239, %232 : vector<8x256xf32>
    %241 = vector.broadcast %238 : f32 to vector<8x256xf32>
    %242 = arith.mulf %241, %174 : vector<8x256xf32>
    %243 = arith.addf %240, %242 : vector<8x256xf32>
    %c50 = arith.constant 50 : index
    %244 = memref.load %arg1[%c50] : memref<146xf32, #tpu.memory_space<smem>>
    %c51 = arith.constant 51 : index
    %245 = memref.load %arg1[%c51] : memref<146xf32, #tpu.memory_space<smem>>
    %246 = vector.broadcast %244 : f32 to vector<8x256xf32>
    %247 = arith.mulf %246, %234 : vector<8x256xf32>
    %248 = vector.broadcast %245 : f32 to vector<8x256xf32>
    %249 = arith.mulf %248, %202 : vector<8x256xf32>
    %250 = arith.addf %247, %249 : vector<8x256xf32>
    %251 = arith.addf %243, %250 : vector<8x256xf32>
    %c52 = arith.constant 52 : index
    %252 = memref.load %arg1[%c52] : memref<146xf32, #tpu.memory_space<smem>>
    %c53 = arith.constant 53 : index
    %253 = memref.load %arg1[%c53] : memref<146xf32, #tpu.memory_space<smem>>
    %254 = vector.broadcast %252 : f32 to vector<8x256xf32>
    %255 = arith.mulf %254, %236 : vector<8x256xf32>
    %256 = vector.broadcast %253 : f32 to vector<8x256xf32>
    %257 = arith.mulf %256, %230 : vector<8x256xf32>
    %258 = arith.addf %255, %257 : vector<8x256xf32>
    %259 = arith.addf %251, %258 : vector<8x256xf32>
    %c66 = arith.constant 66 : index
    %260 = memref.load %arg1[%c66] : memref<146xf32, #tpu.memory_space<smem>>
    %261 = vector.broadcast %260 : f32 to vector<8x256xf32>
    %262 = arith.addf %259, %261 : vector<8x256xf32>
    %cst_27 = arith.constant 0.000000e+00 : f32
    %263 = vector.broadcast %cst_27 : f32 to vector<8x256xf32>
    %264 = arith.maximumf %262, %263 : vector<8x256xf32>
    %c54 = arith.constant 54 : index
    %265 = memref.load %arg1[%c54] : memref<146xf32, #tpu.memory_space<smem>>
    %c55 = arith.constant 55 : index
    %266 = memref.load %arg1[%c55] : memref<146xf32, #tpu.memory_space<smem>>
    %267 = vector.broadcast %265 : f32 to vector<8x256xf32>
    %268 = arith.mulf %267, %232 : vector<8x256xf32>
    %269 = vector.broadcast %266 : f32 to vector<8x256xf32>
    %270 = arith.mulf %269, %174 : vector<8x256xf32>
    %271 = arith.addf %268, %270 : vector<8x256xf32>
    %c56 = arith.constant 56 : index
    %272 = memref.load %arg1[%c56] : memref<146xf32, #tpu.memory_space<smem>>
    %c57 = arith.constant 57 : index
    %273 = memref.load %arg1[%c57] : memref<146xf32, #tpu.memory_space<smem>>
    %274 = vector.broadcast %272 : f32 to vector<8x256xf32>
    %275 = arith.mulf %274, %234 : vector<8x256xf32>
    %276 = vector.broadcast %273 : f32 to vector<8x256xf32>
    %277 = arith.mulf %276, %202 : vector<8x256xf32>
    %278 = arith.addf %275, %277 : vector<8x256xf32>
    %279 = arith.addf %271, %278 : vector<8x256xf32>
    %c58 = arith.constant 58 : index
    %280 = memref.load %arg1[%c58] : memref<146xf32, #tpu.memory_space<smem>>
    %c59 = arith.constant 59 : index
    %281 = memref.load %arg1[%c59] : memref<146xf32, #tpu.memory_space<smem>>
    %282 = vector.broadcast %280 : f32 to vector<8x256xf32>
    %283 = arith.mulf %282, %236 : vector<8x256xf32>
    %284 = vector.broadcast %281 : f32 to vector<8x256xf32>
    %285 = arith.mulf %284, %230 : vector<8x256xf32>
    %286 = arith.addf %283, %285 : vector<8x256xf32>
    %287 = arith.addf %279, %286 : vector<8x256xf32>
    %c67 = arith.constant 67 : index
    %288 = memref.load %arg1[%c67] : memref<146xf32, #tpu.memory_space<smem>>
    %289 = vector.broadcast %288 : f32 to vector<8x256xf32>
    %290 = arith.addf %287, %289 : vector<8x256xf32>
    %cst_28 = arith.constant 0.000000e+00 : f32
    %291 = vector.broadcast %cst_28 : f32 to vector<8x256xf32>
    %292 = arith.maximumf %290, %291 : vector<8x256xf32>
    %c60 = arith.constant 60 : index
    %293 = memref.load %arg1[%c60] : memref<146xf32, #tpu.memory_space<smem>>
    %c61 = arith.constant 61 : index
    %294 = memref.load %arg1[%c61] : memref<146xf32, #tpu.memory_space<smem>>
    %295 = vector.broadcast %293 : f32 to vector<8x256xf32>
    %296 = arith.mulf %295, %232 : vector<8x256xf32>
    %297 = vector.broadcast %294 : f32 to vector<8x256xf32>
    %298 = arith.mulf %297, %174 : vector<8x256xf32>
    %299 = arith.addf %296, %298 : vector<8x256xf32>
    %c62 = arith.constant 62 : index
    %300 = memref.load %arg1[%c62] : memref<146xf32, #tpu.memory_space<smem>>
    %c63 = arith.constant 63 : index
    %301 = memref.load %arg1[%c63] : memref<146xf32, #tpu.memory_space<smem>>
    %302 = vector.broadcast %300 : f32 to vector<8x256xf32>
    %303 = arith.mulf %302, %234 : vector<8x256xf32>
    %304 = vector.broadcast %301 : f32 to vector<8x256xf32>
    %305 = arith.mulf %304, %202 : vector<8x256xf32>
    %306 = arith.addf %303, %305 : vector<8x256xf32>
    %307 = arith.addf %299, %306 : vector<8x256xf32>
    %c64 = arith.constant 64 : index
    %308 = memref.load %arg1[%c64] : memref<146xf32, #tpu.memory_space<smem>>
    %c65 = arith.constant 65 : index
    %309 = memref.load %arg1[%c65] : memref<146xf32, #tpu.memory_space<smem>>
    %310 = vector.broadcast %308 : f32 to vector<8x256xf32>
    %311 = arith.mulf %310, %236 : vector<8x256xf32>
    %312 = vector.broadcast %309 : f32 to vector<8x256xf32>
    %313 = arith.mulf %312, %230 : vector<8x256xf32>
    %314 = arith.addf %311, %313 : vector<8x256xf32>
    %315 = arith.addf %307, %314 : vector<8x256xf32>
    %c68 = arith.constant 68 : index
    %316 = memref.load %arg1[%c68] : memref<146xf32, #tpu.memory_space<smem>>
    %317 = vector.broadcast %316 : f32 to vector<8x256xf32>
    %318 = arith.addf %315, %317 : vector<8x256xf32>
    %cst_29 = arith.constant 0.000000e+00 : f32
    %319 = vector.broadcast %cst_29 : f32 to vector<8x256xf32>
    %320 = arith.maximumf %318, %319 : vector<8x256xf32>
    %c8_i32_30 = arith.constant 8 : i32
    %321 = tpu.dynamic_rotate %264 by %c8_i32_30 dim 1 : vector<8x256xf32>, i32 -> vector<8x256xf32>
    %322 = arith.mulf %321, %16 : vector<8x256xf32>
    %c8_i32_31 = arith.constant 8 : i32
    %323 = tpu.dynamic_rotate %292 by %c8_i32_31 dim 1 : vector<8x256xf32>, i32 -> vector<8x256xf32>
    %324 = arith.mulf %323, %16 : vector<8x256xf32>
    %c8_i32_32 = arith.constant 8 : i32
    %325 = tpu.dynamic_rotate %320 by %c8_i32_32 dim 1 : vector<8x256xf32>, i32 -> vector<8x256xf32>
    %326 = arith.mulf %325, %16 : vector<8x256xf32>
    %c69 = arith.constant 69 : index
    %327 = memref.load %arg1[%c69] : memref<146xf32, #tpu.memory_space<smem>>
    %c70 = arith.constant 70 : index
    %328 = memref.load %arg1[%c70] : memref<146xf32, #tpu.memory_space<smem>>
    %329 = vector.broadcast %327 : f32 to vector<8x256xf32>
    %330 = arith.mulf %329, %322 : vector<8x256xf32>
    %331 = vector.broadcast %328 : f32 to vector<8x256xf32>
    %332 = arith.mulf %331, %264 : vector<8x256xf32>
    %333 = arith.addf %330, %332 : vector<8x256xf32>
    %c71 = arith.constant 71 : index
    %334 = memref.load %arg1[%c71] : memref<146xf32, #tpu.memory_space<smem>>
    %c72 = arith.constant 72 : index
    %335 = memref.load %arg1[%c72] : memref<146xf32, #tpu.memory_space<smem>>
    %336 = vector.broadcast %334 : f32 to vector<8x256xf32>
    %337 = arith.mulf %336, %324 : vector<8x256xf32>
    %338 = vector.broadcast %335 : f32 to vector<8x256xf32>
    %339 = arith.mulf %338, %292 : vector<8x256xf32>
    %340 = arith.addf %337, %339 : vector<8x256xf32>
    %341 = arith.addf %333, %340 : vector<8x256xf32>
    %c73 = arith.constant 73 : index
    %342 = memref.load %arg1[%c73] : memref<146xf32, #tpu.memory_space<smem>>
    %c74 = arith.constant 74 : index
    %343 = memref.load %arg1[%c74] : memref<146xf32, #tpu.memory_space<smem>>
    %344 = vector.broadcast %342 : f32 to vector<8x256xf32>
    %345 = arith.mulf %344, %326 : vector<8x256xf32>
    %346 = vector.broadcast %343 : f32 to vector<8x256xf32>
    %347 = arith.mulf %346, %320 : vector<8x256xf32>
    %348 = arith.addf %345, %347 : vector<8x256xf32>
    %349 = arith.addf %341, %348 : vector<8x256xf32>
    %c87 = arith.constant 87 : index
    %350 = memref.load %arg1[%c87] : memref<146xf32, #tpu.memory_space<smem>>
    %351 = vector.broadcast %350 : f32 to vector<8x256xf32>
    %352 = arith.addf %349, %351 : vector<8x256xf32>
    %cst_33 = arith.constant 0.000000e+00 : f32
    %353 = vector.broadcast %cst_33 : f32 to vector<8x256xf32>
    %354 = arith.maximumf %352, %353 : vector<8x256xf32>
    %c75 = arith.constant 75 : index
    %355 = memref.load %arg1[%c75] : memref<146xf32, #tpu.memory_space<smem>>
    %c76 = arith.constant 76 : index
    %356 = memref.load %arg1[%c76] : memref<146xf32, #tpu.memory_space<smem>>
    %357 = vector.broadcast %355 : f32 to vector<8x256xf32>
    %358 = arith.mulf %357, %322 : vector<8x256xf32>
    %359 = vector.broadcast %356 : f32 to vector<8x256xf32>
    %360 = arith.mulf %359, %264 : vector<8x256xf32>
    %361 = arith.addf %358, %360 : vector<8x256xf32>
    %c77 = arith.constant 77 : index
    %362 = memref.load %arg1[%c77] : memref<146xf32, #tpu.memory_space<smem>>
    %c78 = arith.constant 78 : index
    %363 = memref.load %arg1[%c78] : memref<146xf32, #tpu.memory_space<smem>>
    %364 = vector.broadcast %362 : f32 to vector<8x256xf32>
    %365 = arith.mulf %364, %324 : vector<8x256xf32>
    %366 = vector.broadcast %363 : f32 to vector<8x256xf32>
    %367 = arith.mulf %366, %292 : vector<8x256xf32>
    %368 = arith.addf %365, %367 : vector<8x256xf32>
    %369 = arith.addf %361, %368 : vector<8x256xf32>
    %c79 = arith.constant 79 : index
    %370 = memref.load %arg1[%c79] : memref<146xf32, #tpu.memory_space<smem>>
    %c80 = arith.constant 80 : index
    %371 = memref.load %arg1[%c80] : memref<146xf32, #tpu.memory_space<smem>>
    %372 = vector.broadcast %370 : f32 to vector<8x256xf32>
    %373 = arith.mulf %372, %326 : vector<8x256xf32>
    %374 = vector.broadcast %371 : f32 to vector<8x256xf32>
    %375 = arith.mulf %374, %320 : vector<8x256xf32>
    %376 = arith.addf %373, %375 : vector<8x256xf32>
    %377 = arith.addf %369, %376 : vector<8x256xf32>
    %c88 = arith.constant 88 : index
    %378 = memref.load %arg1[%c88] : memref<146xf32, #tpu.memory_space<smem>>
    %379 = vector.broadcast %378 : f32 to vector<8x256xf32>
    %380 = arith.addf %377, %379 : vector<8x256xf32>
    %cst_34 = arith.constant 0.000000e+00 : f32
    %381 = vector.broadcast %cst_34 : f32 to vector<8x256xf32>
    %382 = arith.maximumf %380, %381 : vector<8x256xf32>
    %c81 = arith.constant 81 : index
    %383 = memref.load %arg1[%c81] : memref<146xf32, #tpu.memory_space<smem>>
    %c82 = arith.constant 82 : index
    %384 = memref.load %arg1[%c82] : memref<146xf32, #tpu.memory_space<smem>>
    %385 = vector.broadcast %383 : f32 to vector<8x256xf32>
    %386 = arith.mulf %385, %322 : vector<8x256xf32>
    %387 = vector.broadcast %384 : f32 to vector<8x256xf32>
    %388 = arith.mulf %387, %264 : vector<8x256xf32>
    %389 = arith.addf %386, %388 : vector<8x256xf32>
    %c83 = arith.constant 83 : index
    %390 = memref.load %arg1[%c83] : memref<146xf32, #tpu.memory_space<smem>>
    %c84 = arith.constant 84 : index
    %391 = memref.load %arg1[%c84] : memref<146xf32, #tpu.memory_space<smem>>
    %392 = vector.broadcast %390 : f32 to vector<8x256xf32>
    %393 = arith.mulf %392, %324 : vector<8x256xf32>
    %394 = vector.broadcast %391 : f32 to vector<8x256xf32>
    %395 = arith.mulf %394, %292 : vector<8x256xf32>
    %396 = arith.addf %393, %395 : vector<8x256xf32>
    %397 = arith.addf %389, %396 : vector<8x256xf32>
    %c85 = arith.constant 85 : index
    %398 = memref.load %arg1[%c85] : memref<146xf32, #tpu.memory_space<smem>>
    %c86 = arith.constant 86 : index
    %399 = memref.load %arg1[%c86] : memref<146xf32, #tpu.memory_space<smem>>
    %400 = vector.broadcast %398 : f32 to vector<8x256xf32>
    %401 = arith.mulf %400, %326 : vector<8x256xf32>
    %402 = vector.broadcast %399 : f32 to vector<8x256xf32>
    %403 = arith.mulf %402, %320 : vector<8x256xf32>
    %404 = arith.addf %401, %403 : vector<8x256xf32>
    %405 = arith.addf %397, %404 : vector<8x256xf32>
    %c89 = arith.constant 89 : index
    %406 = memref.load %arg1[%c89] : memref<146xf32, #tpu.memory_space<smem>>
    %407 = vector.broadcast %406 : f32 to vector<8x256xf32>
    %408 = arith.addf %405, %407 : vector<8x256xf32>
    %cst_35 = arith.constant 0.000000e+00 : f32
    %409 = vector.broadcast %cst_35 : f32 to vector<8x256xf32>
    %410 = arith.maximumf %408, %409 : vector<8x256xf32>
    %c90 = arith.constant 90 : index
    %411 = memref.load %arg1[%c90] : memref<146xf32, #tpu.memory_space<smem>>
    %412 = vector.broadcast %411 : f32 to vector<8x256xf32>
    %413 = arith.mulf %412, %68 : vector<8x256xf32>
    %c91 = arith.constant 91 : index
    %414 = memref.load %arg1[%c91] : memref<146xf32, #tpu.memory_space<smem>>
    %415 = vector.broadcast %414 : f32 to vector<8x256xf32>
    %416 = arith.mulf %415, %104 : vector<8x256xf32>
    %417 = arith.addf %413, %416 : vector<8x256xf32>
    %c92 = arith.constant 92 : index
    %418 = memref.load %arg1[%c92] : memref<146xf32, #tpu.memory_space<smem>>
    %419 = vector.broadcast %418 : f32 to vector<8x256xf32>
    %420 = arith.mulf %419, %140 : vector<8x256xf32>
    %421 = arith.addf %417, %420 : vector<8x256xf32>
    %c93 = arith.constant 93 : index
    %422 = memref.load %arg1[%c93] : memref<146xf32, #tpu.memory_space<smem>>
    %423 = vector.broadcast %422 : f32 to vector<8x256xf32>
    %424 = arith.mulf %423, %354 : vector<8x256xf32>
    %425 = arith.addf %421, %424 : vector<8x256xf32>
    %c94 = arith.constant 94 : index
    %426 = memref.load %arg1[%c94] : memref<146xf32, #tpu.memory_space<smem>>
    %427 = vector.broadcast %426 : f32 to vector<8x256xf32>
    %428 = arith.mulf %427, %382 : vector<8x256xf32>
    %429 = arith.addf %425, %428 : vector<8x256xf32>
    %c95 = arith.constant 95 : index
    %430 = memref.load %arg1[%c95] : memref<146xf32, #tpu.memory_space<smem>>
    %431 = vector.broadcast %430 : f32 to vector<8x256xf32>
    %432 = arith.mulf %431, %410 : vector<8x256xf32>
    %433 = arith.addf %429, %432 : vector<8x256xf32>
    %c138 = arith.constant 138 : index
    %434 = memref.load %arg1[%c138] : memref<146xf32, #tpu.memory_space<smem>>
    %435 = vector.broadcast %434 : f32 to vector<8x256xf32>
    %436 = arith.addf %433, %435 : vector<8x256xf32>
    %cst_36 = arith.constant 0.000000e+00 : f32
    %437 = vector.broadcast %cst_36 : f32 to vector<8x256xf32>
    %438 = arith.maximumf %436, %437 : vector<8x256xf32>
    %439 = arith.truncf %438 : vector<8x256xf32> to vector<8x256xbf16>
    %c0_37 = arith.constant 0 : index
    %c0_38 = arith.constant 0 : index
    %440 = vector.load %arg8[%c0_37, %c0_38] : memref<8x2048xbf16, #tpu.memory_space<vmem>>, vector<8x256xbf16>
    tpu.vector_store %arg8[%c0_37, %c0_38], %439 {strides = array<i32>} : memref<8x2048xbf16, #tpu.memory_space<vmem>>, vector<8x256xbf16>,
    %c96 = arith.constant 96 : index
    %441 = memref.load %arg1[%c96] : memref<146xf32, #tpu.memory_space<smem>>
    %442 = vector.broadcast %441 : f32 to vector<8x256xf32>
    %443 = arith.mulf %442, %68 : vector<8x256xf32>
    %c97 = arith.constant 97 : index
    %444 = memref.load %arg1[%c97] : memref<146xf32, #tpu.memory_space<smem>>
    %445 = vector.broadcast %444 : f32 to vector<8x256xf32>
    %446 = arith.mulf %445, %104 : vector<8x256xf32>
    %447 = arith.addf %443, %446 : vector<8x256xf32>
    %c98 = arith.constant 98 : index
    %448 = memref.load %arg1[%c98] : memref<146xf32, #tpu.memory_space<smem>>
    %449 = vector.broadcast %448 : f32 to vector<8x256xf32>
    %450 = arith.mulf %449, %140 : vector<8x256xf32>
    %451 = arith.addf %447, %450 : vector<8x256xf32>
    %c99 = arith.constant 99 : index
    %452 = memref.load %arg1[%c99] : memref<146xf32, #tpu.memory_space<smem>>
    %453 = vector.broadcast %452 : f32 to vector<8x256xf32>
    %454 = arith.mulf %453, %354 : vector<8x256xf32>
    %455 = arith.addf %451, %454 : vector<8x256xf32>
    %c100 = arith.constant 100 : index
    %456 = memref.load %arg1[%c100] : memref<146xf32, #tpu.memory_space<smem>>
    %457 = vector.broadcast %456 : f32 to vector<8x256xf32>
    %458 = arith.mulf %457, %382 : vector<8x256xf32>
    %459 = arith.addf %455, %458 : vector<8x256xf32>
    %c101 = arith.constant 101 : index
    %460 = memref.load %arg1[%c101] : memref<146xf32, #tpu.memory_space<smem>>
    %461 = vector.broadcast %460 : f32 to vector<8x256xf32>
    %462 = arith.mulf %461, %410 : vector<8x256xf32>
    %463 = arith.addf %459, %462 : vector<8x256xf32>
    %c139 = arith.constant 139 : index
    %464 = memref.load %arg1[%c139] : memref<146xf32, #tpu.memory_space<smem>>
    %465 = vector.broadcast %464 : f32 to vector<8x256xf32>
    %466 = arith.addf %463, %465 : vector<8x256xf32>
    %cst_39 = arith.constant 0.000000e+00 : f32
    %467 = vector.broadcast %cst_39 : f32 to vector<8x256xf32>
    %468 = arith.maximumf %466, %467 : vector<8x256xf32>
    %469 = arith.truncf %468 : vector<8x256xf32> to vector<8x256xbf16>
    %c0_40 = arith.constant 0 : index
    %c256 = arith.constant 256 : index
    %470 = vector.load %arg8[%c0_40, %c256] : memref<8x2048xbf16, #tpu.memory_space<vmem>>, vector<8x256xbf16>
    tpu.vector_store %arg8[%c0_40, %c256], %469 {strides = array<i32>} : memref<8x2048xbf16, #tpu.memory_space<vmem>>, vector<8x256xbf16>,
    %c102 = arith.constant 102 : index
    %471 = memref.load %arg1[%c102] : memref<146xf32, #tpu.memory_space<smem>>
    %472 = vector.broadcast %471 : f32 to vector<8x256xf32>
    %473 = arith.mulf %472, %68 : vector<8x256xf32>
    %c103 = arith.constant 103 : index
    %474 = memref.load %arg1[%c103] : memref<146xf32, #tpu.memory_space<smem>>
    %475 = vector.broadcast %474 : f32 to vector<8x256xf32>
    %476 = arith.mulf %475, %104 : vector<8x256xf32>
    %477 = arith.addf %473, %476 : vector<8x256xf32>
    %c104 = arith.constant 104 : index
    %478 = memref.load %arg1[%c104] : memref<146xf32, #tpu.memory_space<smem>>
    %479 = vector.broadcast %478 : f32 to vector<8x256xf32>
    %480 = arith.mulf %479, %140 : vector<8x256xf32>
    %481 = arith.addf %477, %480 : vector<8x256xf32>
    %c105 = arith.constant 105 : index
    %482 = memref.load %arg1[%c105] : memref<146xf32, #tpu.memory_space<smem>>
    %483 = vector.broadcast %482 : f32 to vector<8x256xf32>
    %484 = arith.mulf %483, %354 : vector<8x256xf32>
    %485 = arith.addf %481, %484 : vector<8x256xf32>
    %c106 = arith.constant 106 : index
    %486 = memref.load %arg1[%c106] : memref<146xf32, #tpu.memory_space<smem>>
    %487 = vector.broadcast %486 : f32 to vector<8x256xf32>
    %488 = arith.mulf %487, %382 : vector<8x256xf32>
    %489 = arith.addf %485, %488 : vector<8x256xf32>
    %c107 = arith.constant 107 : index
    %490 = memref.load %arg1[%c107] : memref<146xf32, #tpu.memory_space<smem>>
    %491 = vector.broadcast %490 : f32 to vector<8x256xf32>
    %492 = arith.mulf %491, %410 : vector<8x256xf32>
    %493 = arith.addf %489, %492 : vector<8x256xf32>
    %c140 = arith.constant 140 : index
    %494 = memref.load %arg1[%c140] : memref<146xf32, #tpu.memory_space<smem>>
    %495 = vector.broadcast %494 : f32 to vector<8x256xf32>
    %496 = arith.addf %493, %495 : vector<8x256xf32>
    %cst_41 = arith.constant 0.000000e+00 : f32
    %497 = vector.broadcast %cst_41 : f32 to vector<8x256xf32>
    %498 = arith.maximumf %496, %497 : vector<8x256xf32>
    %499 = arith.truncf %498 : vector<8x256xf32> to vector<8x256xbf16>
    %c0_42 = arith.constant 0 : index
    %c512 = arith.constant 512 : index
    %500 = vector.load %arg8[%c0_42, %c512] : memref<8x2048xbf16, #tpu.memory_space<vmem>>, vector<8x256xbf16>
    tpu.vector_store %arg8[%c0_42, %c512], %499 {strides = array<i32>} : memref<8x2048xbf16, #tpu.memory_space<vmem>>, vector<8x256xbf16>,
    %c108 = arith.constant 108 : index
    %501 = memref.load %arg1[%c108] : memref<146xf32, #tpu.memory_space<smem>>
    %502 = vector.broadcast %501 : f32 to vector<8x256xf32>
    %503 = arith.mulf %502, %68 : vector<8x256xf32>
    %c109 = arith.constant 109 : index
    %504 = memref.load %arg1[%c109] : memref<146xf32, #tpu.memory_space<smem>>
    %505 = vector.broadcast %504 : f32 to vector<8x256xf32>
    %506 = arith.mulf %505, %104 : vector<8x256xf32>
    %507 = arith.addf %503, %506 : vector<8x256xf32>
    %c110 = arith.constant 110 : index
    %508 = memref.load %arg1[%c110] : memref<146xf32, #tpu.memory_space<smem>>
    %509 = vector.broadcast %508 : f32 to vector<8x256xf32>
    %510 = arith.mulf %509, %140 : vector<8x256xf32>
    %511 = arith.addf %507, %510 : vector<8x256xf32>
    %c111 = arith.constant 111 : index
    %512 = memref.load %arg1[%c111] : memref<146xf32, #tpu.memory_space<smem>>
    %513 = vector.broadcast %512 : f32 to vector<8x256xf32>
    %514 = arith.mulf %513, %354 : vector<8x256xf32>
    %515 = arith.addf %511, %514 : vector<8x256xf32>
    %c112 = arith.constant 112 : index
    %516 = memref.load %arg1[%c112] : memref<146xf32, #tpu.memory_space<smem>>
    %517 = vector.broadcast %516 : f32 to vector<8x256xf32>
    %518 = arith.mulf %517, %382 : vector<8x256xf32>
    %519 = arith.addf %515, %518 : vector<8x256xf32>
    %c113 = arith.constant 113 : index
    %520 = memref.load %arg1[%c113] : memref<146xf32, #tpu.memory_space<smem>>
    %521 = vector.broadcast %520 : f32 to vector<8x256xf32>
    %522 = arith.mulf %521, %410 : vector<8x256xf32>
    %523 = arith.addf %519, %522 : vector<8x256xf32>
    %c141 = arith.constant 141 : index
    %524 = memref.load %arg1[%c141] : memref<146xf32, #tpu.memory_space<smem>>
    %525 = vector.broadcast %524 : f32 to vector<8x256xf32>
    %526 = arith.addf %523, %525 : vector<8x256xf32>
    %cst_43 = arith.constant 0.000000e+00 : f32
    %527 = vector.broadcast %cst_43 : f32 to vector<8x256xf32>
    %528 = arith.maximumf %526, %527 : vector<8x256xf32>
    %529 = arith.truncf %528 : vector<8x256xf32> to vector<8x256xbf16>
    %c0_44 = arith.constant 0 : index
    %c768 = arith.constant 768 : index
    %530 = vector.load %arg8[%c0_44, %c768] : memref<8x2048xbf16, #tpu.memory_space<vmem>>, vector<8x256xbf16>
    tpu.vector_store %arg8[%c0_44, %c768], %529 {strides = array<i32>} : memref<8x2048xbf16, #tpu.memory_space<vmem>>, vector<8x256xbf16>,
    %c114 = arith.constant 114 : index
    %531 = memref.load %arg1[%c114] : memref<146xf32, #tpu.memory_space<smem>>
    %532 = vector.broadcast %531 : f32 to vector<8x256xf32>
    %533 = arith.mulf %532, %68 : vector<8x256xf32>
    %c115 = arith.constant 115 : index
    %534 = memref.load %arg1[%c115] : memref<146xf32, #tpu.memory_space<smem>>
    %535 = vector.broadcast %534 : f32 to vector<8x256xf32>
    %536 = arith.mulf %535, %104 : vector<8x256xf32>
    %537 = arith.addf %533, %536 : vector<8x256xf32>
    %c116 = arith.constant 116 : index
    %538 = memref.load %arg1[%c116] : memref<146xf32, #tpu.memory_space<smem>>
    %539 = vector.broadcast %538 : f32 to vector<8x256xf32>
    %540 = arith.mulf %539, %140 : vector<8x256xf32>
    %541 = arith.addf %537, %540 : vector<8x256xf32>
    %c117 = arith.constant 117 : index
    %542 = memref.load %arg1[%c117] : memref<146xf32, #tpu.memory_space<smem>>
    %543 = vector.broadcast %542 : f32 to vector<8x256xf32>
    %544 = arith.mulf %543, %354 : vector<8x256xf32>
    %545 = arith.addf %541, %544 : vector<8x256xf32>
    %c118 = arith.constant 118 : index
    %546 = memref.load %arg1[%c118] : memref<146xf32, #tpu.memory_space<smem>>
    %547 = vector.broadcast %546 : f32 to vector<8x256xf32>
    %548 = arith.mulf %547, %382 : vector<8x256xf32>
    %549 = arith.addf %545, %548 : vector<8x256xf32>
    %c119 = arith.constant 119 : index
    %550 = memref.load %arg1[%c119] : memref<146xf32, #tpu.memory_space<smem>>
    %551 = vector.broadcast %550 : f32 to vector<8x256xf32>
    %552 = arith.mulf %551, %410 : vector<8x256xf32>
    %553 = arith.addf %549, %552 : vector<8x256xf32>
    %c142 = arith.constant 142 : index
    %554 = memref.load %arg1[%c142] : memref<146xf32, #tpu.memory_space<smem>>
    %555 = vector.broadcast %554 : f32 to vector<8x256xf32>
    %556 = arith.addf %553, %555 : vector<8x256xf32>
    %cst_45 = arith.constant 0.000000e+00 : f32
    %557 = vector.broadcast %cst_45 : f32 to vector<8x256xf32>
    %558 = arith.maximumf %556, %557 : vector<8x256xf32>
    %559 = arith.truncf %558 : vector<8x256xf32> to vector<8x256xbf16>
    %c0_46 = arith.constant 0 : index
    %c1024 = arith.constant 1024 : index
    %560 = vector.load %arg8[%c0_46, %c1024] : memref<8x2048xbf16, #tpu.memory_space<vmem>>, vector<8x256xbf16>
    tpu.vector_store %arg8[%c0_46, %c1024], %559 {strides = array<i32>} : memref<8x2048xbf16, #tpu.memory_space<vmem>>, vector<8x256xbf16>,
    %c120 = arith.constant 120 : index
    %561 = memref.load %arg1[%c120] : memref<146xf32, #tpu.memory_space<smem>>
    %562 = vector.broadcast %561 : f32 to vector<8x256xf32>
    %563 = arith.mulf %562, %68 : vector<8x256xf32>
    %c121 = arith.constant 121 : index
    %564 = memref.load %arg1[%c121] : memref<146xf32, #tpu.memory_space<smem>>
    %565 = vector.broadcast %564 : f32 to vector<8x256xf32>
    %566 = arith.mulf %565, %104 : vector<8x256xf32>
    %567 = arith.addf %563, %566 : vector<8x256xf32>
    %c122 = arith.constant 122 : index
    %568 = memref.load %arg1[%c122] : memref<146xf32, #tpu.memory_space<smem>>
    %569 = vector.broadcast %568 : f32 to vector<8x256xf32>
    %570 = arith.mulf %569, %140 : vector<8x256xf32>
    %571 = arith.addf %567, %570 : vector<8x256xf32>
    %c123 = arith.constant 123 : index
    %572 = memref.load %arg1[%c123] : memref<146xf32, #tpu.memory_space<smem>>
    %573 = vector.broadcast %572 : f32 to vector<8x256xf32>
    %574 = arith.mulf %573, %354 : vector<8x256xf32>
    %575 = arith.addf %571, %574 : vector<8x256xf32>
    %c124 = arith.constant 124 : index
    %576 = memref.load %arg1[%c124] : memref<146xf32, #tpu.memory_space<smem>>
    %577 = vector.broadcast %576 : f32 to vector<8x256xf32>
    %578 = arith.mulf %577, %382 : vector<8x256xf32>
    %579 = arith.addf %575, %578 : vector<8x256xf32>
    %c125 = arith.constant 125 : index
    %580 = memref.load %arg1[%c125] : memref<146xf32, #tpu.memory_space<smem>>
    %581 = vector.broadcast %580 : f32 to vector<8x256xf32>
    %582 = arith.mulf %581, %410 : vector<8x256xf32>
    %583 = arith.addf %579, %582 : vector<8x256xf32>
    %c143 = arith.constant 143 : index
    %584 = memref.load %arg1[%c143] : memref<146xf32, #tpu.memory_space<smem>>
    %585 = vector.broadcast %584 : f32 to vector<8x256xf32>
    %586 = arith.addf %583, %585 : vector<8x256xf32>
    %cst_47 = arith.constant 0.000000e+00 : f32
    %587 = vector.broadcast %cst_47 : f32 to vector<8x256xf32>
    %588 = arith.maximumf %586, %587 : vector<8x256xf32>
    %589 = arith.truncf %588 : vector<8x256xf32> to vector<8x256xbf16>
    %c0_48 = arith.constant 0 : index
    %c1280 = arith.constant 1280 : index
    %590 = vector.load %arg8[%c0_48, %c1280] : memref<8x2048xbf16, #tpu.memory_space<vmem>>, vector<8x256xbf16>
    tpu.vector_store %arg8[%c0_48, %c1280], %589 {strides = array<i32>} : memref<8x2048xbf16, #tpu.memory_space<vmem>>, vector<8x256xbf16>,
    %c126 = arith.constant 126 : index
    %591 = memref.load %arg1[%c126] : memref<146xf32, #tpu.memory_space<smem>>
    %592 = vector.broadcast %591 : f32 to vector<8x256xf32>
    %593 = arith.mulf %592, %68 : vector<8x256xf32>
    %c127 = arith.constant 127 : index
    %594 = memref.load %arg1[%c127] : memref<146xf32, #tpu.memory_space<smem>>
    %595 = vector.broadcast %594 : f32 to vector<8x256xf32>
    %596 = arith.mulf %595, %104 : vector<8x256xf32>
    %597 = arith.addf %593, %596 : vector<8x256xf32>
    %c128 = arith.constant 128 : index
    %598 = memref.load %arg1[%c128] : memref<146xf32, #tpu.memory_space<smem>>
    %599 = vector.broadcast %598 : f32 to vector<8x256xf32>
    %600 = arith.mulf %599, %140 : vector<8x256xf32>
    %601 = arith.addf %597, %600 : vector<8x256xf32>
    %c129 = arith.constant 129 : index
    %602 = memref.load %arg1[%c129] : memref<146xf32, #tpu.memory_space<smem>>
    %603 = vector.broadcast %602 : f32 to vector<8x256xf32>
    %604 = arith.mulf %603, %354 : vector<8x256xf32>
    %605 = arith.addf %601, %604 : vector<8x256xf32>
    %c130 = arith.constant 130 : index
    %606 = memref.load %arg1[%c130] : memref<146xf32, #tpu.memory_space<smem>>
    %607 = vector.broadcast %606 : f32 to vector<8x256xf32>
    %608 = arith.mulf %607, %382 : vector<8x256xf32>
    %609 = arith.addf %605, %608 : vector<8x256xf32>
    %c131 = arith.constant 131 : index
    %610 = memref.load %arg1[%c131] : memref<146xf32, #tpu.memory_space<smem>>
    %611 = vector.broadcast %610 : f32 to vector<8x256xf32>
    %612 = arith.mulf %611, %410 : vector<8x256xf32>
    %613 = arith.addf %609, %612 : vector<8x256xf32>
    %c144 = arith.constant 144 : index
    %614 = memref.load %arg1[%c144] : memref<146xf32, #tpu.memory_space<smem>>
    %615 = vector.broadcast %614 : f32 to vector<8x256xf32>
    %616 = arith.addf %613, %615 : vector<8x256xf32>
    %cst_49 = arith.constant 0.000000e+00 : f32
    %617 = vector.broadcast %cst_49 : f32 to vector<8x256xf32>
    %618 = arith.maximumf %616, %617 : vector<8x256xf32>
    %619 = arith.truncf %618 : vector<8x256xf32> to vector<8x256xbf16>
    %c0_50 = arith.constant 0 : index
    %c1536 = arith.constant 1536 : index
    %620 = vector.load %arg8[%c0_50, %c1536] : memref<8x2048xbf16, #tpu.memory_space<vmem>>, vector<8x256xbf16>
    tpu.vector_store %arg8[%c0_50, %c1536], %619 {strides = array<i32>} : memref<8x2048xbf16, #tpu.memory_space<vmem>>, vector<8x256xbf16>,
    %c132 = arith.constant 132 : index
    %621 = memref.load %arg1[%c132] : memref<146xf32, #tpu.memory_space<smem>>
    %622 = vector.broadcast %621 : f32 to vector<8x256xf32>
    %623 = arith.mulf %622, %68 : vector<8x256xf32>
    %c133 = arith.constant 133 : index
    %624 = memref.load %arg1[%c133] : memref<146xf32, #tpu.memory_space<smem>>
    %625 = vector.broadcast %624 : f32 to vector<8x256xf32>
    %626 = arith.mulf %625, %104 : vector<8x256xf32>
    %627 = arith.addf %623, %626 : vector<8x256xf32>
    %c134 = arith.constant 134 : index
    %628 = memref.load %arg1[%c134] : memref<146xf32, #tpu.memory_space<smem>>
    %629 = vector.broadcast %628 : f32 to vector<8x256xf32>
    %630 = arith.mulf %629, %140 : vector<8x256xf32>
    %631 = arith.addf %627, %630 : vector<8x256xf32>
    %c135 = arith.constant 135 : index
    %632 = memref.load %arg1[%c135] : memref<146xf32, #tpu.memory_space<smem>>
    %633 = vector.broadcast %632 : f32 to vector<8x256xf32>
    %634 = arith.mulf %633, %354 : vector<8x256xf32>
    %635 = arith.addf %631, %634 : vector<8x256xf32>
    %c136 = arith.constant 136 : index
    %636 = memref.load %arg1[%c136] : memref<146xf32, #tpu.memory_space<smem>>
    %637 = vector.broadcast %636 : f32 to vector<8x256xf32>
    %638 = arith.mulf %637, %382 : vector<8x256xf32>
    %639 = arith.addf %635, %638 : vector<8x256xf32>
    %c137 = arith.constant 137 : index
    %640 = memref.load %arg1[%c137] : memref<146xf32, #tpu.memory_space<smem>>
    %641 = vector.broadcast %640 : f32 to vector<8x256xf32>
    %642 = arith.mulf %641, %410 : vector<8x256xf32>
    %643 = arith.addf %639, %642 : vector<8x256xf32>
    %c145 = arith.constant 145 : index
    %644 = memref.load %arg1[%c145] : memref<146xf32, #tpu.memory_space<smem>>
    %645 = vector.broadcast %644 : f32 to vector<8x256xf32>
    %646 = arith.addf %643, %645 : vector<8x256xf32>
    %cst_51 = arith.constant 0.000000e+00 : f32
    %647 = vector.broadcast %cst_51 : f32 to vector<8x256xf32>
    %648 = arith.maximumf %646, %647 : vector<8x256xf32>
    %649 = arith.truncf %648 : vector<8x256xf32> to vector<8x256xbf16>
    %c0_52 = arith.constant 0 : index
    %c1792 = arith.constant 1792 : index
    %650 = vector.load %arg8[%c0_52, %c1792] : memref<8x2048xbf16, #tpu.memory_space<vmem>>, vector<8x256xbf16>
    tpu.vector_store %arg8[%c0_52, %c1792], %649 {strides = array<i32>} : memref<8x2048xbf16, #tpu.memory_space<vmem>>, vector<8x256xbf16>,
    %c0_53 = arith.constant 0 : index
    %c0_54 = arith.constant 0 : index
    %651 = vector.load %arg8[%c0_53, %c0_54] : memref<8x2048xbf16, #tpu.memory_space<vmem>>, vector<8x2048xbf16>
    %c0_55 = arith.constant 0 : index
    %c0_56 = arith.constant 0 : index
    %652 = vector.load %arg4[%c0_55, %c0_56] : memref<2048x56xbf16, #tpu.memory_space<vmem>>, vector<2048x56xbf16>
    %cst_57 = arith.constant dense<0.000000e+00> : vector<8x56xf32>
    %653 = tpu.matmul %651, %652, %cst_57 {dimension_numbers = #tpu.dot_dimension_numbers<[1], [0], [0], [1], [0, 0, 1, 1], [], []>} : vector<8x2048xbf16>, vector<2048x56xbf16>, vector<8x56xf32> -> vector<8x56xf32>
    %c0_58 = arith.constant 0 : index
    %c0_59 = arith.constant 0 : index
    %654 = vector.load %arg3[%c0_58, %c0_59] : memref<8x56xf32, #tpu.memory_space<vmem>>, vector<8x56xf32>
    %655 = arith.addf %653, %654 : vector<8x56xf32>
    %cst_60 = arith.constant 0.000000e+00 : f32
    %656 = vector.broadcast %cst_60 : f32 to vector<8x56xf32>
    %657 = arith.maximumf %655, %656 : vector<8x56xf32>
    %658 = arith.truncf %657 : vector<8x56xf32> to vector<8x56xbf16>
    %c0_61 = arith.constant 0 : index
    %c0_62 = arith.constant 0 : index
    %659 = vector.load %arg5[%c0_61, %c0_62] : memref<56x28xbf16, #tpu.memory_space<vmem>>, vector<56x28xbf16>
    %cst_63 = arith.constant dense<0.000000e+00> : vector<8x28xf32>
    %660 = tpu.matmul %658, %659, %cst_63 {dimension_numbers = #tpu.dot_dimension_numbers<[1], [0], [0], [1], [0, 0, 1, 1], [], []>} : vector<8x56xbf16>, vector<56x28xbf16>, vector<8x28xf32> -> vector<8x28xf32>
    %c0_64 = arith.constant 0 : index
    %c0_65 = arith.constant 0 : index
    %661 = vector.load %arg6[%c0_64, %c0_65] : memref<1x28xf32, #tpu.memory_space<vmem>>, vector<1x28xf32>
    %662 = vector.broadcast %661 : vector<1x28xf32> to vector<8x28xf32>
    %663 = arith.addf %660, %662 : vector<8x28xf32>
    %c0_66 = arith.constant 0 : index
    %c0_67 = arith.constant 0 : index
    %664 = vector.load %arg7[%c0_66, %c0_67] : memref<8x28xf32, #tpu.memory_space<vmem>>, vector<8x28xf32>
    tpu.vector_store %arg7[%c0_66, %c0_67], %663 {strides = array<i32>} : memref<8x28xf32, #tpu.memory_space<vmem>>, vector<8x28xf32>,
    return
  }
  func.func @transform_0(%arg0: i32) -> i32 {
    %c0_i32 = arith.constant 0 : i32
    %c0_i32_0 = arith.constant 0 : i32
    return %c0_i32 : i32
  }
  func.func @transform_1(%arg0: i32) -> (i32, i32, i32) {
    %c0_i32 = arith.constant 0 : i32
    %c0_i32_0 = arith.constant 0 : i32
    %c0_i32_1 = arith.constant 0 : i32
    return %c0_i32, %arg0, %c0_i32_0 : i32, i32, i32
  }
  func.func @transform_2(%arg0: i32) -> (i32, i32) {
    %c0_i32 = arith.constant 0 : i32
    %c0_i32_0 = arith.constant 0 : i32
    return %arg0, %c0_i32 : i32, i32
  }
  func.func @transform_3(%arg0: i32) -> (i32, i32) {
    %c0_i32 = arith.constant 0 : i32
    %c0_i32_0 = arith.constant 0 : i32
    %c0_i32_1 = arith.constant 0 : i32
    return %c0_i32, %c0_i32_0 : i32, i32
  }
  func.func @transform_4(%arg0: i32) -> (i32, i32) {
    %c0_i32 = arith.constant 0 : i32
    %c0_i32_0 = arith.constant 0 : i32
    %c0_i32_1 = arith.constant 0 : i32
    return %c0_i32, %c0_i32_0 : i32, i32
  }
  func.func @transform_5(%arg0: i32) -> (i32, i32) {
    %c0_i32 = arith.constant 0 : i32
    %c0_i32_0 = arith.constant 0 : i32
    %c0_i32_1 = arith.constant 0 : i32
    return %c0_i32, %c0_i32_0 : i32, i32
  }
  func.func @transform_6(%arg0: i32) -> (i32, i32) {
    %c0_i32 = arith.constant 0 : i32
    %c0_i32_0 = arith.constant 0 : i32
    return %arg0, %c0_i32 : i32, i32
  }
}

</mosaic_0001>

<bundles_post_ra>
// kernel: forward.1
= control target key start
LH: loop header
LB: loop body
LE: loop exit
PB: predicated region body
PF: predicated region fallthrough
CT: control target
= control target key end

     0   :  { %11 = vsyncpa [#allocation4], 0  ;;  %s4798_s0 = inlined_call_operand.vmem [shape: f32[146], index: 0, kind: input, shape index: {}]   ;;  %s4799_s1 = inlined_call_operand.vmem [shape: f32[4,8,256], index: 1, kind: input, shape index: {}]   ;;  %s4800_s2 = inlined_call_operand.vmem [shape: f32[8,56], index: 2, kind: input, shape index: {}]   ;;  %s4801_s3 = inlined_call_operand.vmem [shape: bf16[2048,56], index: 3, kind: input, shape index: {}]   ;;  %s4802_s4 = inlined_call_operand.vmem [shape: bf16[56,28], index: 4, kind: input, shape index: {}]   ;;  %s4803_s5 = inlined_call_operand.vmem [shape: f32[1,28], index: 5, kind: input, shape index: {}]   ;;  %s4804_s6 = inlined_call_operand.vmem [shape: f32[8,28], index: 6, kind: output, shape index: {}]  }
   0x1   :  { %s18_s23 = sshll.u32 %s4798_s0, 4  ;;  %s19_s23 = int_to_ptr.vmem [resolvable:$true] %s18_s23 }
   0x2   :  { %s3261_s24 = scalar_lea.vmem %s19_s23, 32  ;;  %p3266_p1 = scmp.lt.s32.totalorder %s19_s23, %s19_s23 }
   0x3   :  { %p3262_p0 = scmp.ne.s32.totalorder %s19_s23, %s3261_s24  ;;  %p3267_p2 = scmp.lt.s32.totalorder %s3261_s24, %s3261_s24 }
   0x5   :  { %p3268_p3 = por %p3267_p2, %p3266_p1 }
   0x7   :  { %p3269_p4 = pnand %p3268_p3, %p3262_p0 }
   0x9   :  { %3272 = shalt.err (!%p3269_p4)
}
   0xa   :  { %s3275_s25 = smov [#allocation3]  }
   0xb   :  { %21 = dma.vmem_to_smem %s19_s23, 32, %s3275_s25, [#allocation4]  }
   0xc   :  { %3273 = dma.done.wait [#allocation4], 32  }
   0xd   :  { %3274 = vsyncadd [#allocation4], 4294967264 }
   0xe   :  { %35 = sfence }
   0xf   :  { %v2596_v0 = vld [vmem:[%s4799_s1 + $0x10] sm:$0xff]  ;;  %v64_v1 = vld [vmem:[%s4799_s1] sm:$0xff]  ;;  %s3276_s0 = smov 1   ;;  %v2597_v2 = vld [vmem:[%s4799_s1 + $0x18] sm:$0xff]  ;;  %s3359_s18 = sld [smem:[#allocation3 + $0x3]]  ;;  %v37_v8 = vlaneseq  ;;  %v4805_v10 = vmov 0.0  }
  0x10   :  { %84 = vrot.lane.b32.xlu1 %v2596_v0, %s3276_s0  ;;  %75 = vrot.lane.b32.xlu0 %v64_v1, %s3276_s0  ;;  %v3332_v3 = vld [vmem:[%s4799_s1 + $0x8] sm:$0xff]  ;;  %v3343_v5 = vld [vmem:[%s4799_s1 + $0x20] sm:$0xff]  ;;  %s3361_s19 = sld [smem:[#allocation3 + $0xb]]  ;;  %s3365_s21 = sld [smem:[#allocation3 + $0x1]]  ;;  %vm3281_vm8 = vmmov 0   ;;  %vm2541_vm9 = vcmask 1043456  }
  0x11   :  { %v3338_v4 = vld [vmem:[%s4799_s1 + $0x28] sm:$0xff]  ;;  %v3350_v6 = vld [vmem:[%s4799_s1 + $0x38] sm:$0xff]  ;;  %v3355_v7 = vld [vmem:[%s4799_s1 + $0x30] sm:$0xff]  ;;  %s3363_s20 = sld [smem:[#allocation3 + $0x13]]  ;;  %s3367_s22 = sld [smem:[#allocation3 + $0x9]]  ;;  %v3373_v9 = vand.u32 127, %v37_v8 }
  0x12   :  { %s3369_s23 = sld [smem:[#allocation3 + $0x11]]  ;;  %s3371_s24 = sld [smem:[#allocation3 + $0x5]]  ;;  %vm2537_vm10 = vcmask 457728   ;;  %vm2585_vm11 = vcmask 228352  }
  0x13   :  { %s3375_s1 = sld [smem:[#allocation3 + $0xd]]  ;;  %s3379_s26 = sld [smem:[#allocation3 + $0x7]]  ;;  %vm40_vm0 = vcmp.ge.s32.totalorder %v3373_v9, 1  ;;  %vm79_vm1 = vcmp.lt.s32.totalorder %v3373_v9, 1  ;;  %vm46_vm2 = vcmp.ge.s32.totalorder %v3373_v9, 2  ;;  %vm268_vm3 = vcmp.lt.s32.totalorder %v3373_v9, 2 }
  0x14   :  { %86 = vrot.lane.b32.xlu1 %v2597_v2, %s3276_s0  ;;  %77 = vrot.lane.b32.xlu0 %v3332_v3, %s3276_s0  ;;  %s3377_s25 = sld [smem:[#allocation3 + $0x15]]  ;;  %s3381_s27 = sld [smem:[#allocation3 + $0xf]]  ;;  %v3389_v11 = vsel %vm40_vm0, 1.0, %v4805_v10  ;;  %vm52_vm4 = vcmp.ge.s32.totalorder %v3373_v9, 4  ;;  %vm413_vm5 = vcmp.lt.s32.totalorder %v3373_v9, 4  ;;  %vm58_vm6 = vcmp.ge.s32.totalorder %v3373_v9, 8 }
  0x15   :  { %s3384_s28 = sld [smem:[#allocation3 + $0x17]]  ;;  %s3386_s29 = sld [smem:[#allocation3 + $0x2]]  ;;  %v123_v12 = vstv %s3359_s18  ;;  %vm558_vm7 = vcmp.lt.s32.totalorder %v3373_v9, 8 }
  0x16   :  { %s3393_s30 = sld [smem:[#allocation3 + $0x12]]  ;;  %s3395_s7 = sld [smem:[#allocation3]]  ;;  %v175_v13 = vstv %s3361_s19  ;;  %v113_v15 = vstv %s3365_s21  ;;  %v3421_v18 = vmul.f32 %v2596_v0, %v123_v12  ;;  %v125_v19 = vmul.f32 %v2597_v2, %v123_v12 }
  0x17   :  { %s3397_s8 = sld [smem:[#allocation3 + $0x8]]  ;;  %s3401_s10 = sld [smem:[#allocation3 + $0x4]]  ;;  %v227_v14 = vstv %s3363_s20  ;;  %v165_v16 = vstv %s3367_s22  ;;  %v3425_v21 = vmul.f32 %v2596_v0, %v175_v13  ;;  %v3429_v23 = vmul.f32 %v113_v15, %v64_v1 }
  0x18   :  { %94 = vrot.lane.b32.xlu1 %v3338_v4, %s3276_s0  ;;  %92 = vrot.lane.b32.xlu0 %v3343_v5, %s3276_s0  ;;  %s3399_s9 = sld [smem:[#allocation3 + $0x10]]  ;;  %s3403_s11 = sld [smem:[#allocation3 + $0xc]]  ;;  %v217_v17 = vstv %s3369_s23  ;;  %v135_v20 = vstv %s3371_s24  ;;  %v3427_v22 = vmul.f32 %v2596_v0, %v227_v14  ;;  %v3432_v25 = vmul.f32 %v165_v16, %v64_v1 }
  0x19   :  { %s3405_s12 = sld [smem:[#allocation3 + $0x14]]  ;;  %s3407_s13 = sld [smem:[#allocation3 + $0x6]]  ;;  %v187_v24 = vstv %s3375_s1  ;;  %v3434_v26 = vmul.f32 %v217_v17, %v64_v1  ;;  %v177_v27 = vmul.f32 %v2597_v2, %v175_v13  ;;  %v229_v29 = vmul.f32 %v2597_v2, %v227_v14 }
  0x1a   :  { %s3409_s14 = sld [smem:[#allocation3 + $0x18]]  ;;  %s3411_s15 = sld [smem:[#allocation3 + $0xe]]  ;;  %v239_v28 = vstv %s3377_s25  ;;  %v115_v30 = vmul.f32 %v113_v15, %v3332_v3  ;;  %v147_v31 = vstv %s3379_s26  ;;  %v199_v32 = vstv %s3381_s27 }
  0x1b   :  { %s3413_s16 = sld [smem:[#allocation3 + $0x16]]  ;;  %v167_v33 = vmul.f32 %v165_v16, %v3332_v3  ;;  %v3442_v34 = vmul.f32 %v217_v17, %v3332_v3  ;;  %v3445_v35 = vmul.f32 %v3338_v4, %v135_v20  ;;  %v251_v36 = vstv %s3384_s28  ;;  %s3516_s17 = sld [smem:[#allocation3 + $0x19]] }
  0x1c   :  { %102 = vrot.lane.b32.xlu1 %v3350_v6, %s3276_s0  ;;  %100 = vrot.lane.b32.xlu0 %v3355_v7, %s3276_s0  ;;  %s3391_s0 = sld [smem:[#allocation3 + $0xa]]  ;;  %v3449_v37 = vmul.f32 %v3338_v4, %v187_v24  ;;  %v3452_v38 = vmul.f32 %v3338_v4, %v239_v28  ;;  %v3455_v39 = vmul.f32 %v3343_v5, %v135_v20  ;;  %v120_v50 = vstv %s3386_s29  ;;  %s3549_s20 = sld [smem:[#allocation3 + $0x5b]] }
  0x1d   :  { %v3458_v40 = vmul.f32 %v3343_v5, %v187_v24  ;;  %v3461_v41 = vmul.f32 %v3343_v5, %v239_v28  ;;  %v3464_v42 = vmul.f32 %v3350_v6, %v147_v31  ;;  %v3467_v43 = vmul.f32 %v3350_v6, %v199_v32  ;;  %s3530_s18 = sld [smem:[#allocation3 + $0x1a]]  ;;  %s3551_s21 = sld [smem:[#allocation3 + $0x5c]] }
  0x1e   :  { %v3470_v44 = vmul.f32 %v3355_v7, %v147_v31  ;;  %v3473_v47 = vmul.f32 %v3350_v6, %v251_v36  ;;  %v3476_v48 = vmul.f32 %v3355_v7, %v199_v32  ;;  %v3479_v49 = vmul.f32 %v3355_v7, %v251_v36  ;;  %s3543_s19 = sld [smem:[#allocation3 + $0x5a]]  ;;  %s3557_s22 = sld [smem:[#allocation3 + $0x60]] }
  0x1f   :  { %v224_v52 = vstv %s3393_s30  ;;  %v110_v53 = vstv %s3395_s7  ;;  %v162_v54 = vstv %s3397_s8  ;;  %v214_v55 = vstv %s3399_s9  ;;  %s3559_s23 = sld [smem:[#allocation3 + $0x61]]  ;;  %s3562_s24 = sld [smem:[#allocation3 + $0x62]] }
  0x20   :  { %v132_v56 = vstv %s3401_s10  ;;  %v184_v57 = vstv %s3403_s11  ;;  %v236_v58 = vstv %s3405_s12  ;;  %v144_v61 = vstv %s3407_s13  ;;  %s3564_s1 = sld [smem:[#allocation3 + $0x66]]  ;;  %s3568_s25 = sld [smem:[#allocation3 + $0x67]] }
  0x21   :  { %v155_v62 = vstv %s3409_s14  ;;  %v196_v63 = vstv %s3411_s15  ;;  %v248_v0 = vstv %s3413_s16  ;;  %s3570_s26 = sld [smem:[#allocation3 + $0x68]]  ;;  %s3573_s27 = sld [smem:[#allocation3 + $0x6c]] }
  0x22   :  { %v172_v51 = vstv %s3391_s0  ;;  %s3575_s28 = sld [smem:[#allocation3 + $0x6d]]  ;;  %s3278_s29 = smov 2  }
  0x23   :  { %s3581_s0 = sld [smem:[#allocation3 + $0x6e]]  ;;  %s3583_s30 = sld [smem:[#allocation3 + $0x72]] }
  0x24   :  { %s3585_s7 = sld [smem:[#allocation3 + $0x73]]  ;;  %s3591_s8 = sld [smem:[#allocation3 + $0x74]] }
  0x25   :  { %s3610_s9 = sld [smem:[#allocation3 + $0x78]]  ;;  %s3612_s10 = sld [smem:[#allocation3 + $0x79]] }
  0x26   :  { %s3618_s11 = sld [smem:[#allocation3 + $0x7a]]  ;;  %s3620_s12 = sld [smem:[#allocation3 + $0x7e]] }
  0x27   :  { %s3630_s13 = sld [smem:[#allocation3 + $0x7f]]  ;;  %s3636_s14 = sld [smem:[#allocation3 + $0x80]] }
  0x28   :  { %s3638_s15 = sld [smem:[#allocation3 + $0x84]]  ;;  %s3643_s16 = sld [smem:[#allocation3 + $0x85]] }
  0x82   :  { %v85_v45 = vpop.permute.xlu1 %84  ;;  %v76_v46 = vpop.permute.xlu0 %75 }
  0x86   :  { %v87_v59 = vpop.permute.xlu1 %86  ;;  %v78_v60 = vpop.permute.xlu0 %77 }
  0x87   :  { %v88_v1 = vsel %vm79_vm1, %v85_v45, %v87_v59  ;;  %v89_v2 = vsel %vm79_vm1, %v87_v59, %v85_v45  ;;  %v80_v3 = vsel %vm79_vm1, %v76_v46, %v78_v60  ;;  %v81_v4 = vsel %vm79_vm1, %v78_v60, %v76_v46 }
  0x88   :  { %v90_v5 = vmul.f32 %v3389_v11, %v89_v2  ;;  %v122_v6 = vmul.f32 %v120_v50, %v88_v1  ;;  %v174_v7 = vmul.f32 %v172_v51, %v88_v1  ;;  %v226_v8 = vmul.f32 %v224_v52, %v88_v1 }
  0x89   :  { %v82_v12 = vmul.f32 %v3389_v11, %v81_v4  ;;  %v112_v13 = vmul.f32 %v110_v53, %v80_v3  ;;  %v164_v14 = vmul.f32 %v162_v54, %v80_v3  ;;  %v216_v15 = vmul.f32 %v214_v55, %v80_v3 }
  0x8a   :  { %v121_v16 = vmul.f32 %v120_v50, %v90_v5  ;;  %v127_v17 = vadd.f32 %v125_v19, %v122_v6  ;;  %v173_v20 = vmul.f32 %v172_v51, %v90_v5  ;;  %v179_v24 = vadd.f32 %v177_v27, %v174_v7  ;;  %v95_v28 = vpop.permute.xlu1 %94  ;;  %v93_v31 = vpop.permute.xlu0 %92 }
  0x8b   :  { %v225_v32 = vmul.f32 %v224_v52, %v90_v5  ;;  %v231_v36 = vadd.f32 %v229_v29, %v226_v8  ;;  %v111_v45 = vmul.f32 %v110_v53, %v82_v12  ;;  %v117_v46 = vadd.f32 %v115_v30, %v112_v13 }
  0x8c   :  { %v126_v59 = vadd.f32 %v3421_v18, %v121_v16  ;;  %v178_v60 = vadd.f32 %v3425_v21, %v173_v20  ;;  %v163_v1 = vmul.f32 %v162_v54, %v82_v12  ;;  %v169_v2 = vadd.f32 %v167_v33, %v164_v14 }
  0x8d   :  { %v230_v4 = vadd.f32 %v3427_v22, %v225_v32  ;;  %v116_v3 = vadd.f32 %v3429_v23, %v111_v45  ;;  %v129_v50 = vadd.f32 %v127_v17, %v117_v46  ;;  %v215_v19 = vmul.f32 %v214_v55, %v82_v12 }
  0x8e   :  { %v168_v27 = vadd.f32 %v3432_v25, %v163_v1  ;;  %v181_v51 = vadd.f32 %v179_v24, %v169_v2  ;;  %v221_v52 = vadd.f32 %v3442_v34, %v216_v15  ;;  %v96_v29 = vsel %vm79_vm1, %v93_v31, %v95_v28  ;;  %v103_v30 = vpop.permute.xlu1 %102  ;;  %v101_v18 = vpop.permute.xlu0 %100 }
  0x8f   :  { %v128_v53 = vadd.f32 %v126_v59, %v116_v3  ;;  %v220_v21 = vadd.f32 %v3434_v26, %v215_v19  ;;  %v97_v22 = vsel %vm79_vm1, %v95_v28, %v93_v31  ;;  %v134_v33 = vmul.f32 %v132_v56, %v96_v29 }
  0x90   :  { %v180_v23 = vadd.f32 %v178_v60, %v168_v27  ;;  %v233_v54 = vadd.f32 %v231_v36, %v221_v52  ;;  %v98_v25 = vmul.f32 %v3389_v11, %v97_v22  ;;  %v186_v55 = vmul.f32 %v184_v57, %v96_v29 }
  0x91   :  { %v232_v34 = vadd.f32 %v230_v4, %v220_v21  ;;  %v139_v5 = vadd.f32 %v3445_v35, %v134_v33  ;;  %v238_v6 = vmul.f32 %v236_v58, %v96_v29  ;;  %v104_v7 = vsel %vm79_vm1, %v101_v18, %v103_v30 }
  0x92   :  { %v133_v26 = vmul.f32 %v132_v56, %v98_v25  ;;  %v185_v8 = vmul.f32 %v184_v57, %v98_v25  ;;  %v191_v12 = vadd.f32 %v3449_v37, %v186_v55  ;;  %v237_v13 = vmul.f32 %v236_v58, %v98_v25 }
  0x93   :  { %v141_v14 = vadd.f32 %v139_v5, %v129_v50  ;;  %v243_v15 = vadd.f32 %v3452_v38, %v238_v6  ;;  %v105_v16 = vsel %vm79_vm1, %v103_v30, %v101_v18  ;;  %v146_v35 = vmul.f32 %v144_v61, %v104_v7 }
  0x94   :  { %v138_v17 = vadd.f32 %v3455_v39, %v133_v26  ;;  %v190_v56 = vadd.f32 %v3458_v40, %v185_v8  ;;  %v193_v20 = vadd.f32 %v191_v12, %v181_v51  ;;  %v242_v37 = vadd.f32 %v3461_v41, %v237_v13 }
  0x95   :  { %v245_v57 = vadd.f32 %v243_v15, %v233_v54  ;;  %v106_v38 = vmul.f32 %v3389_v11, %v105_v16  ;;  %v151_v58 = vadd.f32 %v3464_v42, %v146_v35  ;;  %v198_v24 = vmul.f32 %v196_v63, %v104_v7 }
  0x96   :  { %v140_v28 = vadd.f32 %v138_v17, %v128_v53  ;;  %v192_v31 = vadd.f32 %v190_v56, %v180_v23  ;;  %v244_v39 = vadd.f32 %v242_v37, %v232_v34  ;;  %v250_v40 = vmul.f32 %v248_v0, %v104_v7 }
  0x97   :  { %v145_v32 = vmul.f32 %v144_v61, %v106_v38  ;;  %v153_v36 = vadd.f32 %v151_v58, %v141_v14  ;;  %v197_v41 = vmul.f32 %v196_v63, %v106_v38  ;;  %v203_v45 = vadd.f32 %v3467_v43, %v198_v24 }
  0x98   :  { %v207_v11 = vstv %s3516_s17  ;;  %v249_v42 = vmul.f32 %v248_v0, %v106_v38  ;;  %v255_v46 = vadd.f32 %v3473_v47, %v250_v40  ;;  %v700_v52 = vstv %s3543_s19  ;;  %s3645_s17 = sld [smem:[#allocation3 + $0x86]]  ;;  %s3733_s19 = sld [smem:[#allocation3 + $0x22]] }
  0x99   :  { %v150_v59 = vadd.f32 %v3470_v44, %v145_v32  ;;  %v157_v61 = vadd.f32 %v155_v62, %v153_v36  ;;  %v202_v63 = vadd.f32 %v3476_v48, %v197_v41  ;;  %v205_v60 = vadd.f32 %v203_v45, %v193_v20 }
  0x9a   :  { %v254_v43 = vadd.f32 %v3479_v49, %v249_v42  ;;  %v257_v47 = vadd.f32 %v255_v46, %v245_v57  ;;  %v259_v48 = vstv %s3530_s18  ;;  %v704_v29 = vstv %s3549_s20  ;;  %s3731_s18 = sld [smem:[#allocation3 + $0x1c]]  ;;  %s3735_s20 = sld [smem:[#allocation3 + $0x28]] }
  0x9b   :  { %v152_v0 = vadd.f32 %v150_v59, %v140_v28  ;;  %v3566_v44 = vmax.f32 %v157_v61, 0.0  ;;  %v204_v1 = vadd.f32 %v202_v63, %v192_v31  ;;  %v209_v2 = vadd.f32 %v207_v11, %v205_v60 }
  0x9c   :  { %v256_v4 = vadd.f32 %v254_v43, %v244_v39  ;;  %v261_v27 = vadd.f32 %v259_v48, %v257_v47  ;;  %v710_v30 = vstv %s3551_s21  ;;  %v749_v18 = vstv %s3557_s22  ;;  %s3737_s21 = sld [smem:[#allocation3 + $0x1e]]  ;;  %s3739_s22 = sld [smem:[#allocation3 + $0x24]] }
  0x9d   :  { %v156_v49 = vadd.f32 %v155_v62, %v152_v0  ;;  %v208_v3 = vadd.f32 %v207_v11, %v204_v1  ;;  %266 = vrot.lane.b32.xlu1 %v3566_v44, %s3278_s29  ;;  %v3589_v62 = vmax.f32 %v209_v2, 0.0  ;;  %v753_v53 = vstv %s3559_s23  ;;  %s3741_s23 = sld [smem:[#allocation3 + $0x2a]] }
  0x9e   :  { %v260_v19 = vadd.f32 %v259_v48, %v256_v4  ;;  %v3606_v22 = vmax.f32 %v261_v27, 0.0  ;;  %v759_v33 = vstv %s3562_s24  ;;  %v798_v23 = vstv %s3564_s1  ;;  %s3743_s24 = sld [smem:[#allocation3 + $0x20]]  ;;  %s3745_s1 = sld [smem:[#allocation3 + $0x26]] }
  0x9f   :  { %v3587_v50 = vmax.f32 %v156_v49, 0.0  ;;  %v3593_v51 = vmax.f32 %v208_v3, 0.0  ;;  %v802_v54 = vstv %s3568_s25  ;;  %v808_v25 = vstv %s3570_s26  ;;  %s3747_s25 = sld [smem:[#allocation3 + $0x1b]]  ;;  %s3749_s26 = sld [smem:[#allocation3 + $0x2c]] }
  0xa0   :  { %v3604_v21 = vmax.f32 %v260_v19, 0.0  ;;  %v847_v55 = vstv %s3573_s27  ;;  %v851_v34 = vstv %s3575_s28  ;;  %v702_v6 = vmul.f32 %v700_v52, %v3566_v44  ;;  %s3751_s27 = sld [smem:[#allocation3 + $0x21]]  ;;  %s3753_s28 = sld [smem:[#allocation3 + $0x27]] }
  0xa1   :  { %264 = vrot.lane.b32.xlu0 %v3587_v50, %s3278_s29  ;;  %275 = vrot.lane.b32.xlu1 %v3589_v62, %s3278_s29  ;;  %v701_v5 = vmul.f32 %v700_v52, %v3587_v50  ;;  %v705_v7 = vmul.f32 %v704_v29, %v3593_v51  ;;  %v857_v26 = vstv %s3581_s0  ;;  %v706_v8 = vmul.f32 %v704_v29, %v3589_v62  ;;  %s3757_s0 = sld [smem:[#allocation3 + $0x23]] }
  0xa2   :  { %v750_v12 = vmul.f32 %v749_v18, %v3587_v50  ;;  %v896_v13 = vstv %s3583_s30  ;;  %v900_v14 = vstv %s3585_s7  ;;  %v711_v16 = vmul.f32 %v710_v30, %v3604_v21  ;;  %s3759_s30 = sld [smem:[#allocation3 + $0x29]]  ;;  %s3761_s7 = sld [smem:[#allocation3 + $0x1f]] }
  0xa3   :  { %v707_v15 = vadd.f32 %v705_v7, %v701_v5  ;;  %v751_v35 = vmul.f32 %v749_v18, %v3566_v44  ;;  %v906_v17 = vstv %s3591_s8  ;;  %v708_v56 = vadd.f32 %v706_v8, %v702_v6  ;;  %s3772_s8 = sld [smem:[#allocation3 + $0x25]] }
  0xa4   :  { %v712_v20 = vmul.f32 %v710_v30, %v3606_v22  ;;  %v754_v37 = vmul.f32 %v753_v53, %v3593_v51  ;;  %v755_v57 = vmul.f32 %v753_v53, %v3589_v62  ;;  %v760_v58 = vmul.f32 %v759_v33, %v3604_v21 }
  0xa5   :  { %273 = vrot.lane.b32.xlu0 %v3593_v51, %s3278_s29  ;;  %283 = vrot.lane.b32.xlu1 %v3606_v22, %s3278_s29  ;;  %v3652_v38 = vadd.f32 %v711_v16, %v707_v15  ;;  %v761_v24 = vmul.f32 %v759_v33, %v3606_v22  ;;  %v799_v28 = vmul.f32 %v798_v23, %v3587_v50  ;;  %v945_v45 = vstv %s3610_s9  ;;  %s3775_s9 = sld [smem:[#allocation3 + $0x2b]] }
  0xa6   :  { %v3657_v31 = vadd.f32 %v712_v20, %v708_v56  ;;  %v756_v39 = vadd.f32 %v754_v37, %v750_v12  ;;  %v757_v40 = vadd.f32 %v755_v57, %v751_v35  ;;  %v800_v32 = vmul.f32 %v798_v23, %v3566_v44 }
  0xa7   :  { %v803_v36 = vmul.f32 %v802_v54, %v3593_v51  ;;  %v804_v41 = vmul.f32 %v802_v54, %v3589_v62  ;;  %v949_v11 = vstv %s3612_s10  ;;  %v955_v59 = vstv %s3618_s11  ;;  %s3819_s10 = sld [smem:[#allocation3 + $0x2d]]  ;;  %s3821_s11 = sld [smem:[#allocation3 + $0x2e]] }
  0xa8   :  { %v3664_v42 = vadd.f32 %v760_v58, %v756_v39  ;;  %v3666_v46 = vadd.f32 %v761_v24, %v757_v40  ;;  %v994_v61 = vstv %s3620_s12  ;;  %v809_v43 = vmul.f32 %v808_v25, %v3604_v21  ;;  %s3828_s12 = sld [smem:[#allocation3 + $0x2f]] }
  0xa9   :  { %281 = vrot.lane.b32.xlu0 %v3604_v21, %s3278_s29  ;;  %v805_v63 = vadd.f32 %v803_v36, %v799_v28  ;;  %v806_v60 = vadd.f32 %v804_v41, %v800_v32  ;;  %v998_v47 = vstv %s3630_s13  ;;  %v810_v0 = vmul.f32 %v808_v25, %v3606_v22  ;;  %s3755_s29 = sld [smem:[#allocation3 + $0x1d]]  ;;  %s3279_s13 = smov 4  }
  0xaa   :  { %v848_v1 = vmul.f32 %v847_v55, %v3587_v50  ;;  %v1004_v2 = vstv %s3636_s14  ;;  %v1043_v48 = vstv %s3638_s15  ;;  %v849_v49 = vmul.f32 %v847_v55, %v3566_v44  ;;  %s3842_s14 = sld [smem:[#allocation3 + $0x31]]  ;;  %s3844_s15 = sld [smem:[#allocation3 + $0x37]] }
  0xab   :  { %v3676_v4 = vadd.f32 %v809_v43, %v805_v63  ;;  %v1047_v3 = vstv %s3643_s16  ;;  %v1053_v19 = vstv %s3645_s17  ;;  %v3681_v27 = vadd.f32 %v810_v0, %v806_v60  ;;  %s3846_s16 = sld [smem:[#allocation3 + $0x3d]]  ;;  %s3848_s17 = sld [smem:[#allocation3 + $0x33]] }
  0xac   :  { %v852_v52 = vmul.f32 %v851_v34, %v3593_v51  ;;  %v853_v29 = vmul.f32 %v851_v34, %v3589_v62  ;;  %v858_v30 = vmul.f32 %v857_v26, %v3604_v21  ;;  %v859_v18 = vmul.f32 %v857_v26, %v3606_v22 }
  0xad   :  { %v897_v53 = vmul.f32 %v896_v13, %v3587_v50  ;;  %v898_v33 = vmul.f32 %v896_v13, %v3566_v44  ;;  %v901_v23 = vmul.f32 %v900_v14, %v3593_v51  ;;  %v902_v55 = vmul.f32 %v900_v14, %v3589_v62 }
  0xae   :  { %v854_v54 = vadd.f32 %v852_v52, %v848_v1  ;;  %v855_v25 = vadd.f32 %v853_v29, %v849_v49  ;;  %v907_v5 = vmul.f32 %v906_v17, %v3604_v21  ;;  %v908_v7 = vmul.f32 %v906_v17, %v3606_v22 }
  0xaf   :  { %v903_v6 = vadd.f32 %v901_v23, %v897_v53  ;;  %v946_v34 = vmul.f32 %v945_v45, %v3587_v50  ;;  %v947_v8 = vmul.f32 %v945_v45, %v3566_v44  ;;  %v904_v13 = vadd.f32 %v902_v55, %v898_v33 }
  0xb0   :  { %v3695_v26 = vadd.f32 %v858_v30, %v854_v54  ;;  %v3697_v12 = vadd.f32 %v859_v18, %v855_v25  ;;  %v950_v15 = vmul.f32 %v949_v11, %v3593_v51  ;;  %v951_v14 = vmul.f32 %v949_v11, %v3589_v62 }
  0xb1   :  { %v3700_v16 = vadd.f32 %v907_v5, %v903_v6  ;;  %v956_v35 = vmul.f32 %v955_v59, %v3604_v21  ;;  %v957_v56 = vmul.f32 %v955_v59, %v3606_v22  ;;  %v3705_v17 = vadd.f32 %v908_v7, %v904_v13 }
  0xb2   :  { %v952_v20 = vadd.f32 %v950_v15, %v946_v34  ;;  %v995_v37 = vmul.f32 %v994_v61, %v3587_v50  ;;  %v996_v57 = vmul.f32 %v994_v61, %v3566_v44  ;;  %v953_v58 = vadd.f32 %v951_v14, %v947_v8 }
  0xb3   :  { %v999_v24 = vmul.f32 %v998_v47, %v3593_v51  ;;  %v1000_v28 = vmul.f32 %v998_v47, %v3589_v62  ;;  %v1005_v39 = vmul.f32 %v1004_v2, %v3604_v21  ;;  %v1006_v32 = vmul.f32 %v1004_v2, %v3606_v22 }
  0xb4   :  { %v3712_v40 = vadd.f32 %v956_v35, %v952_v20  ;;  %v1044_v36 = vmul.f32 %v1043_v48, %v3587_v50  ;;  %v1045_v41 = vmul.f32 %v1043_v48, %v3566_v44  ;;  %v3717_v45 = vadd.f32 %v957_v56, %v953_v58 }
  0xb5   :  { %v1001_v11 = vadd.f32 %v999_v24, %v995_v37  ;;  %v1002_v59 = vadd.f32 %v1000_v28, %v996_v57  ;;  %v1048_v61 = vmul.f32 %v1047_v3, %v3593_v51  ;;  %v1049_v63 = vmul.f32 %v1047_v3, %v3589_v62 }
  0xb6   :  { %v1054_v0 = vmul.f32 %v1053_v19, %v3604_v21  ;;  %v1055_v2 = vmul.f32 %v1053_v19, %v3606_v22  ;;  %v294_v3 = vstv %s3731_s18  ;;  %v334_v19 = vstv %s3733_s19  ;;  %s3850_s18 = sld [smem:[#allocation3 + $0x39]]  ;;  %s3852_s19 = sld [smem:[#allocation3 + $0x3f]] }
  0xb7   :  { %v3721_v60 = vadd.f32 %v1005_v39, %v1001_v11  ;;  %v3723_v43 = vadd.f32 %v1006_v32, %v1002_v59  ;;  %v1050_v47 = vadd.f32 %v1048_v61, %v1044_v36  ;;  %v1051_v1 = vadd.f32 %v1049_v63, %v1045_v41 }
  0xb8   :  { %v374_v52 = vstv %s3735_s20  ;;  %v304_v29 = vstv %s3737_s21  ;;  %v344_v30 = vstv %s3739_s22  ;;  %v384_v18 = vstv %s3741_s23  ;;  %s3854_s20 = sld [smem:[#allocation3 + $0x35]]  ;;  %s3856_s21 = sld [smem:[#allocation3 + $0x3b]] }
  0xb9   :  { %v3727_v49 = vadd.f32 %v1054_v0, %v1050_v47  ;;  %v3729_v48 = vadd.f32 %v1055_v2, %v1051_v1  ;;  %v316_v53 = vstv %s3743_s24  ;;  %v356_v33 = vstv %s3745_s1  ;;  %s3858_s22 = sld [smem:[#allocation3 + $0x41]]  ;;  %s3860_s23 = sld [smem:[#allocation3 + $0x30]] }
  0xba   :  { %v4807_v23 = vstv %s3749_s26  ;;  %v3779_v25 = vsel %vm46_vm2, 1.0, %v4805_v10  ;;  %v291_v55 = vstv %s3747_s25  ;;  %v331_v5 = vstv %s3751_s27  ;;  %s3862_s24 = sld [smem:[#allocation3 + $0x36]]  ;;  %s3864_s1 = sld [smem:[#allocation3 + $0x3c]] }
  0xbb   :  { %4809 = vst [vmem:[#allocation6_spill] sm:$0xff] %v3729_v48  ;;  %v371_v6 = vstv %s3753_s28  ;;  %v296_v7 = vmul.f32 %v294_v3, %v3566_v44  ;;  %v336_v34 = vmul.f32 %v334_v19, %v3566_v44  ;;  %v376_v8 = vmul.f32 %v374_v52, %v3566_v44  ;;  %s3866_s25 = sld [smem:[#allocation3 + $0x32]]  ;;  %s3870_s27 = sld [smem:[#allocation3 + $0x3e]] }
  0xbc   :  { %v301_v13 = vstv %s3755_s29  ;;  %v306_v15 = vmul.f32 %v304_v29, %v3589_v62  ;;  %v341_v14 = vstv %s3757_s0  ;;  %v346_v35 = vmul.f32 %v344_v30, %v3589_v62  ;;  %s3873_s28 = sld [smem:[#allocation3 + $0x34]]  ;;  %s3885_s29 = sld [smem:[#allocation3 + $0x3a]] }
  0xbd   :  { %v381_v56 = vstv %s3759_s30  ;;  %v295_v20 = vmul.f32 %v294_v3, %v3587_v50  ;;  %v335_v37 = vmul.f32 %v334_v19, %v3587_v50  ;;  %v375_v57 = vmul.f32 %v374_v52, %v3587_v50  ;;  %s3888_s0 = sld [smem:[#allocation3 + $0x40]]  ;;  %s3918_s30 = sld [smem:[#allocation3 + $0x42]] }
  0xbe   :  { %v313_v58 = vstv %s3761_s7  ;;  %v305_v28 = vmul.f32 %v304_v29, %v3593_v51  ;;  %v345_v44 = vmul.f32 %v344_v30, %v3593_v51  ;;  %v385_v39 = vmul.f32 %v384_v18, %v3593_v51  ;;  %s3920_s7 = sld [smem:[#allocation3 + $0x43]] }
  0xbf   :  { %v386_v32 = vmul.f32 %v384_v18, %v3589_v62  ;;  %v317_v50 = vmul.f32 %v316_v53, %v3604_v21  ;;  %v318_v11 = vmul.f32 %v316_v53, %v3606_v22  ;;  %v353_v51 = vstv %s3772_s8  ;;  %s3927_s8 = sld [smem:[#allocation3 + $0x44]] }
  0xc0   :  { %v357_v62 = vmul.f32 %v356_v33, %v3604_v21  ;;  %v358_v1 = vmul.f32 %v356_v33, %v3606_v22  ;;  %v393_v2 = vstv %s3775_s9  ;;  %v397_v30 = vmul.f32 %v4807_v23, %v3604_v21  ;;  %s4079_s9 = sld [smem:[#allocation3 + $0x56]] }
 0x10f   :  { %v267_v54 = vpop.permute.xlu1 %266 }
 0x113   :  { %v265_v24 = vpop.permute.xlu0 %264  ;;  %v276_v0 = vpop.permute.xlu1 %275 }
 0x114   :  { %v269_v36 = vsel %vm268_vm3, %v265_v24, %v267_v54  ;;  %v270_v41 = vsel %vm268_vm3, %v267_v54, %v265_v24 }
 0x115   :  { %v271_v59 = vmul.f32 %v3779_v25, %v270_v41  ;;  %v293_v61 = vmul.f32 %v291_v55, %v269_v36  ;;  %v333_v63 = vmul.f32 %v331_v5, %v269_v36  ;;  %v373_v47 = vmul.f32 %v371_v6, %v269_v36 }
 0x117   :  { %v292_v3 = vmul.f32 %v291_v55, %v271_v59  ;;  %v298_v19 = vadd.f32 %v296_v7, %v293_v61  ;;  %v332_v52 = vmul.f32 %v331_v5, %v271_v59  ;;  %v274_v29 = vpop.permute.xlu0 %273  ;;  %v338_v18 = vadd.f32 %v336_v34, %v333_v63  ;;  %v284_v63 = vpop.permute.xlu1 %283 }
 0x118   :  { %v372_v53 = vmul.f32 %v371_v6, %v271_v59  ;;  %v277_v54 = vsel %vm268_vm3, %v274_v29, %v276_v0  ;;  %v278_v24 = vsel %vm268_vm3, %v276_v0, %v274_v29  ;;  %v378_v41 = vadd.f32 %v376_v8, %v373_v47 }
 0x119   :  { %v297_v36 = vadd.f32 %v295_v20, %v292_v3  ;;  %v279_v33 = vmul.f32 %v3779_v25, %v278_v24  ;;  %v303_v10 = vmul.f32 %v301_v13, %v277_v54  ;;  %v337_v55 = vadd.f32 %v335_v37, %v332_v52 }
 0x11a   :  { %v377_v5 = vadd.f32 %v375_v57, %v372_v53  ;;  %v343_v7 = vmul.f32 %v341_v14, %v277_v54  ;;  %v383_v61 = vmul.f32 %v381_v56, %v277_v54  ;;  %v324_v24 = vstv %s3819_s10  ;;  %s4081_s10 = sld [smem:[#allocation3 + $0x4b]] }
 0x11b   :  { %v302_v21 = vmul.f32 %v301_v13, %v279_v33  ;;  %v308_v34 = vadd.f32 %v306_v15, %v303_v10  ;;  %v342_v6 = vmul.f32 %v341_v14, %v279_v33  ;;  %v382_v59 = vmul.f32 %v381_v56, %v279_v33  ;;  %v282_v23 = vpop.permute.xlu0 %281 }
 0x11c   :  { %v348_v0 = vadd.f32 %v346_v35, %v343_v7  ;;  %v388_v20 = vadd.f32 %v386_v32, %v383_v61  ;;  %v285_v8 = vsel %vm268_vm3, %v282_v23, %v284_v63  ;;  %v286_v47 = vsel %vm268_vm3, %v284_v63, %v282_v23 }
 0x11d   :  { %v307_v37 = vadd.f32 %v305_v28, %v302_v21  ;;  %v310_v57 = vadd.f32 %v308_v34, %v298_v19  ;;  %v347_v3 = vadd.f32 %v345_v44, %v342_v6  ;;  %v387_v13 = vadd.f32 %v385_v39, %v382_v59 }
 0x11e   :  { %v350_v10 = vadd.f32 %v348_v0, %v338_v18  ;;  %v390_v15 = vadd.f32 %v388_v20, %v378_v41  ;;  %v287_v14 = vmul.f32 %v3779_v25, %v286_v47  ;;  %v315_v56 = vmul.f32 %v313_v58, %v285_v8 }
 0x11f   :  { %v309_v52 = vadd.f32 %v307_v37, %v297_v36  ;;  %v349_v35 = vadd.f32 %v347_v3, %v337_v55  ;;  %v389_v32 = vadd.f32 %v387_v13, %v377_v5  ;;  %v355_v29 = vmul.f32 %v353_v51, %v285_v8 }
 0x120   :  { %v314_v53 = vmul.f32 %v313_v58, %v287_v14  ;;  %v320_v23 = vadd.f32 %v318_v11, %v315_v56  ;;  %v354_v28 = vmul.f32 %v353_v51, %v287_v14  ;;  %v394_v19 = vmul.f32 %v393_v2, %v287_v14 }
 0x121   :  { %v4810_v44 = vstv %s3749_s26  ;;  %v360_v18 = vadd.f32 %v358_v1, %v355_v29  ;;  %v395_v54 = vmul.f32 %v393_v2, %v285_v8  ;;  %v364_v7 = vstv %s3821_s11  ;;  %s3868_s26 = sld [smem:[#allocation3 + $0x38]]  ;;  %s4083_s11 = sld [smem:[#allocation3 + $0x51]] }
 0x122   :  { %v398_v39 = vmul.f32 %v4810_v44, %v3606_v22  ;;  %v319_v25 = vadd.f32 %v317_v50, %v314_v53  ;;  %v322_v41 = vadd.f32 %v320_v23, %v310_v57  ;;  %v359_v36 = vadd.f32 %v357_v62, %v354_v28 }
 0x123   :  { %v399_v33 = vadd.f32 %v397_v30, %v394_v19  ;;  %v362_v55 = vadd.f32 %v360_v18, %v350_v10  ;;  %v404_v22 = vstv %s3828_s12  ;;  %v439_v8 = vstv %s3842_s14  ;;  %s4085_s12 = sld [smem:[#allocation3 + $0x47]]  ;;  %s4089_s14 = sld [smem:[#allocation3 + $0x53]] }
 0x124   :  { %v400_v5 = vadd.f32 %v398_v39, %v395_v54  ;;  %v326_v61 = vadd.f32 %v324_v24, %v322_v41  ;;  %v321_v21 = vadd.f32 %v319_v25, %v309_v52  ;;  %v361_v58 = vadd.f32 %v359_v36, %v349_v35 }
 0x125   :  { %v401_v11 = vadd.f32 %v399_v33, %v389_v32  ;;  %v366_v59 = vadd.f32 %v364_v7, %v362_v55  ;;  %v479_v47 = vstv %s3844_s15  ;;  %v519_v37 = vstv %s3846_s16  ;;  %s4093_s15 = sld [smem:[#allocation3 + $0x49]]  ;;  %s4095_s16 = sld [smem:[#allocation3 + $0x4f]] }
 0x126   :  { %v402_v51 = vadd.f32 %v400_v5, %v390_v15  ;;  %v328_v34 = vmax.f32 %v326_v61, 0.0  ;;  %v325_v6 = vadd.f32 %v324_v24, %v321_v21  ;;  %v365_v2 = vadd.f32 %v364_v7, %v361_v58 }
 0x127   :  { %v368_v50 = vmax.f32 %v366_v59, 0.0  ;;  %v405_v63 = vadd.f32 %v404_v22, %v401_v11  ;;  %v449_v57 = vstv %s3848_s17  ;;  %v489_v3 = vstv %s3850_s18  ;;  %s4101_s17 = sld [smem:[#allocation3 + $0x57]]  ;;  %s4103_s18 = sld [smem:[#allocation3 + $0x55]] }
 0x128   :  { %411 = vrot.lane.b32.xlu1 %v328_v34, %s3279_s13  ;;  %v327_v1 = vmax.f32 %v325_v6, 0.0  ;;  %v406_v62 = vadd.f32 %v404_v22, %v402_v51  ;;  %v367_v30 = vmax.f32 %v365_v2, 0.0  ;;  %v529_v13 = vstv %s3852_s19  ;;  %s4108_s19 = sld [smem:[#allocation3 + $0x58]] }
 0x129   :  { %v3839_v20 = vmax.f32 %v405_v63, 0.0  ;;  %v4811_v10 = vmov 0.0   ;;  %v461_v14 = vstv %s3854_s20  ;;  %v501_v56 = vstv %s3856_s21  ;;  %s4111_s20 = sld [smem:[#allocation3 + $0x59]]  ;;  %s4121_s21 = sld [smem:[#allocation3 + $0x5d]] }
 0x12a   :  { %409 = vrot.lane.b32.xlu0 %v327_v1, %s3279_s13  ;;  %v3836_v0 = vmax.f32 %v406_v62, 0.0  ;;  %v3882_v15 = vsel %vm52_vm4, 1.0, %v4811_v10  ;;  %v4808_v52 = vstv %s3858_s22  ;;  %v436_v35 = vstv %s3860_s23  ;;  %s4129_s23 = sld [smem:[#allocation3 + $0x5f]] }
 0x12b   :  { %v476_v32 = vstv %s3862_s24  ;;  %v516_v29 = vstv %s3864_s1  ;;  %v441_v53 = vmul.f32 %v439_v8, %v328_v34  ;;  %v446_v23 = vstv %s3866_s25  ;;  %s3280_s1 = smov 8   ;;  %s4061_s25 = sld [smem:[#allocation3 + $0x46]] }
 0x12c   :  { %420 = vrot.lane.b32.xlu1 %v368_v50, %s3279_s13  ;;  %v486_v28 = vstv %s3868_s26  ;;  %v526_v19 = vstv %s3870_s27  ;;  %v481_v39 = vmul.f32 %v479_v47, %v328_v34  ;;  %v521_v18 = vmul.f32 %v519_v37, %v328_v34  ;;  %s4063_s26 = sld [smem:[#allocation3 + $0x4c]]  ;;  %s4065_s27 = sld [smem:[#allocation3 + $0x52]] }
 0x12d   :  { %v440_v54 = vmul.f32 %v439_v8, %v327_v1  ;;  %v451_v24 = vmul.f32 %v449_v57, %v368_v50  ;;  %v480_v25 = vmul.f32 %v479_v47, %v327_v1  ;;  %v520_v41 = vmul.f32 %v519_v37, %v327_v1  ;;  %s4131_s24 = sld [smem:[#allocation3 + $0x63]] }
 0x12e   :  { %418 = vrot.lane.b32.xlu0 %v367_v30, %s3279_s13  ;;  %v450_v36 = vmul.f32 %v449_v57, %v367_v30  ;;  %v490_v33 = vmul.f32 %v489_v3, %v367_v30  ;;  %v491_v5 = vmul.f32 %v489_v3, %v368_v50  ;;  %v530_v7 = vmul.f32 %v529_v13, %v367_v30 }
 0x12f   :  { %v531_v61 = vmul.f32 %v529_v13, %v368_v50  ;;  %v458_v21 = vstv %s3873_s28  ;;  %v462_v51 = vmul.f32 %v461_v14, %v3839_v20  ;;  %v463_v34 = vmul.f32 %v461_v14, %v3836_v0  ;;  %s4067_s28 = sld [smem:[#allocation3 + $0x48]] }
 0x130   :  { %428 = vrot.lane.b32.xlu1 %v3836_v0, %s3279_s13  ;;  %v498_v62 = vstv %s3885_s29  ;;  %v502_v50 = vmul.f32 %v501_v56, %v3839_v20  ;;  %v503_v30 = vmul.f32 %v501_v56, %v3836_v0  ;;  %v538_v63 = vstv %s3888_s0  ;;  %s4069_s29 = sld [smem:[#allocation3 + $0x4e]]  ;;  %s4071_s0 = sld [smem:[#allocation3 + $0x54]] }
 0x131   :  { %v542_v3 = vmul.f32 %v4808_v52, %v3839_v20 }
 0x132   :  { %426 = vrot.lane.b32.xlu0 %v3839_v20, %s3279_s13  ;;  %s4087_s13 = sld [smem:[#allocation3 + $0x4d]] }
 0x19a   :  { %v412_v44 = vpop.permute.xlu1 %411 }
 0x19c   :  { %v410_v55 = vpop.permute.xlu0 %409 }
 0x19d   :  { %v414_v58 = vsel %vm413_vm5, %v410_v55, %v412_v44  ;;  %v415_v11 = vsel %vm413_vm5, %v412_v44, %v410_v55 }
 0x19e   :  { %v416_v6 = vmul.f32 %v3882_v15, %v415_v11  ;;  %v438_v59 = vmul.f32 %v436_v35, %v414_v58  ;;  %v478_v22 = vmul.f32 %v476_v32, %v414_v58  ;;  %v518_v1 = vmul.f32 %v516_v29, %v414_v58  ;;  %v421_v2 = vpop.permute.xlu1 %420 }
 0x1a0   :  { %v437_v8 = vmul.f32 %v436_v35, %v416_v6  ;;  %v443_v47 = vadd.f32 %v441_v53, %v438_v59  ;;  %v477_v37 = vmul.f32 %v476_v32, %v416_v6  ;;  %v419_v57 = vpop.permute.xlu0 %418  ;;  %v483_v13 = vadd.f32 %v481_v39, %v478_v22 }
 0x1a1   :  { %v517_v14 = vmul.f32 %v516_v29, %v416_v6  ;;  %v422_v44 = vsel %vm413_vm5, %v419_v57, %v421_v2  ;;  %v423_v55 = vsel %vm413_vm5, %v421_v2, %v419_v57  ;;  %v523_v11 = vadd.f32 %v521_v18, %v518_v1 }
 0x1a2   :  { %v442_v58 = vadd.f32 %v440_v54, %v437_v8  ;;  %v424_v56 = vmul.f32 %v3882_v15, %v423_v55  ;;  %v448_v48 = vmul.f32 %v446_v23, %v422_v44  ;;  %v482_v35 = vadd.f32 %v480_v25, %v477_v37  ;;  %v429_v22 = vpop.permute.xlu1 %428 }
 0x1a3   :  { %v522_v32 = vadd.f32 %v520_v41, %v517_v14  ;;  %v488_v53 = vmul.f32 %v486_v28, %v422_v44  ;;  %v528_v59 = vmul.f32 %v526_v19, %v422_v44  ;;  %v469_v55 = vstv %s3918_s30  ;;  %s4073_s30 = sld [smem:[#allocation3 + $0x4a]] }
 0x1a4   :  { %v447_v20 = vmul.f32 %v446_v23, %v424_v56  ;;  %v453_v39 = vadd.f32 %v451_v24, %v448_v48  ;;  %v487_v29 = vmul.f32 %v486_v28, %v424_v56  ;;  %v527_v6 = vmul.f32 %v526_v19, %v424_v56  ;;  %v427_v52 = vpop.permute.xlu0 %426 }
 0x1a5   :  { %v493_v2 = vadd.f32 %v491_v5, %v488_v53  ;;  %v533_v54 = vadd.f32 %v531_v61, %v528_v59  ;;  %v430_v18 = vsel %vm413_vm5, %v427_v52, %v429_v22  ;;  %v431_v1 = vsel %vm413_vm5, %v429_v22, %v427_v52 }
 0x1a6   :  { %v452_v25 = vadd.f32 %v450_v36, %v447_v20  ;;  %v455_v41 = vadd.f32 %v453_v39, %v443_v47  ;;  %v492_v8 = vadd.f32 %v490_v33, %v487_v29  ;;  %v532_v23 = vadd.f32 %v530_v7, %v527_v6  ;;  %v3133_v29 = vld [vmem:[%s4801_s3 + $0x48] sm:$0xff]  }
 0x1a7   :  { %v495_v48 = vadd.f32 %v493_v2, %v483_v13  ;;  %v535_v28 = vadd.f32 %v533_v54, %v523_v11  ;;  %v432_v19 = vmul.f32 %v3882_v15, %v431_v1  ;;  %v460_v24 = vmul.f32 %v458_v21, %v430_v18  ;;  %v3134_v6 = vld [vmem:[%s4801_s3 + $0xc8] sm:$0xff]  }
 0x1a8   :  { %v454_v37 = vadd.f32 %v452_v25, %v442_v58  ;;  %v494_v5 = vadd.f32 %v492_v8, %v482_v35  ;;  %v534_v61 = vadd.f32 %v532_v23, %v522_v32  ;;  %v500_v57 = vmul.f32 %v498_v62, %v430_v18  ;;  %v3129_v35 = vld [vmem:[%s4801_s3 + $0x40] sm:$0xff]   ;;  %v3135_v2 = vld [vmem:[%s4801_s3 + $0x8] sm:$0xff]   ;;  %v3137_v8 = vld [vmem:[%s4801_s3 + $0x50] sm:$0xff]  }
 0x1a9   :  { %v459_v14 = vmul.f32 %v458_v21, %v432_v19  ;;  %v465_v52 = vadd.f32 %v463_v34, %v460_v24  ;;  %v499_v36 = vmul.f32 %v498_v62, %v432_v19  ;;  %v539_v47 = vmul.f32 %v538_v63, %v432_v19  ;;  %v3130_v21 = vld [vmem:[%s4801_s3 + $0xc0] sm:$0xff]   ;;  %2929 = vmatprep.subr.bf16.mxu0 %v3129_v35  ;;  %v3136_v54 = vld [vmem:[%s4801_s3 + $0x88] sm:$0xff]   ;;  %v3138_v23 = vld [vmem:[%s4801_s3 + $0xd0] sm:$0xff]  }
 0x1aa   :  { %v4812_v33 = vstv %s3858_s22  ;;  %v505_v13 = vadd.f32 %v503_v30, %v500_v57  ;;  %v540_v44 = vmul.f32 %v538_v63, %v430_v18  ;;  %v509_v32 = vstv %s3920_s7  ;;  %2951 = vmatprep.subr.bf16.mxu1 %v3130_v21  ;;  %v3139_v19 = vld [vmem:[%s4801_s3 + $0x10] sm:$0xff]   ;;  %v3157_v21 = vld [vmem:[%s4801_s3 + $0x78] sm:$0xff]   ;;  %s4075_s7 = sld [smem:[#allocation3 + $0x50]]  ;;  %s4123_s22 = sld [smem:[#allocation3 + $0x5e]] }
 0x1ab   :  { %v543_v7 = vmul.f32 %v4812_v33, %v3836_v0  ;;  %v464_v11 = vadd.f32 %v462_v51, %v459_v14  ;;  %v467_v15 = vadd.f32 %v465_v52, %v455_v41  ;;  %v504_v56 = vadd.f32 %v502_v50, %v499_v36  ;;  %v3131_v0 = vld [vmem:[%s4801_s3] sm:$0xff]   ;;  %v3140_v24 = vld [vmem:[%s4801_s3 + $0x90] sm:$0xff]   ;;  %v3143_v14 = vld [vmem:[%s4801_s3 + $0x18] sm:$0xff]  }
 0x1ac   :  { %v544_v58 = vadd.f32 %v542_v3, %v539_v47  ;;  %v507_v34 = vadd.f32 %v505_v13, %v495_v48  ;;  %v3132_v51 = vld [vmem:[%s4801_s3 + $0x80] sm:$0xff]   ;;  %2930 = vmatpush3.bf16.msra.mxu0 %v3131_v0  ;;  %v549_v22 = vstv %s3927_s8  ;;  %v3144_v52 = vld [vmem:[%s4801_s3 + $0x98] sm:$0xff]   ;;  %v3149_v13 = vld [vmem:[%s4801_s3 + $0x68] sm:$0xff]   ;;  %s4077_s8 = sld [smem:[#allocation3 + $0x45]] }
 0x1ad   :  { %v545_v62 = vadd.f32 %v543_v7, %v540_v44  ;;  %v471_v50 = vadd.f32 %v469_v55, %v467_v15  ;;  %v466_v30 = vadd.f32 %v464_v11, %v454_v37  ;;  %v506_v63 = vadd.f32 %v504_v56, %v494_v5  ;;  %2952 = vmatpush3.bf16.msra.mxu1 %v3132_v51  ;;  %v3141_v5 = vld [vmem:[%s4801_s3 + $0x58] sm:$0xff]   ;;  %v3145_v36 = vld [vmem:[%s4801_s3 + $0x60] sm:$0xff]   ;;  %v3150_v44 = vld [vmem:[%s4801_s3 + $0xe8] sm:$0xff]  }
 0x1ae   :  { %v546_v3 = vadd.f32 %v544_v58, %v534_v61  ;;  %v511_v39 = vadd.f32 %v509_v32, %v507_v34  ;;  %2931 = vmatprep.subr.bf16.mxu0 %v3133_v29  ;;  %2953 = vmatprep.subr.bf16.mxu1 %v3134_v6  ;;  %v3142_v61 = vld [vmem:[%s4801_s3 + $0xd8] sm:$0xff]   ;;  %v3146_v47 = vld [vmem:[%s4801_s3 + $0xe0] sm:$0xff]   ;;  %v3152_v11 = vld [vmem:[%s4801_s3 + $0xa8] sm:$0xff]   ;;  %v686_v6 = vstv %s4079_s9  ;;  %s4232_s9 = sld [smem:[#allocation3 + $0x71]] }
 0x1af   :  { %v547_v53 = vadd.f32 %v545_v62, %v535_v28  ;;  %v3946_v59 = vmax.f32 %v471_v50, 0.0  ;;  %v470_v20 = vadd.f32 %v469_v55, %v466_v30  ;;  %v510_v1 = vadd.f32 %v509_v32, %v506_v63  ;;  %v3147_v33 = vld [vmem:[%s4801_s3 + $0x20] sm:$0xff]   ;;  %v3151_v55 = vld [vmem:[%s4801_s3 + $0x28] sm:$0xff]   ;;  %v3153_v15 = vld [vmem:[%s4801_s3 + $0x70] sm:$0xff]  }
 0x1b0   :  { %2932 = vmatpush3.bf16.msra.mxu0 %v3135_v2  ;;  %v3967_v25 = vmax.f32 %v511_v39, 0.0  ;;  %v550_v28 = vadd.f32 %v549_v22, %v546_v3  ;;  %v3148_v7 = vld [vmem:[%s4801_s3 + $0xa0] sm:$0xff]   ;;  %v3154_v56 = vld [vmem:[%s4801_s3 + $0xf0] sm:$0xff]   ;;  %v3158_v34 = vld [vmem:[%s4801_s3 + $0xf8] sm:$0xff]   ;;  %v584_v50 = vstv %s4061_s25  ;;  %s4139_s25 = sld [smem:[#allocation3 + $0x65]] }
 0x1b1   :  { %556 = vrot.lane.b32.xlu1 %v3946_v59, %s3280_s1  ;;  %v3963_v18 = vmax.f32 %v470_v20, 0.0  ;;  %v551_v41 = vadd.f32 %v549_v22, %v547_v53  ;;  %2954 = vmatpush3.bf16.msra.mxu1 %v3136_v54  ;;  %v3977_v48 = vmax.f32 %v510_v1, 0.0  ;;  %v3155_v58 = vld [vmem:[%s4801_s3 + $0x30] sm:$0xff]   ;;  %v3159_v62 = vld [vmem:[%s4801_s3 + $0x38] sm:$0xff]   ;;  %v3161_v0 = vld [vmem:[%s4801_s3 + $0x140] sm:$0xff]   ;;  %v4116_v22 = vsel %vm58_vm6, 1.0, %v4811_v10 }
 0x1b2   :  { %2933 = vmatprep.subr.bf16.mxu0 %v3137_v8  ;;  %2955 = vmatprep.subr.bf16.mxu1 %v3138_v23  ;;  %v3997_v57 = vmax.f32 %v550_v28, 0.0  ;;  %v3156_v35 = vld [vmem:[%s4801_s3 + $0xb0] sm:$0xff]   ;;  %v3160_v32 = vld [vmem:[%s4801_s3 + $0xb8] sm:$0xff]   ;;  %v3162_v51 = vld [vmem:[%s4801_s3 + $0x1c0] sm:$0xff]   ;;  %v624_v30 = vstv %s4063_s26  ;;  %v586_v1 = vmul.f32 %v584_v50, %v3946_v59  ;;  %s4149_s26 = sld [smem:[#allocation3 + $0x69]] }
 0x1b3   :  { %554 = vrot.lane.b32.xlu0 %v3963_v18, %s3280_s1  ;;  %v3987_v37 = vmax.f32 %v551_v41, 0.0  ;;  %v664_v63 = vstv %s4065_s27  ;;  %v594_v3 = vstv %s4067_s28  ;;  %v634_v53 = vstv %s4069_s29  ;;  %s4200_s27 = sld [smem:[#allocation3 + $0x8a]]  ;;  %s4210_s29 = sld [smem:[#allocation3 + $0x8b]] }
 0x1b4   :  { %2934 = vmatpush3.bf16.msra.mxu0 %v3139_v19  ;;  %v674_v20 = vstv %s4071_s0  ;;  %v606_v39 = vstv %s4073_s30  ;;  %v646_v29 = vstv %s4075_s7  ;;  %v581_v2 = vstv %s4077_s8  ;;  %s4202_s28 = sld [smem:[#allocation3 + $0x6a]]  ;;  %s4212_s0 = sld [smem:[#allocation3 + $0x6b]] }
 0x1b5   :  { %565 = vrot.lane.b32.xlu1 %v3967_v25, %s3280_s1  ;;  %2956 = vmatpush3.bf16.msra.mxu1 %v3140_v24  ;;  %v621_v54 = vstv %s4081_s10  ;;  %v661_v41 = vstv %s4083_s11  ;;  %v591_v8 = vstv %s4085_s12  ;;  %v626_v28 = vmul.f32 %v624_v30, %v3946_v59  ;;  %s4221_s30 = sld [smem:[#allocation3 + $0x6f]]  ;;  %s4223_s7 = sld [smem:[#allocation3 + $0x70]] }
 0x1b6   :  { %2935 = vmatprep.subr.bf16.mxu0 %v3141_v5  ;;  %2957 = vmatprep.subr.bf16.mxu1 %v3142_v61  ;;  %v631_v23 = vstv %s4087_s13  ;;  %v666_v19 = vmul.f32 %v664_v63, %v3946_v59  ;;  %v585_v24 = vmul.f32 %v584_v50, %v3963_v18  ;;  %v596_v5 = vmul.f32 %v594_v3, %v3967_v25  ;;  %s4230_s8 = sld [smem:[#allocation3 + $0x8c]]  ;;  %s4326_s10 = sld [smem:[#allocation3 + $0x75]] }
 0x1b7   :  { %563 = vrot.lane.b32.xlu0 %v3977_v48, %s3280_s1  ;;  %v625_v61 = vmul.f32 %v624_v30, %v3963_v18  ;;  %v4147_v59 = vmul.f32 %v634_v53, %v3977_v48  ;;  %s4330_s11 = sld [smem:[#allocation3 + $0x76]]  ;;  %s4340_s12 = sld [smem:[#allocation3 + $0x8d]] }
 0x1b8   :  { %2936 = vmatpush3.bf16.msra.mxu0 %v3143_v14  ;;  %v665_v14 = vmul.f32 %v664_v63, %v3963_v18  ;;  %s4342_s13 = sld [smem:[#allocation3 + $0x77]] }
 0x1b9   :  { %573 = vrot.lane.b32.xlu1 %v3987_v37, %s3280_s1  ;;  %2958 = vmatpush3.bf16.msra.mxu1 %v3144_v52  ;;  %v4144_v52 = vmul.f32 %v594_v3, %v3977_v48 }
 0x1ba   :  { %2937 = vmatprep.subr.bf16.mxu0 %v3145_v36  ;;  %2959 = vmatprep.subr.bf16.mxu1 %v3146_v47  ;;  %v636_v36 = vmul.f32 %v634_v53, %v3967_v25  ;;  %v671_v47 = vstv %s4089_s14  ;;  %s4348_s14 = sld [smem:[#allocation3 + $0x7b]] }
 0x1bb   :  { %571 = vrot.lane.b32.xlu0 %v3997_v57, %s3280_s1  ;;  %s4137_s1 = sld [smem:[#allocation3 + $0x64]] }
 0x1bc   :  { %2938 = vmatpush3.bf16.msra.mxu0 %v3147_v33  ;;  %v4154_v33 = vmul.f32 %v674_v20, %v3977_v48  ;;  %v4170_v48 = vmul.f32 %v646_v29, %v3987_v37 }
 0x1bd   :  { %2960 = vmatpush3.bf16.msra.mxu1 %v3148_v7  ;;  %2939 = vmatprep.subr.bf16.mxu0 %v3149_v13  ;;  %v676_v7 = vmul.f32 %v674_v20, %v3967_v25  ;;  %v603_v13 = vstv %s4093_s15  ;;  %v683_v25 = vstv %s4103_s18  ;;  %s4354_s15 = sld [smem:[#allocation3 + $0x7c]] }
 0x1be   :  { %2961 = vmatprep.subr.bf16.mxu1 %v3150_v44  ;;  %v4159_v44 = vmul.f32 %v606_v39, %v3997_v57 }
 0x1c0   :  { %2940 = vmatpush3.bf16.msra.mxu0 %v3151_v55  ;;  %v4162_v55 = vmul.f32 %v606_v39, %v3987_v37 }
 0x1c1   :  { %2962 = vmatpush3.bf16.msra.mxu1 %v3152_v11  ;;  %2941 = vmatprep.subr.bf16.mxu0 %v3153_v15  ;;  %v643_v11 = vstv %s4095_s16  ;;  %v771_v39 = vstv %s4137_s1  ;;  %s4358_s16 = sld [smem:[#allocation3 + $0x7d]] }
 0x1c2   :  { %2963 = vmatprep.subr.bf16.mxu1 %v3154_v56  ;;  %v4167_v56 = vmul.f32 %v646_v29, %v3997_v57 }
 0x1c4   :  { %2942 = vmatpush3.bf16.msra.mxu0 %v3155_v58 }
 0x1c5   :  { %2964 = vmatpush3.bf16.msra.mxu1 %v3156_v35  ;;  %2943 = vmatprep.subr.bf16.mxu0 %v3157_v21  ;;  %v4175_v21 = vmul.f32 %v686_v6, %v3997_v57 }
 0x1c6   :  { %2965 = vmatprep.subr.bf16.mxu1 %v3158_v34  ;;  %v4178_v34 = vmul.f32 %v686_v6, %v3987_v37 }
 0x1c8   :  { %2944 = vmatpush3.bf16.msra.mxu0 %v3159_v62 }
 0x1c9   :  { %2966 = vmatpush3.bf16.msra.mxu1 %v3160_v32  ;;  %2973 = vmatprep.subr.bf16.mxu0 %v3161_v0 }
 0x1ca   :  { %2995 = vmatprep.subr.bf16.mxu1 %v3162_v51  ;;  %v716_v51 = vstv %s4121_s21 }
 0x223   :  { %v557_v18 = vpop.permute.xlu1 %556 }
 0x225   :  { %v555_v58 = vpop.permute.xlu0 %554 }
 0x226   :  { %v559_v32 = vsel %vm558_vm7, %v555_v58, %v557_v18  ;;  %v560_v0 = vsel %vm558_vm7, %v557_v18, %v555_v58  ;;  %v814_v18 = vstv %s4149_s26 }
 0x227   :  { %v561_v30 = vmul.f32 %v4116_v22, %v560_v0  ;;  %v583_v63 = vmul.f32 %v581_v2, %v559_v32  ;;  %v623_v3 = vmul.f32 %v621_v54, %v559_v32  ;;  %v663_v53 = vmul.f32 %v661_v41, %v559_v32  ;;  %v566_v57 = vpop.permute.xlu1 %565 }
 0x229   :  { %v582_v6 = vmul.f32 %v581_v2, %v561_v30  ;;  %v588_v62 = vadd.f32 %v586_v1, %v583_v63  ;;  %v622_v35 = vmul.f32 %v621_v54, %v561_v30  ;;  %v564_v15 = vpop.permute.xlu0 %563  ;;  %v628_v58 = vadd.f32 %v626_v28, %v623_v3 }
 0x22a   :  { %v662_v50 = vmul.f32 %v661_v41, %v561_v30  ;;  %v567_v0 = vsel %vm558_vm7, %v564_v15, %v566_v57  ;;  %v568_v32 = vsel %vm558_vm7, %v566_v57, %v564_v15  ;;  %v668_v37 = vadd.f32 %v666_v19, %v663_v53 }
 0x22b   :  { %v587_v20 = vadd.f32 %v585_v24, %v582_v6  ;;  %v569_v29 = vmul.f32 %v4116_v22, %v568_v32  ;;  %v593_v2 = vmul.f32 %v591_v8, %v567_v0  ;;  %v627_v54 = vadd.f32 %v625_v61, %v622_v35  ;;  %v574_v19 = vpop.permute.xlu1 %573 }
 0x22c   :  { %v667_v1 = vadd.f32 %v665_v14, %v662_v50  ;;  %v633_v41 = vmul.f32 %v631_v23, %v567_v0  ;;  %v673_v28 = vmul.f32 %v671_v47, %v567_v0  ;;  %v820_v0 = vstv %s4202_s28 }
 0x22d   :  { %v592_v30 = vmul.f32 %v591_v8, %v569_v29  ;;  %v598_v63 = vadd.f32 %v596_v5, %v593_v2  ;;  %v632_v15 = vmul.f32 %v631_v23, %v569_v29  ;;  %v672_v24 = vmul.f32 %v671_v47, %v569_v29  ;;  %v572_v3 = vpop.permute.xlu0 %571 }
 0x22e   :  { %v638_v53 = vadd.f32 %v636_v36, %v633_v41  ;;  %v678_v57 = vadd.f32 %v676_v7, %v673_v28  ;;  %v575_v61 = vsel %vm558_vm7, %v572_v3, %v574_v19  ;;  %v576_v8 = vsel %vm558_vm7, %v574_v19, %v572_v3 }
 0x22f   :  { %v597_v5 = vadd.f32 %v4144_v52, %v592_v30  ;;  %v600_v23 = vadd.f32 %v598_v63, %v588_v62  ;;  %v637_v14 = vadd.f32 %v4147_v59, %v632_v15  ;;  %v677_v47 = vadd.f32 %v4154_v33, %v672_v24 }
 0x230   :  { %v640_v36 = vadd.f32 %v638_v53, %v628_v58  ;;  %v680_v7 = vadd.f32 %v678_v57, %v668_v37  ;;  %v577_v9 = vmul.f32 %v4116_v22, %v576_v8  ;;  %v605_v52 = vmul.f32 %v603_v13, %v575_v61 }
 0x231   :  { %v599_v35 = vadd.f32 %v597_v5, %v587_v20  ;;  %v639_v62 = vadd.f32 %v637_v14, %v627_v54  ;;  %v679_v59 = vadd.f32 %v677_v47, %v667_v1  ;;  %v645_v50 = vmul.f32 %v643_v11, %v575_v61 }
 0x232   :  { %v604_v33 = vmul.f32 %v603_v13, %v577_v9  ;;  %v610_v37 = vadd.f32 %v4162_v55, %v605_v52  ;;  %v644_v22 = vmul.f32 %v643_v11, %v577_v9  ;;  %v684_v29 = vmul.f32 %v683_v25, %v577_v9 }
 0x233   :  { %v650_v20 = vadd.f32 %v4170_v48, %v645_v50  ;;  %v685_v6 = vmul.f32 %v683_v25, %v575_v61  ;;  %v734_v58 = vstv %s4200_s27  ;;  %v783_v54 = vstv %s4210_s29  ;;  %s4613_s27 = sld [smem:[#allocation3 + $0x90]] }
 0x234   :  { %v609_v32 = vadd.f32 %v4159_v44, %v604_v33  ;;  %v612_v13 = vadd.f32 %v610_v37, %v600_v23  ;;  %v649_v55 = vadd.f32 %v4167_v56, %v644_v22  ;;  %v689_v11 = vadd.f32 %v4175_v21, %v684_v29 }
 0x235   :  { %v652_v2 = vadd.f32 %v650_v20, %v640_v36  ;;  %v690_v48 = vadd.f32 %v4178_v34, %v685_v6  ;;  %v826_v25 = vstv %s4212_s0  ;;  %v4813_v41 = vstv %s4101_s17 }
 0x236   :  { %v611_v1 = vadd.f32 %v609_v32, %v599_v35  ;;  %v616_v28 = vadd.f32 %v4813_v41, %v612_v13  ;;  %v651_v44 = vadd.f32 %v649_v55, %v639_v62  ;;  %v691_v30 = vadd.f32 %v689_v11, %v679_v59 }
 0x237   :  { %v4814_v63 = vstv %s4108_s19  ;;  %v692_v15 = vadd.f32 %v690_v48, %v680_v7  ;;  %v863_v21 = vstv %s4221_s30  ;;  %v869_v24 = vstv %s4223_s7  ;;  %s4410_s7 = sld [smem:[#allocation3 + $0x83]]  ;;  %s4621_s30 = sld [smem:[#allocation3 + $0x91]] }
 0x238   :  { %v656_v56 = vadd.f32 %v4814_v63, %v652_v2  ;;  %v4815_v19 = vmov %v4813_v41  ;;  %v4260_v3 = vmax.f32 %v616_v28, 0.0  ;;  %v4816_v53 = vmov %v4814_v63 }
 0x239   :  { %v615_v34 = vadd.f32 %v4815_v19, %v611_v1  ;;  %v655_v57 = vadd.f32 %v4816_v53, %v651_v44  ;;  %v4817_v61 = vstv %s4111_s20  ;;  %v832_v47 = vstv %s4230_s8 }
 0x23a   :  { %v695_v8 = vadd.f32 %v4817_v61, %v691_v30  ;;  %v4266_v5 = vmax.f32 %v656_v56, 0.0  ;;  %v4818_v23 = vmov %v4817_v61  ;;  %v875_v36 = vstv %s4232_s9 }
 0x23b   :  { %v696_v14 = vadd.f32 %v4818_v23, %v692_v15  ;;  %v4272_v7 = vmax.f32 %v615_v34, 0.0  ;;  %v4274_v9 = vmax.f32 %v655_v57, 0.0  ;;  %v718_v35 = vmul.f32 %v716_v51, %v4260_v3 }
 0x23c   :  { %v4276_v52 = vmax.f32 %v695_v8, 0.0  ;;  %v4819_v59 = vstv %s4123_s22  ;;  %v4820_v33 = vstv %s4131_s24  ;;  %v773_v22 = vmul.f32 %v771_v39, %v4266_v5  ;;  %s4450_s22 = sld [smem:[#allocation3 + $0x89]] }
 0x23d   :  { %v4281_v62 = vmax.f32 %v696_v14, 0.0  ;;  %v724_v50 = vmul.f32 %v4819_v59, %v4266_v5  ;;  %v767_v37 = vmul.f32 %v4820_v33, %v4260_v3  ;;  %v717_v29 = vmul.f32 %v716_v51, %v4272_v7 }
 0x23e   :  { %v720_v20 = vadd.f32 %v718_v35, %v3657_v31  ;;  %v4821_v6 = vmov %v4819_v59  ;;  %v4822_v13 = vstv %s4129_s23  ;;  %v4824_v48 = vmov %v4820_v33  ;;  %s4379_s23 = sld [smem:[#allocation3 + $0x81]] }
 0x23f   :  { %v723_v32 = vmul.f32 %v4821_v6, %v4274_v9  ;;  %v729_v55 = vmul.f32 %v4822_v13, %v4276_v52  ;;  %v4823_v11 = vmov %v4822_v13  ;;  %v766_v1 = vmul.f32 %v4824_v48, %v4272_v7 }
 0x240   :  { %v730_v2 = vmul.f32 %v4823_v11, %v4281_v62  ;;  %v769_v41 = vadd.f32 %v767_v37, %v3666_v46  ;;  %v772_v28 = vmul.f32 %v771_v39, %v4274_v9  ;;  %v719_v51 = vadd.f32 %v717_v29, %v3652_v38 }
 0x241   :  { %v726_v31 = vadd.f32 %v724_v50, %v720_v20  ;;  %v4825_v44 = vstv %s4139_s25  ;;  %v768_v15 = vadd.f32 %v766_v1, %v3664_v42  ;;  %v815_v34 = vmul.f32 %v814_v18, %v4272_v7  ;;  %s4392_s25 = sld [smem:[#allocation3 + $0x82]] }
 0x242   :  { %v778_v30 = vmul.f32 %v4825_v44, %v4276_v52  ;;  %v4826_v63 = vmov %v4825_v44  ;;  %v775_v19 = vadd.f32 %v773_v22, %v769_v41  ;;  %v816_v46 = vmul.f32 %v814_v18, %v4260_v3 }
 0x243   :  { %v779_v56 = vmul.f32 %v4826_v63, %v4281_v62  ;;  %v725_v38 = vadd.f32 %v723_v32, %v719_v51  ;;  %v732_v39 = vadd.f32 %v730_v2, %v726_v31  ;;  %v821_v53 = vmul.f32 %v820_v0, %v4274_v9  ;;  %v3163_v2 = vld [vmem:[%s4801_s3 + $0x100] sm:$0xff]   ;;  %v3165_v51 = vld [vmem:[%s4801_s3 + $0x148] sm:$0xff]  }
 0x244   :  { %v822_v57 = vmul.f32 %v820_v0, %v4266_v5  ;;  %v774_v42 = vadd.f32 %v772_v28, %v768_v15  ;;  %v817_v8 = vadd.f32 %v815_v34, %v3676_v4  ;;  %v818_v23 = vadd.f32 %v816_v46, %v3681_v27 }
 0x245   :  { %v781_v61 = vadd.f32 %v779_v56, %v775_v19  ;;  %v731_v18 = vadd.f32 %v729_v55, %v725_v38  ;;  %v736_v14 = vadd.f32 %v734_v58, %v732_v39  ;;  %v827_v35 = vmul.f32 %v826_v25, %v4276_v52 }
 0x246   :  { %v828_v59 = vmul.f32 %v826_v25, %v4281_v62  ;;  %v780_v50 = vadd.f32 %v778_v30, %v774_v42  ;;  %v823_v33 = vadd.f32 %v821_v53, %v817_v8  ;;  %v824_v37 = vadd.f32 %v822_v57, %v818_v23  ;;  %v3168_v8 = vld [vmem:[%s4801_s3 + $0x188] sm:$0xff]   ;;  %v3169_v23 = vld [vmem:[%s4801_s3 + $0x150] sm:$0xff]  }
 0x247   :  { %v785_v0 = vadd.f32 %v783_v54, %v781_v61  ;;  %v735_v4 = vadd.f32 %v734_v58, %v731_v18  ;;  %v738_v27 = vmax.f32 %v736_v14, 0.0  ;;  %v864_v22 = vmul.f32 %v863_v21, %v4272_v7 }
 0x248   :  { %v865_v29 = vmul.f32 %v863_v21, %v4260_v3  ;;  %v784_v25 = vadd.f32 %v783_v54, %v780_v50  ;;  %v4352_v6 = vadd.f32 %v827_v35, %v823_v33  ;;  %v830_v32 = vadd.f32 %v828_v59, %v824_v37  ;;  %v3170_v35 = vld [vmem:[%s4801_s3 + $0x1d0] sm:$0xff]  }
 0x249   :  { %v787_v20 = vmax.f32 %v785_v0, 0.0  ;;  %v737_v58 = vmax.f32 %v735_v4, 0.0  ;;  %v2914_v13 = vpack.c.bf16 %v738_v27, %v738_v27  ;;  %v866_v55 = vadd.f32 %v864_v22, %v3695_v26  ;;  %v3164_v26 = vld [vmem:[%s4801_s3 + $0x180] sm:$0xff]   ;;  %v3171_v27 = vld [vmem:[%s4801_s3 + $0x110] sm:$0xff]  }
 0x24a   :  { %v867_v21 = vadd.f32 %v865_v29, %v3697_v12  ;;  %v786_v11 = vmax.f32 %v784_v25, 0.0  ;;  %v834_v48 = vadd.f32 %v832_v47, %v830_v32  ;;  %v912_v1 = vstv %s4326_s10  ;;  %v3172_v32 = vld [vmem:[%s4801_s3 + $0x190] sm:$0xff]  }
 0x24b   :  { %v2916_v54 = vpack.c.bf16 %v787_v20, %v787_v20  ;;  %2212 = vmatprep.mubr.bf16.mxu0 %v2914_v13  ;;  %v2913_v41 = vpack.c.bf16 %v737_v58, %v737_v58  ;;  %v870_v12 = vmul.f32 %v869_v24, %v4274_v9  ;;  %v871_v28 = vmul.f32 %v869_v24, %v4266_v5  ;;  %v3166_v24 = vld [vmem:[%s4801_s3 + $0x1c8] sm:$0xff]  }
 0x24c   :  { %v918_v31 = vstv %s4330_s11  ;;  %v2915_v44 = vpack.c.bf16 %v786_v11, %v786_v11  ;;  %v836_v30 = vmax.f32 %v834_v48, 0.0  ;;  %v876_v63 = vmul.f32 %v875_v36, %v4276_v52  ;;  %s4418_s11 = sld [smem:[#allocation3 + $0x87]]  ;;  %v3174_v11 = vld [vmem:[%s4801_s3 + $0x1d8] sm:$0xff]  }
 0x24d   :  { %2252 = vmatprep.mubr.bf16.mxu1 %v2916_v54  ;;  %v877_v56 = vmul.f32 %v875_v36, %v4281_v62  ;;  %2213 = vmatmul.mubr.bf16.vlgmr.msra.gmra.mrb[0].mxu0 %v2913_v41  ;;  %v872_v15 = vadd.f32 %v870_v12, %v866_v55  ;;  %v873_v19 = vadd.f32 %v871_v28, %v867_v21  ;;  %v881_v39 = vstv %s4340_s12  ;;  %v3167_v36 = vld [vmem:[%s4801_s3 + $0x108] sm:$0xff]   ;;  %v3173_v21 = vld [vmem:[%s4801_s3 + $0x158] sm:$0xff]  }
 0x24e   :  { %v913_v34 = vmul.f32 %v912_v1, %v4272_v7  ;;  %v914_v46 = vmul.f32 %v912_v1, %v4260_v3  ;;  %2253 = vmatmul.mubr.bf16.vlgmr.msra.gmra.mrb[0].mxu1 %v2915_v44  ;;  %2974 = vmatpush3.bf16.msra.mxu0 %v3163_v2  ;;  %v2918_v38 = vpack.c.bf16 %v836_v30, %v836_v30  ;;  %v924_v57 = vstv %s4342_s13  ;;  %v3175_v28 = vld [vmem:[%s4801_s3 + $0x118] sm:$0xff]   ;;  %v3177_v30 = vld [vmem:[%s4801_s3 + $0x160] sm:$0xff]  }
 0x24f   :  { %v919_v53 = vmul.f32 %v918_v31, %v4274_v9  ;;  %2996 = vmatpush3.bf16.msra.mxu1 %v3164_v26  ;;  %v4400_v42 = vadd.f32 %v876_v63, %v872_v15  ;;  %v879_v61 = vadd.f32 %v877_v56, %v873_v19  ;;  %2975 = vmatprep.subr.bf16.mxu0 %v3165_v51  ;;  %v961_v14 = vstv %s4348_s14  ;;  %v3176_v44 = vld [vmem:[%s4801_s3 + $0x198] sm:$0xff]   ;;  %v3178_v15 = vld [vmem:[%s4801_s3 + $0x1e0] sm:$0xff]   ;;  %s4491_s14 = sld [smem:[#allocation3 + $0x8f]] }
 0x250   :  { %v915_v18 = vadd.f32 %v913_v34, %v3700_v16  ;;  %2292 = vmatprep.mubr.bf16.mxu0 %v2918_v38  ;;  %2997 = vmatprep.subr.bf16.mxu1 %v3166_v24  ;;  %v916_v59 = vadd.f32 %v914_v46, %v3705_v17  ;;  %v920_v50 = vmul.f32 %v918_v31, %v4266_v5  ;;  %v967_v0 = vstv %s4354_s15  ;;  %s4430_s15 = sld [smem:[#allocation3 + $0x88]] }
 0x251   :  { %v883_v33 = vadd.f32 %v881_v39, %v879_v61  ;;  %v925_v16 = vmul.f32 %v924_v57, %v4276_v52  ;;  %v973_v4 = vstv %s4358_s16  ;;  %v926_v17 = vmul.f32 %v924_v57, %v4281_v62  ;;  %v3179_v57 = vld [vmem:[%s4801_s3 + $0x120] sm:$0xff]  }
 0x252   :  { %v921_v37 = vadd.f32 %v919_v53, %v915_v18  ;;  %2976 = vmatpush3.bf16.msra.mxu0 %v3167_v36  ;;  %v922_v22 = vadd.f32 %v920_v50, %v916_v59  ;;  %v962_v29 = vmul.f32 %v961_v14, %v4272_v7  ;;  %v963_v25 = vmul.f32 %v961_v14, %v4260_v3  ;;  %v3182_v50 = vld [vmem:[%s4801_s3 + $0x1e8] sm:$0xff]  }
 0x253   :  { %v885_v20 = vmax.f32 %v883_v33, 0.0  ;;  %2998 = vmatpush3.bf16.msra.mxu1 %v3168_v8  ;;  %2977 = vmatprep.subr.bf16.mxu0 %v3169_v23  ;;  %v968_v13 = vmul.f32 %v967_v0, %v4274_v9  ;;  %v1010_v55 = vstv %s4379_s23  ;;  %v969_v1 = vmul.f32 %v967_v0, %v4266_v5 }
 0x254   :  { %v4435_v58 = vadd.f32 %v925_v16, %v921_v37  ;;  %2999 = vmatprep.subr.bf16.mxu1 %v3170_v35  ;;  %v4445_v54 = vadd.f32 %v926_v17, %v922_v22  ;;  %v964_v2 = vadd.f32 %v962_v29, %v3712_v40  ;;  %v965_v48 = vadd.f32 %v963_v25, %v3717_v45  ;;  %v3186_v25 = vld [vmem:[%s4801_s3 + $0x1f0] sm:$0xff]  }
 0x255   :  { %v2920_v41 = vpack.c.bf16 %v885_v20, %v885_v20  ;;  %v974_v26 = vmul.f32 %v973_v4, %v4276_v52  ;;  %v1016_v12 = vstv %s4392_s25  ;;  %v975_v40 = vmul.f32 %v973_v4, %v4281_v62 }
 0x256   :  { %2978 = vmatpush3.bf16.msra.mxu0 %v3171_v27  ;;  %v970_v51 = vadd.f32 %v968_v13, %v964_v2  ;;  %v971_v31 = vadd.f32 %v969_v1, %v965_v48  ;;  %v1011_v45 = vmul.f32 %v1010_v55, %v4272_v7  ;;  %v1012_v63 = vmul.f32 %v1010_v55, %v4260_v3  ;;  %v4827_v27 = vld [vmem:[#allocation6_spill] sm:$0xff]  ;;  %v3187_v13 = vld [vmem:[%s4801_s3 + $0x130] sm:$0xff]   ;;  %v3190_v1 = vld [vmem:[%s4801_s3 + $0x1f8] sm:$0xff]  }
 0x257   :  { %2332 = vmatprep.mubr.bf16.mxu1 %v2920_v41  ;;  %3000 = vmatpush3.bf16.msra.mxu1 %v3172_v32  ;;  %v1017_v56 = vmul.f32 %v1016_v12, %v4274_v9  ;;  %v1022_v24 = vstv %s4410_s7  ;;  %v1059_v38 = vstv %s4418_s11  ;;  %v1018_v53 = vmul.f32 %v1016_v12, %v4266_v5  ;;  %s4480_s7 = sld [smem:[#allocation3 + $0x8e]] }
 0x258   :  { %2979 = vmatprep.subr.bf16.mxu0 %v3173_v21  ;;  %3001 = vmatprep.subr.bf16.mxu1 %v3174_v11  ;;  %v4471_v19 = vadd.f32 %v974_v26, %v970_v51  ;;  %v977_v34 = vadd.f32 %v975_v40, %v971_v31  ;;  %v1013_v46 = vadd.f32 %v1011_v45, %v3721_v60  ;;  %v1065_v18 = vstv %s4430_s15  ;;  %v3180_v60 = vld [vmem:[%s4801_s3 + $0x1a0] sm:$0xff]   ;;  %v3189_v11 = vld [vmem:[%s4801_s3 + $0x178] sm:$0xff]  }
 0x259   :  { %v1014_v36 = vadd.f32 %v1012_v63, %v3723_v43  ;;  %v1023_v8 = vmul.f32 %v1022_v24, %v4276_v52  ;;  %v1024_v23 = vmul.f32 %v1022_v24, %v4281_v62  ;;  %v3181_v43 = vld [vmem:[%s4801_s3 + $0x168] sm:$0xff]   ;;  %v1060_v35 = vmul.f32 %v1059_v38, %v4272_v7  ;;  %v3195_v51 = vld [vmem:[%s4801_s3 + $0x200] sm:$0xff]  }
 0x25a   :  { %2980 = vmatpush3.bf16.msra.mxu0 %v3175_v28  ;;  %v1019_v61 = vadd.f32 %v1017_v56, %v1013_v46  ;;  %v1061_v59 = vmul.f32 %v1059_v38, %v4260_v3  ;;  %v1066_v33 = vmul.f32 %v1065_v18, %v4274_v9  ;;  %v1071_v37 = vstv %s4450_s22  ;;  %v3183_v3 = vld [vmem:[%s4801_s3 + $0x128] sm:$0xff]   ;;  %v3196_v45 = vld [vmem:[%s4801_s3 + $0x280] sm:$0xff]   ;;  %v3201_v46 = vld [vmem:[%s4801_s3 + $0x250] sm:$0xff]  }
 0x25b   :  { %3002 = vmatpush3.bf16.msra.mxu1 %v3176_v44  ;;  %2981 = vmatprep.subr.bf16.mxu0 %v3177_v30  ;;  %v1020_v14 = vadd.f32 %v1018_v53, %v1014_v36  ;;  %v1062_v4 = vadd.f32 %v1060_v35, %v3727_v49  ;;  %v1067_v7 = vmul.f32 %v1065_v18, %v4266_v5  ;;  %v3184_v9 = vld [vmem:[%s4801_s3 + $0x1a8] sm:$0xff]   ;;  %v3185_v49 = vld [vmem:[%s4801_s3 + $0x170] sm:$0xff]   ;;  %v979_v2 = vstv %s4491_s14  ;;  %v3209_v18 = vld [vmem:[%s4801_s3 + $0x260] sm:$0xff]  }
 0x25c   :  { %3003 = vmatprep.subr.bf16.mxu1 %v3178_v15  ;;  %v4498_v0 = vadd.f32 %v1023_v8, %v1019_v61  ;;  %v1063_v22 = vadd.f32 %v1061_v59, %v4827_v27  ;;  %v1072_v29 = vmul.f32 %v1071_v37, %v4276_v52  ;;  %v1073_v20 = vmul.f32 %v1071_v37, %v4281_v62  ;;  %v3188_v62 = vld [vmem:[%s4801_s3 + $0x1b0] sm:$0xff]   ;;  %v3197_v30 = vld [vmem:[%s4801_s3 + $0x248] sm:$0xff]   ;;  %v3206_v61 = vld [vmem:[%s4801_s3 + $0x2d8] sm:$0xff]  }
 0x25d   :  { %v4502_v16 = vadd.f32 %v1024_v23, %v1020_v14  ;;  %v1068_v17 = vadd.f32 %v1066_v33, %v1062_v4  ;;  %v930_v55 = vstv %s4480_s7  ;;  %v833_v52 = vadd.f32 %v832_v47, %v4352_v6  ;;  %v3191_v6 = vld [vmem:[%s4801_s3 + $0x138] sm:$0xff]   ;;  %v3198_v56 = vld [vmem:[%s4801_s3 + $0x2c8] sm:$0xff]   ;;  %v3202_v38 = vld [vmem:[%s4801_s3 + $0x2d0] sm:$0xff]  }
 0x25e   :  { %2982 = vmatpush3.bf16.msra.mxu0 %v3179_v57  ;;  %v1069_v5 = vadd.f32 %v1067_v7, %v1063_v22  ;;  %v882_v48 = vadd.f32 %v881_v39, %v4400_v42  ;;  %v932_v47 = vadd.f32 %v930_v55, %v4445_v54  ;;  %v981_v41 = vadd.f32 %v979_v2, %v977_v34  ;;  %v3192_v39 = vld [vmem:[%s4801_s3 + $0x1b8] sm:$0xff]   ;;  %v3193_v42 = vld [vmem:[%s4801_s3 + $0x240] sm:$0xff]   ;;  %v3199_v15 = vld [vmem:[%s4801_s3 + $0x208] sm:$0xff]  }
 0x25f   :  { %3004 = vmatpush3.bf16.msra.mxu1 %v3180_v60  ;;  %2983 = vmatprep.subr.bf16.mxu0 %v3181_v43  ;;  %v4521_v32 = vadd.f32 %v1072_v29, %v1068_v17  ;;  %v835_v26 = vmax.f32 %v833_v52, 0.0  ;;  %v3194_v54 = vld [vmem:[%s4801_s3 + $0x2c0] sm:$0xff]   ;;  %v3200_v34 = vld [vmem:[%s4801_s3 + $0x288] sm:$0xff]   ;;  %v3203_v36 = vld [vmem:[%s4801_s3 + $0x210] sm:$0xff]   ;;  %v1028_v22 = vstv %s4613_s27  ;;  %v931_v7 = vadd.f32 %v930_v55, %v4435_v58 }
 0x260   :  { %3005 = vmatprep.subr.bf16.mxu1 %v3182_v50  ;;  %v4527_v21 = vadd.f32 %v1073_v20, %v1069_v5  ;;  %v884_v12 = vmax.f32 %v882_v48, 0.0  ;;  %v934_v28 = vmax.f32 %v932_v47, 0.0  ;;  %v983_v31 = vmax.f32 %v981_v41, 0.0  ;;  %v3204_v53 = vld [vmem:[%s4801_s3 + $0x290] sm:$0xff]   ;;  %v3205_v57 = vld [vmem:[%s4801_s3 + $0x258] sm:$0xff]   ;;  %v3210_v60 = vld [vmem:[%s4801_s3 + $0x2e0] sm:$0xff]  }
 0x261   :  { %v2917_v40 = vpack.c.bf16 %v835_v26, %v835_v26  ;;  %v3207_v8 = vld [vmem:[%s4801_s3 + $0x218] sm:$0xff]   ;;  %v3211_v43 = vld [vmem:[%s4801_s3 + $0x220] sm:$0xff]   ;;  %v3213_v35 = vld [vmem:[%s4801_s3 + $0x268] sm:$0xff]   ;;  %v980_v17 = vadd.f32 %v979_v2, %v4471_v19  ;;  %v1030_v58 = vadd.f32 %v1028_v22, %v4502_v16  ;;  %v933_v20 = vmax.f32 %v931_v7, 0.0 }
 0x262   :  { %2984 = vmatpush3.bf16.msra.mxu0 %v3183_v3  ;;  %v2919_v44 = vpack.c.bf16 %v884_v12, %v884_v12  ;;  %v2922_v63 = vpack.c.bf16 %v934_v28, %v934_v28  ;;  %v2924_v24 = vpack.c.bf16 %v983_v31, %v983_v31  ;;  %v3208_v23 = vld [vmem:[%s4801_s3 + $0x298] sm:$0xff]   ;;  %v3212_v14 = vld [vmem:[%s4801_s3 + $0x2a0] sm:$0xff]   ;;  %v3214_v59 = vld [vmem:[%s4801_s3 + $0x2e8] sm:$0xff]  }
 0x263   :  { %3006 = vmatpush3.bf16.msra.mxu1 %v3184_v9  ;;  %2985 = vmatprep.subr.bf16.mxu0 %v3185_v49  ;;  %v3215_v50 = vld [vmem:[%s4801_s3 + $0x228] sm:$0xff]   ;;  %v3217_v37 = vld [vmem:[%s4801_s3 + $0x270] sm:$0xff]   ;;  %v3221_v9 = vld [vmem:[%s4801_s3 + $0x278] sm:$0xff]   ;;  %v1077_v49 = vstv %s4621_s30  ;;  %v982_v16 = vmax.f32 %v980_v17, 0.0  ;;  %v1032_v52 = vmax.f32 %v1030_v58, 0.0 }
 0x264   :  { %3007 = vmatprep.subr.bf16.mxu1 %v3186_v25  ;;  %v3216_v33 = vld [vmem:[%s4801_s3 + $0x2a8] sm:$0xff]   ;;  %v3218_v4 = vld [vmem:[%s4801_s3 + $0x2f0] sm:$0xff]   ;;  %v3222_v5 = vld [vmem:[%s4801_s3 + $0x2f8] sm:$0xff]   ;;  %v1079_v25 = vadd.f32 %v1077_v49, %v4527_v21 }
 0x265   :  { %v3219_v27 = vld [vmem:[%s4801_s3 + $0x230] sm:$0xff]   ;;  %v3223_v29 = vld [vmem:[%s4801_s3 + $0x238] sm:$0xff]   ;;  %v3226_v55 = vld [vmem:[%s4801_s3 + $0x3c0] sm:$0xff]   ;;  %v2923_v48 = vpack.c.bf16 %v982_v16, %v982_v16  ;;  %v2926_v47 = vpack.c.bf16 %v1032_v52, %v1032_v52 }
 0x266   :  { %2986 = vmatpush3.bf16.msra.mxu0 %v3187_v13  ;;  %v3220_v3 = vld [vmem:[%s4801_s3 + $0x2b0] sm:$0xff]   ;;  %v3224_v19 = vld [vmem:[%s4801_s3 + $0x2b8] sm:$0xff]   ;;  %v3225_v13 = vld [vmem:[%s4801_s3 + $0x340] sm:$0xff]  }
 0x267   :  { %3008 = vmatpush3.bf16.msra.mxu1 %v3188_v62  ;;  %2987 = vmatprep.subr.bf16.mxu0 %v3189_v11  ;;  %v3227_v21 = vld [vmem:[%s4801_s3 + $0x300] sm:$0xff]   ;;  %v1081_v62 = vmax.f32 %v1079_v25, 0.0  ;;  %v2921_v11 = vpack.c.bf16 %v933_v20, %v933_v20  ;;  %v3231_v26 = vld [vmem:[%s4801_s3 + $0x308] sm:$0xff]   ;;  %v3234_v12 = vld [vmem:[%s4801_s3 + $0x3d0] sm:$0xff]  }
 0x268   :  { %3009 = vmatprep.subr.bf16.mxu1 %v3190_v1  ;;  %v3228_v2 = vld [vmem:[%s4801_s3 + $0x380] sm:$0xff]   ;;  %v3229_v1 = vld [vmem:[%s4801_s3 + $0x348] sm:$0xff]   ;;  %v3236_v28 = vld [vmem:[%s4801_s3 + $0x390] sm:$0xff]  }
 0x269   :  { %v2928_v41 = vpack.c.bf16 %v1081_v62, %v1081_v62  ;;  %v3238_v31 = vld [vmem:[%s4801_s3 + $0x3d8] sm:$0xff]   ;;  %v1355_v7 = vld [vmem:[%s4800_s2] sm:$0xff] }
 0x26a   :  { %2988 = vmatpush3.bf16.msra.mxu0 %v3191_v6  ;;  %v3230_v6 = vld [vmem:[%s4801_s3 + $0x3c8] sm:$0xff]  }
 0x26b   :  { %3010 = vmatpush3.bf16.msra.mxu1 %v3192_v39  ;;  %3017 = vmatprep.subr.bf16.mxu0 %v3193_v42  ;;  %v3232_v39 = vld [vmem:[%s4801_s3 + $0x388] sm:$0xff]   ;;  %v3233_v42 = vld [vmem:[%s4801_s3 + $0x350] sm:$0xff]  }
 0x26c   :  { %3039 = vmatprep.subr.bf16.mxu1 %v3194_v54  ;;  %v3235_v54 = vld [vmem:[%s4801_s3 + $0x310] sm:$0xff]  }
 0x26d   :  { %2293 = vmatmul.mubr.bf16.vlgmr.msra.gmra.mrb[4].mxu0 %v2917_v40  ;;  %v3239_v40 = vld [vmem:[%s4801_s3 + $0x318] sm:$0xff]  }
 0x26e   :  { %2333 = vmatmul.mubr.bf16.vlgmr.msra.gmra.mrb[4].mxu1 %v2919_v44  ;;  %3018 = vmatpush3.bf16.msra.mxu0 %v3195_v51  ;;  %v3237_v51 = vld [vmem:[%s4801_s3 + $0x358] sm:$0xff]   ;;  %v3241_v44 = vld [vmem:[%s4801_s3 + $0x360] sm:$0xff]  }
 0x26f   :  { %2372 = vmatprep.mubr.bf16.mxu0 %v2922_v63  ;;  %3040 = vmatpush3.bf16.msra.mxu1 %v3196_v45  ;;  %v3240_v45 = vld [vmem:[%s4801_s3 + $0x398] sm:$0xff]   ;;  %v3243_v63 = vld [vmem:[%s4801_s3 + $0x320] sm:$0xff]  }
 0x270   :  { %2412 = vmatprep.mubr.bf16.mxu1 %v2924_v24  ;;  %3019 = vmatprep.subr.bf16.mxu0 %v3197_v30  ;;  %v3242_v30 = vld [vmem:[%s4801_s3 + $0x3e0] sm:$0xff]   ;;  %v3245_v24 = vld [vmem:[%s4801_s3 + $0x368] sm:$0xff]  }
 0x271   :  { %3041 = vmatprep.subr.bf16.mxu1 %v3198_v56  ;;  %v3244_v56 = vld [vmem:[%s4801_s3 + $0x3a0] sm:$0xff]  }
 0x272   :  { %3020 = vmatpush3.bf16.msra.mxu0 %v3199_v15  ;;  %v3246_v15 = vld [vmem:[%s4801_s3 + $0x3e8] sm:$0xff]  }
 0x273   :  { %3042 = vmatpush3.bf16.msra.mxu1 %v3200_v34  ;;  %3021 = vmatprep.subr.bf16.mxu0 %v3201_v46  ;;  %v3247_v34 = vld [vmem:[%s4801_s3 + $0x328] sm:$0xff]  }
 0x274   :  { %3043 = vmatprep.subr.bf16.mxu1 %v3202_v38  ;;  %v3248_v46 = vld [vmem:[%s4801_s3 + $0x3a8] sm:$0xff]   ;;  %v3249_v38 = vld [vmem:[%s4801_s3 + $0x370] sm:$0xff]  }
 0x276   :  { %3022 = vmatpush3.bf16.msra.mxu0 %v3203_v36  ;;  %v3250_v36 = vld [vmem:[%s4801_s3 + $0x3f0] sm:$0xff]  }
 0x277   :  { %3044 = vmatpush3.bf16.msra.mxu1 %v3204_v53  ;;  %3023 = vmatprep.subr.bf16.mxu0 %v3205_v57  ;;  %v3251_v53 = vld [vmem:[%s4801_s3 + $0x330] sm:$0xff]   ;;  %v1029_v57 = vadd.f32 %v1028_v22, %v4498_v0  ;;  %v3255_v0 = vld [vmem:[%s4801_s3 + $0x338] sm:$0xff]  }
 0x278   :  { %3045 = vmatprep.subr.bf16.mxu1 %v3206_v61  ;;  %v3252_v61 = vld [vmem:[%s4801_s3 + $0x3b0] sm:$0xff]  }
 0x27a   :  { %3024 = vmatpush3.bf16.msra.mxu0 %v3207_v8  ;;  %v3253_v8 = vld [vmem:[%s4801_s3 + $0x378] sm:$0xff]  }
 0x27b   :  { %3046 = vmatpush3.bf16.msra.mxu1 %v3208_v23  ;;  %3025 = vmatprep.subr.bf16.mxu0 %v3209_v18  ;;  %v1078_v23 = vadd.f32 %v1077_v49, %v4521_v32  ;;  %v3254_v18 = vld [vmem:[%s4801_s3 + $0x3f8] sm:$0xff]  }
 0x27c   :  { %3047 = vmatprep.subr.bf16.mxu1 %v3210_v60  ;;  %v1031_v60 = vmax.f32 %v1029_v57, 0.0 }
 0x27e   :  { %3026 = vmatpush3.bf16.msra.mxu0 %v3211_v43  ;;  %v3256_v43 = vld [vmem:[%s4801_s3 + $0x3b8] sm:$0xff]   ;;  %v2925_v32 = vpack.c.bf16 %v1031_v60, %v1031_v60 }
 0x27f   :  { %3048 = vmatpush3.bf16.msra.mxu1 %v3212_v14  ;;  %3027 = vmatprep.subr.bf16.mxu0 %v3213_v35  ;;  %v1080_v14 = vmax.f32 %v1078_v23, 0.0  ;;  %v2899_v23 = vld [vmem:[%s4803_s5] ss:$0 sm:$0xff] }
 0x280   :  { %3049 = vmatprep.subr.bf16.mxu1 %v3214_v59  ;;  %v3257_v59 = vld [vmem:[%s4802_s4] sm:$0xff]  }
 0x281   :  { %v2927_v35 = vpack.c.bf16 %v1080_v14, %v1080_v14 }
 0x282   :  { %3028 = vmatpush3.bf16.msra.mxu0 %v3215_v50  ;;  %v3258_v50 = vld [vmem:[%s4802_s4 + $0x8] sm:$0xff]  }
 0x283   :  { %3050 = vmatpush3.bf16.msra.mxu1 %v3216_v33  ;;  %3029 = vmatprep.subr.bf16.mxu0 %v3217_v37  ;;  %v3259_v33 = vld [vmem:[%s4802_s4 + $0x10] sm:$0xff]   ;;  %v3260_v37 = vld [vmem:[%s4802_s4 + $0x18] ss:$0 sps:$4 sm:$0xff]  }
 0x284   :  { %3051 = vmatprep.subr.bf16.mxu1 %v3218_v4  ;;  %v2543_v4 = vsel %vm2541_vm9, %v3260_v37, 0 }
 0x286   :  { %3030 = vmatpush3.bf16.msra.mxu0 %v3219_v27 }
 0x287   :  { %3052 = vmatpush3.bf16.msra.mxu1 %v3220_v3  ;;  %3031 = vmatprep.subr.bf16.mxu0 %v3221_v9 }
 0x288   :  { %3053 = vmatprep.subr.bf16.mxu1 %v3222_v5 }
 0x28a   :  { %3032 = vmatpush3.bf16.msra.mxu0 %v3223_v29 }
 0x28b   :  { %3054 = vmatpush3.bf16.msra.mxu1 %v3224_v19  ;;  %3061 = vmatprep.subr.bf16.mxu0 %v3225_v13 }
 0x28c   :  { %3083 = vmatprep.subr.bf16.mxu1 %v3226_v55 }
 0x28d   :  { %2373 = vmatmul.mubr.bf16.vlgmr.msra.gmra.mrb[8].mxu0 %v2921_v11 }
 0x28e   :  { %2413 = vmatmul.mubr.bf16.vlgmr.msra.gmra.mrb[8].mxu1 %v2923_v48  ;;  %3062 = vmatpush3.bf16.msra.mxu0 %v3227_v21 }
 0x28f   :  { %2452 = vmatprep.mubr.bf16.mxu0 %v2926_v47  ;;  %3084 = vmatpush3.bf16.msra.mxu1 %v3228_v2 }
 0x290   :  { %2492 = vmatprep.mubr.bf16.mxu1 %v2928_v41  ;;  %3063 = vmatprep.subr.bf16.mxu0 %v3229_v1 }
 0x291   :  { %3085 = vmatprep.subr.bf16.mxu1 %v3230_v6 }
 0x292   :  { %3064 = vmatpush3.bf16.msra.mxu0 %v3231_v26 }
 0x293   :  { %3086 = vmatpush3.bf16.msra.mxu1 %v3232_v39  ;;  %3065 = vmatprep.subr.bf16.mxu0 %v3233_v42 }
 0x294   :  { %3087 = vmatprep.subr.bf16.mxu1 %v3234_v12 }
 0x296   :  { %3066 = vmatpush3.bf16.msra.mxu0 %v3235_v54 }
 0x297   :  { %3088 = vmatpush3.bf16.msra.mxu1 %v3236_v28  ;;  %3067 = vmatprep.subr.bf16.mxu0 %v3237_v51 }
 0x298   :  { %3089 = vmatprep.subr.bf16.mxu1 %v3238_v31 }
 0x29a   :  { %3068 = vmatpush3.bf16.msra.mxu0 %v3239_v40 }
 0x29b   :  { %3090 = vmatpush3.bf16.msra.mxu1 %v3240_v45  ;;  %3069 = vmatprep.subr.bf16.mxu0 %v3241_v44 }
 0x29c   :  { %3091 = vmatprep.subr.bf16.mxu1 %v3242_v30 }
 0x29e   :  { %3070 = vmatpush3.bf16.msra.mxu0 %v3243_v63 }
 0x29f   :  { %3092 = vmatpush3.bf16.msra.mxu1 %v3244_v56  ;;  %3071 = vmatprep.subr.bf16.mxu0 %v3245_v24 }
 0x2a0   :  { %3093 = vmatprep.subr.bf16.mxu1 %v3246_v15 }
 0x2a2   :  { %3072 = vmatpush3.bf16.msra.mxu0 %v3247_v34 }
 0x2a3   :  { %3094 = vmatpush3.bf16.msra.mxu1 %v3248_v46  ;;  %3073 = vmatprep.subr.bf16.mxu0 %v3249_v38 }
 0x2a4   :  { %3095 = vmatprep.subr.bf16.mxu1 %v3250_v36 }
 0x2a6   :  { %3074 = vmatpush3.bf16.msra.mxu0 %v3251_v53 }
 0x2a7   :  { %3096 = vmatpush3.bf16.msra.mxu1 %v3252_v61  ;;  %3075 = vmatprep.subr.bf16.mxu0 %v3253_v8 }
 0x2a8   :  { %3097 = vmatprep.subr.bf16.mxu1 %v3254_v18 }
 0x2aa   :  { %3076 = vmatpush3.bf16.msra.mxu0 %v3255_v0 }
 0x2ab   :  { %3098 = vmatpush3.bf16.msra.mxu1 %v3256_v43  ;;  %3110 = vmatprep.subr.bf16.mxu0 %v4811_v10 }
 0x2ad   :  { %2453 = vmatmul.mubr.bf16.vlgmr.msra.gmra.mrb[12].mxu0 %v2925_v32 }
 0x2ae   :  { %2493 = vmatmul.mubr.bf16.vlgmr.msra.gmra.mrb[12].mxu1 %v2927_v35  ;;  %3111 = vmatpush3.bf16.msra.mxu0 %v3257_v59 }
 0x2af   :  { %3112 = vmatprep.subr.bf16.mxu0 %v4811_v10  ;;  %3118 = vmatprep.mubr.msk.bf16.mxu0 %vm3281_vm8, %v4811_v10 }
 0x2b2   :  { %3113 = vmatpush3.bf16.msra.mxu0 %v3258_v50 }
 0x2b3   :  { %3114 = vmatprep.subr.bf16.mxu0 %v4811_v10 }
 0x2b6   :  { %3115 = vmatpush3.bf16.msra.mxu0 %v3259_v33 }
 0x2b7   :  { %3116 = vmatprep.subr.bf16.mxu0 %v4811_v10 }
 0x2ba   :  { %3117 = vmatpush3.bf16.msra.mxu0 %v2543_v4 }
 0x320   :  { %v2945_v27 = vpop.f32.mrb[0].mxu0 }
 0x321   :  { %v2967_v22 = vpop.f32.mrb[0].mxu1  ;;  %v2946_v3 = vpop.f32.mrb[1].mxu0 }
 0x322   :  { %v2947_v9 = vadd.f32 %v2946_v3, %v2945_v27  ;;  %v2968_v49 = vpop.f32.mrb[1].mxu1  ;;  %v2948_v17 = vpop.f32.mrb[2].mxu0 }
 0x323   :  { %v2969_v5 = vadd.f32 %v2968_v49, %v2967_v22  ;;  %v2970_v58 = vpop.f32.mrb[2].mxu1  ;;  %v2949_v29 = vpop.f32.mrb[3].mxu0 }
 0x324   :  { %v2215_v25 = vadd.f32 %v2947_v9, %v1355_v7  ;;  %v2971_v20 = vpop.f32.mrb[3].mxu1 }
 0x326   :  { %v2255_v19 = vadd.f32 %v2969_v5, %v2215_v25 }
 0x340   :  { %v2989_v13 = vpop.f32.mrb[4].mxu0 }
 0x341   :  { %v3011_v10 = vpop.f32.mrb[4].mxu1  ;;  %v2990_v16 = vpop.f32.mrb[5].mxu0 }
 0x342   :  { %v2991_v55 = vadd.f32 %v2990_v16, %v2989_v13  ;;  %v3012_v52 = vpop.f32.mrb[5].mxu1  ;;  %v2992_v21 = vpop.f32.mrb[6].mxu0 }
 0x343   :  { %v3013_v62 = vadd.f32 %v3012_v52, %v3011_v10  ;;  %v3014_v11 = vpop.f32.mrb[6].mxu1  ;;  %v2993_v2 = vpop.f32.mrb[7].mxu0 }
 0x344   :  { %v2295_v48 = vadd.f32 %v2991_v55, %v2255_v19  ;;  %v3015_v1 = vpop.f32.mrb[7].mxu1 }
 0x346   :  { %v2335_v47 = vadd.f32 %v3013_v62, %v2295_v48 }
 0x360   :  { %v3033_v6 = vpop.f32.mrb[8].mxu0 }
 0x361   :  { %v3055_v41 = vpop.f32.mrb[8].mxu1  ;;  %v3034_v26 = vpop.f32.mrb[9].mxu0 }
 0x362   :  { %v3035_v39 = vadd.f32 %v3034_v26, %v3033_v6  ;;  %v3056_v42 = vpop.f32.mrb[9].mxu1  ;;  %v3036_v12 = vpop.f32.mrb[10].mxu0 }
 0x363   :  { %v3057_v54 = vadd.f32 %v3056_v42, %v3055_v41  ;;  %v3058_v28 = vpop.f32.mrb[10].mxu1  ;;  %v3037_v51 = vpop.f32.mrb[11].mxu0 }
 0x364   :  { %v2375_v31 = vadd.f32 %v3035_v39, %v2335_v47  ;;  %v3059_v40 = vpop.f32.mrb[11].mxu1 }
 0x366   :  { %v2415_v45 = vadd.f32 %v3057_v54, %v2375_v31 }
 0x380   :  { %v3077_v44 = vpop.f32.mrb[12].mxu0 }
 0x381   :  { %v3099_v30 = vpop.f32.mrb[12].mxu1  ;;  %v3078_v63 = vpop.f32.mrb[13].mxu0 }
 0x382   :  { %v3079_v56 = vadd.f32 %v3078_v63, %v3077_v44  ;;  %v3100_v24 = vpop.f32.mrb[13].mxu1  ;;  %v3080_v15 = vpop.f32.mrb[14].mxu0 }
 0x383   :  { %v3101_v34 = vadd.f32 %v3100_v24, %v3099_v30  ;;  %v3102_v46 = vpop.f32.mrb[14].mxu1  ;;  %v3081_v38 = vpop.f32.mrb[15].mxu0 }
 0x384   :  { %v2455_v36 = vadd.f32 %v3079_v56, %v2415_v45  ;;  %v3103_v53 = vpop.f32.mrb[15].mxu1 }
 0x386   :  { %v2495_v57 = vadd.f32 %v3101_v34, %v2455_v36 }
 0x388   :  { %v2500_v61 = vmax.f32 %v2495_v57, 0.0 }
 0x38a   :  { %v2501_v8 = vpack.c.bf16 %v2500_v61, %v2500_v61 }
 0x38c   :  { %3119 = vmatmul.mubr.msk.bf16.vlgmr.msra.gmra.mrb[16].mxu0 %vm2537_vm10, %v2501_v8 }
 0x45f   :  { %v2579_v18 = vpop.f32.mrb[16].mxu0 }
 0x460   :  { %v2580_v0 = vadd.f32 %v2899_v23, %v2579_v18  ;;  %v3120_v60 = vpop.f32.mrb[17].mxu0 }
 0x461   :  { %v2582_v43 = vpop.f32.mrb[18].mxu0 }
 0x462   :  { %2586 = vst.msk [vmem:[%s4804_s6] sm:$0xff] %vm2585_vm11, %v2580_v0  ;;  %v3121_v14 = vpop.f32.mrb[19].mxu0 }
 0x463   :  { %2591 = vsyncpa [#allocation4], 1 }

</bundles_post_ra>
